<compile_context>
chip_gen: v7x
topology: tpu7x:2x2x1
jax: 0.10.0
libtpu: 0.0.40
codegen_flags: <defaults>
</compile_context>

<pallas_src>
import functools

import numpy as np
import jax
import jax.numpy as jnp
from jax import lax
from jax.experimental import pallas as pl
from jax.experimental.pallas import tpu as pltpu

NEG_SLOPE = 0.01  # torch.nn.LeakyReLU() default negative_slope


# ----------------------------------------------------------------------------
# Fused encoder kernel: 5 matmuls + bias + LeakyReLU / softplus, all in VMEM.
# One grid step per TM-row tile of the (padded) batch.
# ----------------------------------------------------------------------------
def _encoder_kernel(x_ref,
                    m1_ref, b1_ref, m2_ref, b2_ref, m3_ref, b3_ref,
                    fcw_ref, fcb_ref, hw_ref, hb_ref,
                    out_ref, *, latent_dim):
    def dense(h_bf16, w_ref, b_ref, act):
        acc = jnp.dot(h_bf16, w_ref[...], preferred_element_type=jnp.float32)
        acc = acc + b_ref[...]
        if act:
            acc = jnp.where(acc >= 0.0, acc, NEG_SLOPE * acc)
        return acc

    h = x_ref[...]                                              # (TM, C*H*W) bf16

    h = dense(h, m1_ref, b1_ref, True).astype(jnp.bfloat16)     # conv1 + LeakyReLU
    h = dense(h, m2_ref, b2_ref, True).astype(jnp.bfloat16)     # conv2 + LeakyReLU
    h = dense(h, m3_ref, b3_ref, True).astype(jnp.bfloat16)     # conv3 + LeakyReLU
    lat = dense(h, fcw_ref, fcb_ref, False).astype(jnp.bfloat16)  # fc -> latent

    # Fused heads: (TM, out_w) f32 slab = [ mu | sigma_pre | zero-pad ]
    head = dense(lat, hw_ref, hb_ref, False)

    # softplus on the sigma lanes only: softplus(x) = max(x,0) + log1p(exp(-|x|))
    lane = lax.broadcasted_iota(jnp.int32, head.shape, 1)
    sig_mask = (lane >= latent_dim) & (lane < 2 * latent_dim)
    sp = jnp.maximum(head, 0.0) + jnp.log1p(jnp.exp(-jnp.abs(head))) + 1e-7

    out_ref[...] = jnp.where(sig_mask, sp, head)                # one lane-dense store


def conv2d_encoder_forward(dense_params, x_nchw, latent_dim):
    """Returns (mu, sigma), each (N, latent_dim) f32."""
    n, c, h, w = x_nchw.shape
    d0 = c * h * w
    dp = dense_params
    out_w = dp["head_w"].shape[1]

    # Free reshape: (c, h, w) flatten order matches NCHW memory layout.
    # bf16 cast in the wrapper (halves input DMA bytes per block).
    x2 = x_nchw.reshape(n, d0).astype(jnp.bfloat16)

    # Pad batch to a multiple of 8 sublanes; tile by 256 rows (MXU-native on
    # v6e/v7x, multiple of 128 for v5e) when the batch is large, otherwise one
    # grid step for the whole batch.
    TM_MAX = 256
    n_pad = max(8, -(-n // 8) * 8)
    if n_pad > TM_MAX:
        n_pad = -(-n_pad // TM_MAX) * TM_MAX
        tm = TM_MAX
    else:
        tm = n_pad
    if n_pad != n:
        x2 = jnp.pad(x2, ((0, n_pad - n), (0, 0)))
    grid = (n_pad // tm,)

    def resident(a):  # small weight array, fully resident in VMEM every grid step
        return pl.BlockSpec(a.shape, lambda i: (0,) * a.ndim)

    kernel = functools.partial(_encoder_kernel, latent_dim=latent_dim)

    out = pl.pallas_call(
        kernel,
        out_shape=jax.ShapeDtypeStruct((n_pad, out_w), jnp.float32),
        grid_spec=pltpu.PrefetchScalarGridSpec(
            num_scalar_prefetch=0,
            grid=grid,
            in_specs=[
                pl.BlockSpec((tm, d0), lambda i: (i, 0)),        # image slab
                resident(dp["m1"]), resident(dp["b1"]),
                resident(dp["m2"]), resident(dp["b2"]),
                resident(dp["m3"]), resident(dp["b3"]),
                resident(dp["fc_w"]), resident(dp["fc_b"]),
                resident(dp["head_w"]), resident(dp["head_b"]),
            ],
            out_specs=pl.BlockSpec((tm, out_w), lambda i: (i, 0)),
        ),
        # >=2 real blocks along the batch axis engage both v7x TensorCores when
        # the (padded) batch exceeds one tile.
        compiler_params=pltpu.CompilerParams(dimension_semantics=("parallel",)),
    )(x2,
      dp["m1"], dp["b1"], dp["m2"], dp["b2"], dp["m3"], dp["b3"],
      dp["fc_w"], dp["fc_b"], dp["head_w"], dp["head_b"])

    mu = out[:n, :latent_dim]
    sigma = out[:n, latent_dim:2 * latent_dim]
    return mu, sigma


# ----------------------------------------------------------------------------
# Offline (host, once): lower each Conv2d(k=4, s=2, p=1) to a dense matrix on
# the (c, h, w)-flattened feature vector.  y_flat = x_flat @ M + b_rep.
# ----------------------------------------------------------------------------
def conv_as_dense(w_torch, hi, wi, stride=2, pad=1):
    w_np = np.asarray(w_torch, np.float32)          # (Cout, Cin, kH, kW)
    cout, cin, kh, kw = w_np.shape
    ho = (hi + 2 * pad - kh) // stride + 1
    wo = (wi + 2 * pad - kw) // stride + 1
    m = np.zeros((cin * hi * wi, cout * ho * wo), np.float32)
    ci_idx = np.arange(cin)
    co_idx = np.arange(cout)
    for ky in range(kh):
        for kx in range(kw):
            wt = w_np[:, :, ky, kx].T               # (Cin, Cout)
            for oy in range(ho):
                iy = stride * oy + ky - pad
                if iy < 0 or iy >= hi:
                    continue
                for ox in range(wo):
                    ix = stride * ox + kx - pad
                    if ix < 0 or ix >= wi:
                        continue
                    rows = ci_idx * hi * wi + iy * wi + ix
                    cols = co_idx * ho * wo + oy * wo + ox
                    m[np.ix_(rows, cols)] = wt
    return m, ho, wo


def densify_params(p, height, width, latent_dim):
    m1, h1, w1 = conv_as_dense(p["w1"], height, width)
    m2, h2, w2 = conv_as_dense(p["w2"], h1, w1)
    m3, h3, w3 = conv_as_dense(p["w3"], h2, w2)

    def rep_bias(b, n_spatial):
        return jnp.asarray(np.repeat(np.asarray(b, np.float32), n_spatial)[None, :])

    # Fused mu|sigma head, zero-padded to a lane-dense width (>=128, multiple of 128).
    out_w = max(128, -(-(2 * latent_dim) // 128) * 128)
    head_w = np.zeros((latent_dim, out_w), np.float32)
    head_w[:, :latent_dim] = np.asarray(p["mu_w"], np.float32).T
    head_w[:, latent_dim:2 * latent_dim] = np.asarray(p["sg_w"], np.float32).T
    head_b = np.zeros((1, out_w), np.float32)
    head_b[0, :latent_dim] = np.asarray(p["mu_b"], np.float32)
    head_b[0, latent_dim:2 * latent_dim] = np.asarray(p["sg_b"], np.float32)

    return dict(
        m1=jnp.asarray(m1, jnp.bfloat16), b1=rep_bias(p["b1"], h1 * w1),
        m2=jnp.asarray(m2, jnp.bfloat16), b2=rep_bias(p["b2"], h2 * w2),
        m3=jnp.asarray(m3, jnp.bfloat16), b3=rep_bias(p["b3"], h3 * w3),
        fc_w=jnp.asarray(np.asarray(p["fc_w"], np.float32).T, jnp.bfloat16),
        fc_b=jnp.asarray(np.asarray(p["fc_b"], np.float32)[None, :]),
        head_w=jnp.asarray(head_w, jnp.bfloat16),
        head_b=jnp.asarray(head_b),
    )


# ----------------------------------------------------------------------------
# Plain-JAX reference (XLA conv, f32 HIGHEST) for a correctness cross-check.
# ----------------------------------------------------------------------------
def reference_forward(params, x):
    def conv(xi, w, b):
        y = lax.conv_general_dilated(
            xi, w, window_strides=(2, 2), padding=((1, 1), (1, 1)),
            dimension_numbers=("NCHW", "OIHW", "NCHW"),
            precision=lax.Precision.HIGHEST)
        y = y + b.reshape(1, -1, 1, 1)
        return jnp.where(y >= 0, y, NEG_SLOPE * y)

    y = conv(x, params["w1"], params["b1"])
    y = conv(y, params["w2"], params["b2"])
    y = conv(y, params["w3"], params["b3"])
    n = x.shape[0]
    lat = y.reshape(n, -1) @ params["fc_w"].T + params["fc_b"]
    mu = lat @ params["mu_w"].T + params["mu_b"]
    pre = lat @ params["sg_w"].T + params["sg_b"]
    sigma = jnp.logaddexp(pre, 0.0) + 1e-7
    return mu, sigma


# ----------------------------------------------------------------------------
# Deterministic synthetic parameters (PyTorch layouts)
# ----------------------------------------------------------------------------
def init_params(key, height, width, channels, latent_dim):
    c1, c2, c3 = 16, 32, 64
    h8, w8 = height // 8, width // 8
    fc_in = c3 * h8 * w8
    ks = jax.random.split(key, 12)

    def uni(k, shape, fan_in):
        bound = 1.0 / np.sqrt(fan_in)
        return jax.random.uniform(k, shape, jnp.float32, -bound, bound)

    return dict(
        w1=uni(ks[0], (c1, channels, 4, 4), channels * 16), b1=uni(ks[1], (c1,), channels * 16),
        w2=uni(ks[2], (c2, c1, 4, 4), c1 * 16),             b2=uni(ks[3], (c2,), c1 * 16),
        w3=uni(ks[4], (c3, c2, 4, 4), c2 * 16),             b3=uni(ks[5], (c3,), c2 * 16),
        fc_w=uni(ks[6], (latent_dim, fc_in), fc_in),        fc_b=uni(ks[7], (latent_dim,), fc_in),
        mu_w=uni(ks[8], (latent_dim, latent_dim), latent_dim), mu_b=uni(ks[9], (latent_dim,), latent_dim),
        sg_w=uni(ks[10], (latent_dim, latent_dim), latent_dim), sg_b=uni(ks[11], (latent_dim,), latent_dim),
    )


if __name__ == "__main__":
    HEIGHT, WIDTH, CHANNELS, LATENT_DIM, BATCH = 16, 16, 3, 32, 2

    key = jax.random.PRNGKey(0)
    params = init_params(key, HEIGHT, WIDTH, CHANNELS, LATENT_DIM)
    dense_params = densify_params(params, HEIGHT, WIDTH, LATENT_DIM)
    x = jax.random.normal(jax.random.fold_in(key, 123),
                          (BATCH, CHANNELS, HEIGHT, WIDTH), jnp.float32)

    mu, sigma = conv2d_encoder_forward(dense_params, x, LATENT_DIM)
    mu = jax.block_until_ready(mu)
    sigma = jax.block_until_ready(sigma)
    assert mu.shape == (BATCH, LATENT_DIM), mu.shape
    assert sigma.shape == (BATCH, LATENT_DIM), sigma.shape
    assert bool(jnp.all(sigma > 0.0))

    ref_mu, ref_sigma = reference_forward(params, x)
    # bf16 MXU inputs with f32 accumulation vs f32-HIGHEST reference.
    np.testing.assert_allclose(np.asarray(mu), np.asarray(ref_mu), rtol=2e-2, atol=2e-2)
    np.testing.assert_allclose(np.asarray(sigma), np.asarray(ref_sigma), rtol=2e-2, atol=2e-2)

    print("KERNEL_OK")
</pallas_src>

<mosaic_0001>
module attributes {stable_mosaic.version = 11 : i64} {
  func.func @_encoder_kernel(%arg0: i32, %arg1: memref<8x768xbf16, #tpu.memory_space<vmem>>, %arg2: memref<768x1024xbf16, #tpu.memory_space<vmem>>, %arg3: memref<1x1024xf32, #tpu.memory_space<vmem>>, %arg4: memref<1024x512xbf16, #tpu.memory_space<vmem>>, %arg5: memref<1x512xf32, #tpu.memory_space<vmem>>, %arg6: memref<512x256xbf16, #tpu.memory_space<vmem>>, %arg7: memref<1x256xf32, #tpu.memory_space<vmem>>, %arg8: memref<256x32xbf16, #tpu.memory_space<vmem>>, %arg9: memref<1x32xf32, #tpu.memory_space<vmem>>, %arg10: memref<32x128xbf16, #tpu.memory_space<vmem>>, %arg11: memref<1x128xf32, #tpu.memory_space<vmem>>, %arg12: memref<8x128xf32, #tpu.memory_space<vmem>>) attributes {dimension_semantics = [#tpu.dimension_semantics<parallel>], iteration_bounds = array<i64: 1>, scalar_prefetch = 0 : i64, scratch_operands = 0 : i64, tpu.core_type = #tpu.core_type<tc>, window_params = [{transform_indices = @transform_0, window_bounds = array<i64: 8, 768>}, {pipeline_mode = #tpu.pipeline_mode<synchronous>, transform_indices = @transform_1, window_bounds = array<i64: 768, 1024>}, {pipeline_mode = #tpu.pipeline_mode<synchronous>, transform_indices = @transform_2, window_bounds = array<i64: 1, 1024>}, {pipeline_mode = #tpu.pipeline_mode<synchronous>, transform_indices = @transform_3, window_bounds = array<i64: 1024, 512>}, {pipeline_mode = #tpu.pipeline_mode<synchronous>, transform_indices = @transform_4, window_bounds = array<i64: 1, 512>}, {pipeline_mode = #tpu.pipeline_mode<synchronous>, transform_indices = @transform_5, window_bounds = array<i64: 512, 256>}, {pipeline_mode = #tpu.pipeline_mode<synchronous>, transform_indices = @transform_6, window_bounds = array<i64: 1, 256>}, {pipeline_mode = #tpu.pipeline_mode<synchronous>, transform_indices = @transform_7, window_bounds = array<i64: 256, 32>}, {pipeline_mode = #tpu.pipeline_mode<synchronous>, transform_indices = @transform_8, window_bounds = array<i64: 1, 32>}, {pipeline_mode = #tpu.pipeline_mode<synchronous>, transform_indices = @transform_9, window_bounds = array<i64: 32, 128>}, {pipeline_mode = #tpu.pipeline_mode<synchronous>, transform_indices = @transform_10, window_bounds = array<i64: 1, 128>}, {transform_indices = @transform_11, window_bounds = array<i64: 8, 128>}]} {
    %c0 = arith.constant 0 : index
    %c0_0 = arith.constant 0 : index
    %0 = vector.load %arg1[%c0, %c0_0] : memref<8x768xbf16, #tpu.memory_space<vmem>>, vector<8x768xbf16>
    %c0_1 = arith.constant 0 : index
    %c0_2 = arith.constant 0 : index
    %1 = vector.load %arg2[%c0_1, %c0_2] : memref<768x1024xbf16, #tpu.memory_space<vmem>>, vector<768x1024xbf16>
    %cst = arith.constant dense<0.000000e+00> : vector<8x1024xf32>
    %2 = tpu.matmul %0, %1, %cst {dimension_numbers = #tpu.dot_dimension_numbers<[1], [0], [0], [1], [0, 0, 1, 1], [], []>} : vector<8x768xbf16>, vector<768x1024xbf16>, vector<8x1024xf32> -> vector<8x1024xf32>
    %c0_3 = arith.constant 0 : index
    %c0_4 = arith.constant 0 : index
    %3 = vector.load %arg3[%c0_3, %c0_4] : memref<1x1024xf32, #tpu.memory_space<vmem>>, vector<1x1024xf32>
    %4 = vector.broadcast %3 : vector<1x1024xf32> to vector<8x1024xf32>
    %5 = arith.addf %2, %4 : vector<8x1024xf32>
    %cst_5 = arith.constant 0.000000e+00 : f32
    %6 = vector.broadcast %cst_5 : f32 to vector<8x1024xf32>
    %7 = arith.cmpf oge, %5, %6 : vector<8x1024xf32>
    %cst_6 = arith.constant 0.00999999977 : f32
    %8 = vector.broadcast %cst_6 : f32 to vector<8x1024xf32>
    %9 = arith.mulf %8, %5 : vector<8x1024xf32>
    %10 = arith.select %7, %5, %9 : vector<8x1024xi1>, vector<8x1024xf32>
    %11 = arith.truncf %10 : vector<8x1024xf32> to vector<8x1024xbf16>
    %c0_7 = arith.constant 0 : index
    %c0_8 = arith.constant 0 : index
    %12 = vector.load %arg4[%c0_7, %c0_8] : memref<1024x512xbf16, #tpu.memory_space<vmem>>, vector<1024x512xbf16>
    %cst_9 = arith.constant dense<0.000000e+00> : vector<8x512xf32>
    %13 = tpu.matmul %11, %12, %cst_9 {dimension_numbers = #tpu.dot_dimension_numbers<[1], [0], [0], [1], [0, 0, 1, 1], [], []>} : vector<8x1024xbf16>, vector<1024x512xbf16>, vector<8x512xf32> -> vector<8x512xf32>
    %c0_10 = arith.constant 0 : index
    %c0_11 = arith.constant 0 : index
    %14 = vector.load %arg5[%c0_10, %c0_11] : memref<1x512xf32, #tpu.memory_space<vmem>>, vector<1x512xf32>
    %15 = vector.broadcast %14 : vector<1x512xf32> to vector<8x512xf32>
    %16 = arith.addf %13, %15 : vector<8x512xf32>
    %cst_12 = arith.constant 0.000000e+00 : f32
    %17 = vector.broadcast %cst_12 : f32 to vector<8x512xf32>
    %18 = arith.cmpf oge, %16, %17 : vector<8x512xf32>
    %cst_13 = arith.constant 0.00999999977 : f32
    %19 = vector.broadcast %cst_13 : f32 to vector<8x512xf32>
    %20 = arith.mulf %19, %16 : vector<8x512xf32>
    %21 = arith.select %18, %16, %20 : vector<8x512xi1>, vector<8x512xf32>
    %22 = arith.truncf %21 : vector<8x512xf32> to vector<8x512xbf16>
    %c0_14 = arith.constant 0 : index
    %c0_15 = arith.constant 0 : index
    %23 = vector.load %arg6[%c0_14, %c0_15] : memref<512x256xbf16, #tpu.memory_space<vmem>>, vector<512x256xbf16>
    %cst_16 = arith.constant dense<0.000000e+00> : vector<8x256xf32>
    %24 = tpu.matmul %22, %23, %cst_16 {dimension_numbers = #tpu.dot_dimension_numbers<[1], [0], [0], [1], [0, 0, 1, 1], [], []>} : vector<8x512xbf16>, vector<512x256xbf16>, vector<8x256xf32> -> vector<8x256xf32>
    %c0_17 = arith.constant 0 : index
    %c0_18 = arith.constant 0 : index
    %25 = vector.load %arg7[%c0_17, %c0_18] : memref<1x256xf32, #tpu.memory_space<vmem>>, vector<1x256xf32>
    %26 = vector.broadcast %25 : vector<1x256xf32> to vector<8x256xf32>
    %27 = arith.addf %24, %26 : vector<8x256xf32>
    %cst_19 = arith.constant 0.000000e+00 : f32
    %28 = vector.broadcast %cst_19 : f32 to vector<8x256xf32>
    %29 = arith.cmpf oge, %27, %28 : vector<8x256xf32>
    %cst_20 = arith.constant 0.00999999977 : f32
    %30 = vector.broadcast %cst_20 : f32 to vector<8x256xf32>
    %31 = arith.mulf %30, %27 : vector<8x256xf32>
    %32 = arith.select %29, %27, %31 : vector<8x256xi1>, vector<8x256xf32>
    %33 = arith.truncf %32 : vector<8x256xf32> to vector<8x256xbf16>
    %c0_21 = arith.constant 0 : index
    %c0_22 = arith.constant 0 : index
    %34 = vector.load %arg8[%c0_21, %c0_22] : memref<256x32xbf16, #tpu.memory_space<vmem>>, vector<256x32xbf16>
    %cst_23 = arith.constant dense<0.000000e+00> : vector<8x32xf32>
    %35 = tpu.matmul %33, %34, %cst_23 {dimension_numbers = #tpu.dot_dimension_numbers<[1], [0], [0], [1], [0, 0, 1, 1], [], []>} : vector<8x256xbf16>, vector<256x32xbf16>, vector<8x32xf32> -> vector<8x32xf32>
    %c0_24 = arith.constant 0 : index
    %c0_25 = arith.constant 0 : index
    %36 = vector.load %arg9[%c0_24, %c0_25] : memref<1x32xf32, #tpu.memory_space<vmem>>, vector<1x32xf32>
    %37 = vector.broadcast %36 : vector<1x32xf32> to vector<8x32xf32>
    %38 = arith.addf %35, %37 : vector<8x32xf32>
    %39 = arith.truncf %38 : vector<8x32xf32> to vector<8x32xbf16>
    %c0_26 = arith.constant 0 : index
    %c0_27 = arith.constant 0 : index
    %40 = vector.load %arg10[%c0_26, %c0_27] : memref<32x128xbf16, #tpu.memory_space<vmem>>, vector<32x128xbf16>
    %cst_28 = arith.constant dense<0.000000e+00> : vector<8x128xf32>
    %41 = tpu.matmul %39, %40, %cst_28 {dimension_numbers = #tpu.dot_dimension_numbers<[1], [0], [0], [1], [0, 0, 1, 1], [], []>} : vector<8x32xbf16>, vector<32x128xbf16>, vector<8x128xf32> -> vector<8x128xf32>
    %c0_29 = arith.constant 0 : index
    %c0_30 = arith.constant 0 : index
    %42 = vector.load %arg11[%c0_29, %c0_30] : memref<1x128xf32, #tpu.memory_space<vmem>>, vector<1x128xf32>
    %43 = vector.broadcast %42 : vector<1x128xf32> to vector<8x128xf32>
    %44 = arith.addf %41, %43 : vector<8x128xf32>
    %45 = tpu.iota {dimensions = array<i32: 1>} : vector<8x128xi32>
    %c32_i32 = arith.constant 32 : i32
    %46 = vector.broadcast %c32_i32 : i32 to vector<8x128xi32>
    %47 = arith.cmpi sge, %45, %46 : vector<8x128xi32>
    %c64_i32 = arith.constant 64 : i32
    %48 = vector.broadcast %c64_i32 : i32 to vector<8x128xi32>
    %49 = arith.cmpi slt, %45, %48 : vector<8x128xi32>
    %50 = arith.andi %47, %49 : vector<8x128xi1>
    %cst_31 = arith.constant 0.000000e+00 : f32
    %51 = vector.broadcast %cst_31 : f32 to vector<8x128xf32>
    %52 = arith.maximumf %44, %51 : vector<8x128xf32>
    %53 = math.absf %44 : vector<8x128xf32>
    %cst_32 = arith.constant 0.000000e+00 : f32
    %54 = vector.broadcast %cst_32 : f32 to vector<8x128xf32>
    %55 = arith.subf %54, %53 : vector<8x128xf32>
    %56 = math.exp %55 : vector<8x128xf32>
    %57 = math.log1p %56 : vector<8x128xf32>
    %58 = arith.addf %52, %57 : vector<8x128xf32>
    %cst_33 = arith.constant 1.000000e-07 : f32
    %59 = vector.broadcast %cst_33 : f32 to vector<8x128xf32>
    %60 = arith.addf %58, %59 : vector<8x128xf32>
    %61 = arith.select %50, %60, %44 : vector<8x128xi1>, vector<8x128xf32>
    %c0_34 = arith.constant 0 : index
    %c0_35 = arith.constant 0 : index
    %62 = vector.load %arg12[%c0_34, %c0_35] : memref<8x128xf32, #tpu.memory_space<vmem>>, vector<8x128xf32>
    tpu.vector_store %arg12[%c0_34, %c0_35], %61 {strides = array<i32>} : memref<8x128xf32, #tpu.memory_space<vmem>>, vector<8x128xf32>,
    return
  }
  func.func @transform_0(%arg0: i32) -> (i32, i32) {
    %c0_i32 = arith.constant 0 : i32
    %c0_i32_0 = arith.constant 0 : i32
    return %arg0, %c0_i32 : i32, i32
  }
  func.func @transform_1(%arg0: i32) -> (i32, i32) {
    %c0_i32 = arith.constant 0 : i32
    %c0_i32_0 = arith.constant 0 : i32
    %c0_i32_1 = arith.constant 0 : i32
    return %c0_i32, %c0_i32_0 : i32, i32
  }
  func.func @transform_2(%arg0: i32) -> (i32, i32) {
    %c0_i32 = arith.constant 0 : i32
    %c0_i32_0 = arith.constant 0 : i32
    %c0_i32_1 = arith.constant 0 : i32
    return %c0_i32, %c0_i32_0 : i32, i32
  }
  func.func @transform_3(%arg0: i32) -> (i32, i32) {
    %c0_i32 = arith.constant 0 : i32
    %c0_i32_0 = arith.constant 0 : i32
    %c0_i32_1 = arith.constant 0 : i32
    return %c0_i32, %c0_i32_0 : i32, i32
  }
  func.func @transform_4(%arg0: i32) -> (i32, i32) {
    %c0_i32 = arith.constant 0 : i32
    %c0_i32_0 = arith.constant 0 : i32
    %c0_i32_1 = arith.constant 0 : i32
    return %c0_i32, %c0_i32_0 : i32, i32
  }
  func.func @transform_5(%arg0: i32) -> (i32, i32) {
    %c0_i32 = arith.constant 0 : i32
    %c0_i32_0 = arith.constant 0 : i32
    %c0_i32_1 = arith.constant 0 : i32
    return %c0_i32, %c0_i32_0 : i32, i32
  }
  func.func @transform_6(%arg0: i32) -> (i32, i32) {
    %c0_i32 = arith.constant 0 : i32
    %c0_i32_0 = arith.constant 0 : i32
    %c0_i32_1 = arith.constant 0 : i32
    return %c0_i32, %c0_i32_0 : i32, i32
  }
  func.func @transform_7(%arg0: i32) -> (i32, i32) {
    %c0_i32 = arith.constant 0 : i32
    %c0_i32_0 = arith.constant 0 : i32
    %c0_i32_1 = arith.constant 0 : i32
    return %c0_i32, %c0_i32_0 : i32, i32
  }
  func.func @transform_8(%arg0: i32) -> (i32, i32) {
    %c0_i32 = arith.constant 0 : i32
    %c0_i32_0 = arith.constant 0 : i32
    %c0_i32_1 = arith.constant 0 : i32
    return %c0_i32, %c0_i32_0 : i32, i32
  }
  func.func @transform_9(%arg0: i32) -> (i32, i32) {
    %c0_i32 = arith.constant 0 : i32
    %c0_i32_0 = arith.constant 0 : i32
    %c0_i32_1 = arith.constant 0 : i32
    return %c0_i32, %c0_i32_0 : i32, i32
  }
  func.func @transform_10(%arg0: i32) -> (i32, i32) {
    %c0_i32 = arith.constant 0 : i32
    %c0_i32_0 = arith.constant 0 : i32
    %c0_i32_1 = arith.constant 0 : i32
    return %c0_i32, %c0_i32_0 : i32, i32
  }
  func.func @transform_11(%arg0: i32) -> (i32, i32) {
    %c0_i32 = arith.constant 0 : i32
    %c0_i32_0 = arith.constant 0 : i32
    return %arg0, %c0_i32 : i32, i32
  }
}

</mosaic_0001>

<bundles_post_ra>
// kernel: tpu_custom_call.1
= control target key start
LH: loop header
LB: loop body
LE: loop exit
PB: predicated region body
PF: predicated region fallthrough
CT: control target
= control target key end

     0   :  { %16 = vsyncpa [#allocation3], 0  ;;  %s7752_s0 = inlined_call_operand.hbm [shape: bf16[8,768], index: 0, kind: input, shape index: {}]   ;;  %s7753_s1 = inlined_call_operand.hbm [shape: bf16[768,1024], index: 1, kind: input, shape index: {}]   ;;  %s7754_s2 = inlined_call_operand.hbm [shape: f32[1,1024], index: 2, kind: input, shape index: {}]   ;;  %s7755_s3 = inlined_call_operand.hbm [shape: bf16[1024,512], index: 3, kind: input, shape index: {}]   ;;  %s7756_s4 = inlined_call_operand.hbm [shape: f32[1,512], index: 4, kind: input, shape index: {}]   ;;  %s7757_s5 = inlined_call_operand.hbm [shape: bf16[512,256], index: 5, kind: input, shape index: {}]   ;;  %s7758_s6 = inlined_call_operand.hbm [shape: f32[1,256], index: 6, kind: input, shape index: {}]   ;;  %s7759_s7 = inlined_call_operand.vmem [shape: bf16[256,32], index: 7, kind: input, shape index: {}]   ;;  %s7760_s8 = inlined_call_operand.hbm [shape: f32[1,32], index: 8, kind: input, shape index: {}]   ;;  %s7761_s9 = inlined_call_operand.hbm [shape: bf16[32,128], index: 9, kind: input, shape index: {}]   ;;  %s7762_s10 = inlined_call_operand.hbm [shape: f32[1,128], index: 10, kind: input, shape index: {}]   ;;  %s7763_s11 = inlined_call_operand.hbm [shape: f32[8,128], index: 11, kind: output, shape index: {}]  }
   0x1   :  { %17 = vsyncpa [#allocation6], 0 }
   0x2   :  { %18 = vsyncpa [#allocation9], 0 }
   0x3   :  { %19 = vsyncpa [#allocation12], 0 }
   0x4   :  { %20 = vsyncpa [#allocation15], 0 }
   0x5   :  { %21 = vsyncpa [#allocation18], 0 }
   0x6   :  { %22 = vsyncpa [#allocation4], 0  ;;  %s7354_s17 = smov [#allocation5]   ;;  %s7098_s21 = scalar_lea.hbm %s7753_s1, 49152 }
   0x7   :  { %s38_s18 = sshll.u32 %s7354_s17, 4  ;;  %p7099_p0 = scmp.ne.s32.totalorder %s7753_s1, %s7098_s21  ;;  %s39_s18 = int_to_ptr.vmem [resolvable:$true] %s38_s18 }
   0x8   :  { %p7102_p1 = scmp.lt.u32.totalorder %s7098_s21, %s7753_s1 }
   0xa   :  { %p7104_p2 = pnand %p7102_p1, %p7099_p0 }
   0xc   :  { %7107 = shalt.err (!%p7104_p2)
}
   0xd   :  { %s7108_s26 = scalar_lea.vmem %s39_s18, 49152  ;;  %p7113_p4 = scmp.lt.s32.totalorder %s39_s18, %s39_s18 }
   0xe   :  { %p7109_p3 = scmp.ne.s32.totalorder %s39_s18, %s7108_s26  ;;  %p7114_p5 = scmp.lt.s32.totalorder %s7108_s26, %s7108_s26 }
  0x10   :  { %p7115_p6 = por %p7114_p5, %p7113_p4 }
  0x12   :  { %p7116_p7 = pnand %p7115_p6, %p7109_p3 }
  0x14   :  { %7119 = shalt.err (!%p7116_p7)
}
  0x15   :  { %s7355_s27 = smov 512   ;;  %s7356_s28 = smov 32  }
  0x16   :  { %44 = dma.hbm_to_vmem [thread:$0]  %s7753_s1, 49152, %s39_s18, [#allocation6], %s7355_s27, %s7355_s27, %s7356_s28  }
  0x17   :  { %s7357_s12 = smov [#allocation8]   ;;  %s7120_s16 = scalar_lea.hbm %s7755_s3, 32768 }
  0x18   :  { %s60_s13 = sshll.u32 %s7357_s12, 4  ;;  %p7121_p8 = scmp.ne.s32.totalorder %s7755_s3, %s7120_s16  ;;  %s61_s13 = int_to_ptr.vmem [resolvable:$true] %s60_s13 }
  0x19   :  { %p7124_p9 = scmp.lt.u32.totalorder %s7120_s16, %s7755_s3 }
  0x1b   :  { %p7126_p10 = pnand %p7124_p9, %p7121_p8 }
  0x1d   :  { %7129 = shalt.err (!%p7126_p10)
}
  0x1e   :  { %s7130_s22 = scalar_lea.vmem %s61_s13, 32768  ;;  %p7135_p12 = scmp.lt.s32.totalorder %s61_s13, %s61_s13 }
  0x1f   :  { %p7131_p11 = scmp.ne.s32.totalorder %s61_s13, %s7130_s22  ;;  %p7136_p13 = scmp.lt.s32.totalorder %s7130_s22, %s7130_s22 }
  0x21   :  { %p7137_p0 = por %p7136_p13, %p7135_p12 }
  0x23   :  { %p7138_p1 = pnand %p7137_p0, %p7131_p11 }
  0x25   :  { %7141 = shalt.err (!%p7138_p1)
}
  0x26   :  { %s7358_s1 = smov 256   ;;  %s7359_s18 = smov 16  }
  0x27   :  { %66 = dma.hbm_to_vmem [thread:$0]  %s7755_s3, 32768, %s61_s13, [#allocation9], %s7358_s1, %s7358_s1, %s7359_s18  }
  0x28   :  { %s7360_s25 = smov [#allocation11]   ;;  %s7142_s29 = scalar_lea.hbm %s7757_s5, 8192 }
  0x29   :  { %s82_s26 = sshll.u32 %s7360_s25, 4  ;;  %p7143_p2 = scmp.ne.s32.totalorder %s7757_s5, %s7142_s29  ;;  %s83_s26 = int_to_ptr.vmem [resolvable:$true] %s82_s26 }
  0x2a   :  { %p7146_p3 = scmp.lt.u32.totalorder %s7142_s29, %s7757_s5 }
  0x2c   :  { %p7148_p4 = pnand %p7146_p3, %p7143_p2 }
  0x2e   :  { %7151 = shalt.err (!%p7148_p4)
}
  0x2f   :  { %s7152_s16 = scalar_lea.vmem %s83_s26, 8192  ;;  %p7157_p6 = scmp.lt.s32.totalorder %s83_s26, %s83_s26 }
  0x30   :  { %p7153_p5 = scmp.ne.s32.totalorder %s83_s26, %s7152_s16  ;;  %p7158_p7 = scmp.lt.s32.totalorder %s7152_s16, %s7152_s16 }
  0x32   :  { %p7159_p8 = por %p7158_p7, %p7157_p6 }
  0x34   :  { %p7160_p9 = pnand %p7159_p8, %p7153_p5 }
  0x36   :  { %7163 = shalt.err (!%p7160_p9)
}
  0x37   :  { %s7361_s3 = smov 128   ;;  %s7362_s13 = smov 8  }
  0x38   :  { %88 = dma.hbm_to_vmem [thread:$0]  %s7757_s5, 8192, %s83_s26, [#allocation12], %s7361_s3, %s7361_s3, %s7362_s13  }
  0x39   :  { %s7363_s20 = smov [#allocation14]   ;;  %s7364_s22 = smov [#allocation2]  }
  0x3a   :  { %s107_s21 = sshll.u32 %s7363_s20, 4  ;;  %s29_s1 = sshll.u32 %s7364_s22, 4  ;;  %s108_s21 = int_to_ptr.vmem [resolvable:$true] %s107_s21  ;;  %s30_s1 = int_to_ptr.vmem [resolvable:$true] %s29_s1 }
  0x3b   :  { %s7164_s24 = scalar_lea.hbm %s7760_s8, 16 }
  0x3c   :  { %p7165_p10 = scmp.ne.s32.totalorder %s7760_s8, %s7164_s24  ;;  %p7168_p11 = scmp.lt.u32.totalorder %s7164_s24, %s7760_s8 }
  0x3e   :  { %p7170_p12 = pnand %p7168_p11, %p7165_p10 }
  0x40   :  { %7173 = shalt.err (!%p7170_p12)
}
  0x41   :  { %s7174_s5 = scalar_lea.vmem %s108_s21, 16  ;;  %s7178_s26 = scalar_lea.vmem %s108_s21, 32 }
  0x42   :  { %p7175_p13 = scmp.ne.s32.totalorder %s108_s21, %s7174_s5  ;;  %p7179_p0 = scmp.lt.s32.totalorder %s108_s21, %s108_s21 }
  0x43   :  { %p7180_p1 = scmp.lt.s32.totalorder %s7178_s26, %s7174_s5 }
  0x45   :  { %p7181_p2 = por %p7180_p1, %p7179_p0 }
  0x47   :  { %p7182_p3 = pnand %p7181_p2, %p7175_p13 }
  0x49   :  { %7185 = shalt.err (!%p7182_p3)
}
  0x4a   :  { %110 = dma.hbm_to_vmem [thread:$0]  %s7760_s8, 16, %s108_s21, [#allocation15]  }
  0x4b   :  { %s7186_s16 = scalar_lea.hbm %s7752_s0, 384 }
  0x4c   :  { %p7187_p4 = scmp.ne.s32.totalorder %s7752_s0, %s7186_s16  ;;  %p7190_p5 = scmp.lt.u32.totalorder %s7186_s16, %s7752_s0 }
  0x4e   :  { %p7192_p6 = pnand %p7190_p5, %p7187_p4 }
  0x50   :  { %7195 = shalt.err (!%p7192_p6)
}
  0x51   :  { %s7196_s20 = scalar_lea.vmem %s30_s1, 384  ;;  %p7201_p8 = scmp.lt.s32.totalorder %s30_s1, %s30_s1 }
  0x52   :  { %p7197_p7 = scmp.ne.s32.totalorder %s30_s1, %s7196_s20  ;;  %p7202_p9 = scmp.lt.s32.totalorder %s7196_s20, %s7196_s20 }
  0x54   :  { %p7203_p10 = por %p7202_p9, %p7201_p8 }
  0x56   :  { %p7204_p11 = pnand %p7203_p10, %p7197_p7 }
  0x58   :  { %7207 = shalt.err (!%p7204_p11)
}
  0x59   :  { %32 = dma.hbm_to_vmem [thread:$0]  %s7752_s0, 384, %s30_s1, [#allocation3]  }
  0x5a   :  { %s7365_s22 = smov [#allocation7]   ;;  %s7366_s23 = smov [#allocation10]  }
  0x5b   :  { %s51_s18 = sshll.u32 %s7365_s22, 4  ;;  %s73_s24 = sshll.u32 %s7366_s23, 4  ;;  %s52_s18 = int_to_ptr.vmem [resolvable:$true] %s51_s18  ;;  %s74_s24 = int_to_ptr.vmem [resolvable:$true] %s73_s24 }
  0x5c   :  { %s7208_s28 = scalar_lea.hbm %s7754_s2, 128 }
  0x5d   :  { %p7209_p12 = scmp.ne.s32.totalorder %s7754_s2, %s7208_s28  ;;  %p7212_p13 = scmp.lt.u32.totalorder %s7208_s28, %s7754_s2 }
  0x5f   :  { %p7214_p0 = pnand %p7212_p13, %p7209_p12 }
  0x61   :  { %7217 = shalt.err (!%p7214_p0)
}
  0x62   :  { %s7218_s0 = scalar_lea.vmem %s52_s18, 128  ;;  %p7223_p2 = scmp.lt.s32.totalorder %s52_s18, %s52_s18 }
  0x63   :  { %p7219_p1 = scmp.ne.s32.totalorder %s52_s18, %s7218_s0  ;;  %p7224_p3 = scmp.lt.s32.totalorder %s7218_s0, %s7218_s0 }
  0x65   :  { %p7225_p4 = por %p7224_p3, %p7223_p2 }
  0x67   :  { %p7226_p5 = pnand %p7225_p4, %p7219_p1 }
  0x69   :  { %7229 = shalt.err (!%p7226_p5)
}
  0x6a   :  { %54 = dma.hbm_to_vmem [thread:$0]  %s7754_s2, 128, %s52_s18, [#allocation6]  }
  0x6b   :  { %s7230_s16 = scalar_lea.hbm %s7756_s4, 64 }
  0x6c   :  { %p7231_p6 = scmp.ne.s32.totalorder %s7756_s4, %s7230_s16  ;;  %p7234_p7 = scmp.lt.u32.totalorder %s7230_s16, %s7756_s4 }
  0x6e   :  { %p7236_p8 = pnand %p7234_p7, %p7231_p6 }
  0x70   :  { %7239 = shalt.err (!%p7236_p8)
}
  0x71   :  { %s7240_s20 = scalar_lea.vmem %s74_s24, 64  ;;  %p7245_p10 = scmp.lt.s32.totalorder %s74_s24, %s74_s24 }
  0x72   :  { %p7241_p9 = scmp.ne.s32.totalorder %s74_s24, %s7240_s20  ;;  %p7246_p11 = scmp.lt.s32.totalorder %s7240_s20, %s7240_s20 }
  0x74   :  { %p7247_p12 = por %p7246_p11, %p7245_p10 }
  0x76   :  { %p7248_p13 = pnand %p7247_p12, %p7241_p9 }
  0x78   :  { %7251 = shalt.err (!%p7248_p13)
}
  0x79   :  { %76 = dma.hbm_to_vmem [thread:$0]  %s7756_s4, 64, %s74_s24, [#allocation9]  }
  0x7a   :  { %s7367_s21 = smov [#allocation13]   ;;  %s7368_s18 = smov [#allocation16]  }
  0x7b   :  { %s95_s22 = sshll.u32 %s7367_s21, 4  ;;  %s116_s23 = sshll.u32 %s7368_s18, 4  ;;  %s96_s22 = int_to_ptr.vmem [resolvable:$true] %s95_s22  ;;  %s117_s23 = int_to_ptr.vmem [resolvable:$true] %s116_s23 }
  0x7c   :  { %s7252_s28 = scalar_lea.hbm %s7758_s6, 32 }
  0x7d   :  { %p7253_p0 = scmp.ne.s32.totalorder %s7758_s6, %s7252_s28  ;;  %p7256_p1 = scmp.lt.u32.totalorder %s7252_s28, %s7758_s6 }
  0x7f   :  { %p7258_p2 = pnand %p7256_p1, %p7253_p0 }
  0x81   :  { %7261 = shalt.err (!%p7258_p2)
}
  0x82   :  { %s7262_s4 = scalar_lea.vmem %s96_s22, 32  ;;  %p7267_p4 = scmp.lt.s32.totalorder %s96_s22, %s96_s22 }
  0x83   :  { %p7263_p3 = scmp.ne.s32.totalorder %s96_s22, %s7262_s4  ;;  %p7268_p5 = scmp.lt.s32.totalorder %s7262_s4, %s7262_s4 }
  0x85   :  { %p7269_p6 = por %p7268_p5, %p7267_p4 }
  0x87   :  { %p7270_p7 = pnand %p7269_p6, %p7263_p3 }
  0x89   :  { %7273 = shalt.err (!%p7270_p7)
}
  0x8a   :  { %98 = dma.hbm_to_vmem [thread:$0]  %s7758_s6, 32, %s96_s22, [#allocation12]  }
  0x8b   :  { %s7274_s14 = scalar_lea.hbm %s7761_s9, 256 }
  0x8c   :  { %p7275_p8 = scmp.ne.s32.totalorder %s7761_s9, %s7274_s14  ;;  %p7278_p9 = scmp.lt.u32.totalorder %s7274_s14, %s7761_s9 }
  0x8e   :  { %p7280_p10 = pnand %p7278_p9, %p7275_p8 }
  0x90   :  { %7283 = shalt.err (!%p7280_p10)
}
  0x91   :  { %s7284_s17 = scalar_lea.vmem %s117_s23, 256  ;;  %p7289_p12 = scmp.lt.s32.totalorder %s117_s23, %s117_s23 }
  0x92   :  { %p7285_p11 = scmp.ne.s32.totalorder %s117_s23, %s7284_s17  ;;  %p7290_p13 = scmp.lt.s32.totalorder %s7284_s17, %s7284_s17 }
  0x94   :  { %p7291_p0 = por %p7290_p13, %p7289_p12 }
  0x96   :  { %p7292_p1 = pnand %p7291_p0, %p7285_p11 }
  0x98   :  { %7295 = shalt.err (!%p7292_p1)
}
  0x99   :  { %s7369_s6 = smov 64   ;;  %s7370_s19 = smov 4  }
  0x9a   :  { %122 = dma.hbm_to_vmem [thread:$0]  %s7761_s9, 256, %s117_s23, [#allocation15], %s7369_s6, %s7369_s6, %s7370_s19  }
  0x9b   :  { %s7371_s8 = smov [#allocation17]   ;;  %s7296_s25 = scalar_lea.hbm %s7762_s10, 16 }
  0x9c   :  { %s129_s21 = sshll.u32 %s7371_s8, 4  ;;  %p7297_p2 = scmp.ne.s32.totalorder %s7762_s10, %s7296_s25  ;;  %s130_s21 = int_to_ptr.vmem [resolvable:$true] %s129_s21 }
  0x9d   :  { %p7300_p3 = scmp.lt.u32.totalorder %s7296_s25, %s7762_s10 }
  0x9f   :  { %p7302_p4 = pnand %p7300_p3, %p7297_p2 }
  0xa1   :  { %7305 = shalt.err (!%p7302_p4)
}
  0xa2   :  { %s7306_s26 = scalar_lea.vmem %s130_s21, 16  ;;  %s7310_s9 = scalar_lea.vmem %s130_s21, 32 }
  0xa3   :  { %p7307_p5 = scmp.ne.s32.totalorder %s130_s21, %s7306_s26  ;;  %p7311_p6 = scmp.lt.s32.totalorder %s130_s21, %s130_s21 }
  0xa4   :  { %p7312_p7 = scmp.lt.s32.totalorder %s7310_s9, %s7306_s26 }
  0xa6   :  { %p7313_p8 = por %p7312_p7, %p7311_p6 }
  0xa8   :  { %p7314_p9 = pnand %p7313_p8, %p7307_p5 }
  0xaa   :  { %7317 = shalt.err (!%p7314_p9)
}
  0xab   :  { %132 = dma.hbm_to_vmem [thread:$0]  %s7762_s10, 16, %s130_s21, [#allocation18]  }
  0xac   :  { %7340 = dma.done.wait [#allocation3], 384  }
  0xad   :  { %7341 = vsyncadd [#allocation3], 4294966912 }
  0xae   :  { %7342 = dma.done.wait [#allocation6], 49280  }
  0xaf   :  { %7343 = vsyncadd [#allocation6], 4294918016 }
  0xb0   :  { %7344 = dma.done.wait [#allocation9], 32832  }
  0xb1   :  { %7345 = vsyncadd [#allocation9], 4294934464 }
  0xb2   :  { %7346 = dma.done.wait [#allocation12], 8224  }
  0xb3   :  { %7347 = vsyncadd [#allocation12], 4294959072 }
  0xb4   :  { %7348 = dma.done.wait [#allocation15], 272  }
  0xb5   :  { %7349 = vsyncadd [#allocation15], 4294967024 }
  0xb6   :  { %7350 = dma.done.wait [#allocation18], 16  }
  0xb7   :  { %7351 = vsyncadd [#allocation18], 4294967280  ;;  %v167_v0 = vld [vmem:[#allocation5] sm:$0xff]  ;;  %v7555_v53 = vld [vmem:[#allocation2] sm:$0xff]  ;;  %vm7373_vm14 = vmmov 0   ;;  %vm5645_vm15 = vcmask 261120  }
  0xb8   :  { %v171_v1 = vld [vmem:[#allocation5 + $0x20] sm:$0xff]  ;;  %v7557_v54 = vld [vmem:[#allocation2 + $0x8] sm:$0xff]  ;;  %v7561_v58 = vcombine.high %v7555_v53, %v7555_v53 }
  0xb9   :  { %v295_v2 = vld [vmem:[#allocation5 + $0x400] sm:$0xff]  ;;  %v5739_v3 = vcombine.high %v167_v0, %v171_v1  ;;  %v5738_v5 = vcombine.low %v167_v0, %v171_v1  ;;  %v7565_v61 = vcombine.high %v7557_v54, %v7557_v54 }
  0xba   :  { %v299_v4 = vld [vmem:[#allocation5 + $0x420] sm:$0xff]  ;;  %2566 = vmatprep.mubr.bf16.mxu1 %v7561_v58 }
  0xbb   :  { %v175_v6 = vld [vmem:[#allocation5 + $0x40] sm:$0xff]  ;;  %v5867_v8 = vcombine.high %v295_v2, %v299_v4  ;;  %v5866_v9 = vcombine.low %v295_v2, %v299_v4  ;;  %2534 = vmatprep.subr.bf16.mxu1 %v5739_v3  ;;  %2607 = vmatprep.mubr.bf16.mxu0 %v7565_v61 }
  0xbc   :  { %v179_v7 = vld [vmem:[#allocation5 + $0x60] sm:$0xff]  ;;  %2535 = vmatpush1.bf16.msra.mxu1 %v5738_v5 }
  0xbd   :  { %v5747_v10 = vcombine.high %v175_v6, %v179_v7  ;;  %v303_v11 = vld [vmem:[#allocation5 + $0x440] sm:$0xff]  ;;  %2575 = vmatprep.subr.bf16.mxu0 %v5867_v8  ;;  %v5746_v18 = vcombine.low %v175_v6, %v179_v7 }
  0xbe   :  { %v307_v12 = vld [vmem:[#allocation5 + $0x460] sm:$0xff]  ;;  %2576 = vmatpush1.bf16.msra.mxu0 %v5866_v9 }
  0xbf   :  { %v183_v13 = vld [vmem:[#allocation5 + $0x80] sm:$0xff]  ;;  %v5875_v14 = vcombine.high %v303_v11, %v307_v12  ;;  %2536 = vmatprep.subr.bf16.mxu1 %v5747_v10  ;;  %v5874_v19 = vcombine.low %v303_v11, %v307_v12 }
  0xc0   :  { %v187_v15 = vld [vmem:[#allocation5 + $0xa0] sm:$0xff]  ;;  %2537 = vmatpush1.bf16.msra.mxu1 %v5746_v18 }
  0xc1   :  { %v311_v16 = vld [vmem:[#allocation5 + $0x480] sm:$0xff]  ;;  %v5755_v20 = vcombine.high %v183_v13, %v187_v15  ;;  %2577 = vmatprep.subr.bf16.mxu0 %v5875_v14  ;;  %v5754_v26 = vcombine.low %v183_v13, %v187_v15 }
  0xc2   :  { %v315_v17 = vld [vmem:[#allocation5 + $0x4a0] sm:$0xff]  ;;  %2578 = vmatpush1.bf16.msra.mxu0 %v5874_v19 }
  0xc3   :  { %v5883_v21 = vcombine.high %v311_v16, %v315_v17  ;;  %v191_v22 = vld [vmem:[#allocation5 + $0xc0] sm:$0xff]  ;;  %2538 = vmatprep.subr.bf16.mxu1 %v5755_v20  ;;  %v5882_v27 = vcombine.low %v311_v16, %v315_v17 }
  0xc4   :  { %v195_v23 = vld [vmem:[#allocation5 + $0xe0] sm:$0xff]  ;;  %2539 = vmatpush1.bf16.msra.mxu1 %v5754_v26 }
  0xc5   :  { %v319_v24 = vld [vmem:[#allocation5 + $0x4c0] sm:$0xff]  ;;  %v5763_v28 = vcombine.high %v191_v22, %v195_v23  ;;  %2579 = vmatprep.subr.bf16.mxu0 %v5883_v21  ;;  %v5762_v34 = vcombine.low %v191_v22, %v195_v23 }
  0xc6   :  { %v323_v25 = vld [vmem:[#allocation5 + $0x4e0] sm:$0xff]  ;;  %2580 = vmatpush1.bf16.msra.mxu0 %v5882_v27 }
  0xc7   :  { %v5891_v29 = vcombine.high %v319_v24, %v323_v25  ;;  %v199_v30 = vld [vmem:[#allocation5 + $0x100] sm:$0xff]  ;;  %2540 = vmatprep.subr.bf16.mxu1 %v5763_v28  ;;  %v5890_v35 = vcombine.low %v319_v24, %v323_v25 }
  0xc8   :  { %v203_v31 = vld [vmem:[#allocation5 + $0x120] sm:$0xff]  ;;  %2541 = vmatpush1.bf16.msra.mxu1 %v5762_v34 }
  0xc9   :  { %v327_v32 = vld [vmem:[#allocation5 + $0x500] sm:$0xff]  ;;  %v5771_v36 = vcombine.high %v199_v30, %v203_v31  ;;  %2581 = vmatprep.subr.bf16.mxu0 %v5891_v29  ;;  %v5770_v42 = vcombine.low %v199_v30, %v203_v31 }
  0xca   :  { %v331_v33 = vld [vmem:[#allocation5 + $0x520] sm:$0xff]  ;;  %2582 = vmatpush1.bf16.msra.mxu0 %v5890_v35 }
  0xcb   :  { %v5899_v37 = vcombine.high %v327_v32, %v331_v33  ;;  %v207_v38 = vld [vmem:[#allocation5 + $0x140] sm:$0xff]  ;;  %2542 = vmatprep.subr.bf16.mxu1 %v5771_v36  ;;  %v5898_v43 = vcombine.low %v327_v32, %v331_v33 }
  0xcc   :  { %v211_v39 = vld [vmem:[#allocation5 + $0x160] sm:$0xff]  ;;  %2543 = vmatpush1.bf16.msra.mxu1 %v5770_v42 }
  0xcd   :  { %v335_v40 = vld [vmem:[#allocation5 + $0x540] sm:$0xff]  ;;  %v5779_v44 = vcombine.high %v207_v38, %v211_v39  ;;  %2583 = vmatprep.subr.bf16.mxu0 %v5899_v37  ;;  %v5778_v50 = vcombine.low %v207_v38, %v211_v39 }
  0xce   :  { %v339_v41 = vld [vmem:[#allocation5 + $0x560] sm:$0xff]  ;;  %2584 = vmatpush1.bf16.msra.mxu0 %v5898_v43 }
  0xcf   :  { %v5907_v45 = vcombine.high %v335_v40, %v339_v41  ;;  %v215_v46 = vld [vmem:[#allocation5 + $0x180] sm:$0xff]  ;;  %2544 = vmatprep.subr.bf16.mxu1 %v5779_v44  ;;  %v5906_v51 = vcombine.low %v335_v40, %v339_v41 }
  0xd0   :  { %v219_v47 = vld [vmem:[#allocation5 + $0x1a0] sm:$0xff]  ;;  %2545 = vmatpush1.bf16.msra.mxu1 %v5778_v50 }
  0xd1   :  { %v343_v48 = vld [vmem:[#allocation5 + $0x580] sm:$0xff]  ;;  %v5787_v52 = vcombine.high %v215_v46, %v219_v47  ;;  %2585 = vmatprep.subr.bf16.mxu0 %v5907_v45  ;;  %v5786_v62 = vcombine.low %v215_v46, %v219_v47 }
  0xd2   :  { %v347_v49 = vld [vmem:[#allocation5 + $0x5a0] sm:$0xff]  ;;  %2586 = vmatpush1.bf16.msra.mxu0 %v5906_v51 }
  0xd3   :  { %v5915_v55 = vcombine.high %v343_v48, %v347_v49  ;;  %v223_v56 = vld [vmem:[#allocation5 + $0x1c0] sm:$0xff]  ;;  %2546 = vmatprep.subr.bf16.mxu1 %v5787_v52  ;;  %v5914_v63 = vcombine.low %v343_v48, %v347_v49 }
  0xd4   :  { %v227_v57 = vld [vmem:[#allocation5 + $0x1e0] sm:$0xff]  ;;  %2547 = vmatpush1.bf16.msra.mxu1 %v5786_v62 }
  0xd5   :  { %v351_v59 = vld [vmem:[#allocation5 + $0x5c0] sm:$0xff]  ;;  %v5795_v0 = vcombine.high %v223_v56, %v227_v57  ;;  %2587 = vmatprep.subr.bf16.mxu0 %v5915_v55  ;;  %v5794_v6 = vcombine.low %v223_v56, %v227_v57 }
  0xd6   :  { %v355_v60 = vld [vmem:[#allocation5 + $0x5e0] sm:$0xff]  ;;  %2588 = vmatpush1.bf16.msra.mxu0 %v5914_v63 }
  0xd7   :  { %v5923_v1 = vcombine.high %v351_v59, %v355_v60  ;;  %v231_v2 = vld [vmem:[#allocation5 + $0x200] sm:$0xff]  ;;  %2548 = vmatprep.subr.bf16.mxu1 %v5795_v0  ;;  %v5922_v7 = vcombine.low %v351_v59, %v355_v60 }
  0xd8   :  { %v235_v3 = vld [vmem:[#allocation5 + $0x220] sm:$0xff]  ;;  %2549 = vmatpush1.bf16.msra.mxu1 %v5794_v6  ;;  %v168_v6 = vld [vmem:[#allocation5 + $0x8] sm:$0xff] }
  0xd9   :  { %v359_v4 = vld [vmem:[#allocation5 + $0x600] sm:$0xff]  ;;  %v5803_v8 = vcombine.high %v231_v2, %v235_v3  ;;  %2589 = vmatprep.subr.bf16.mxu0 %v5923_v1  ;;  %v5802_v14 = vcombine.low %v231_v2, %v235_v3 }
  0xda   :  { %v363_v5 = vld [vmem:[#allocation5 + $0x620] sm:$0xff]  ;;  %2590 = vmatpush1.bf16.msra.mxu0 %v5922_v7  ;;  %v172_v7 = vld [vmem:[#allocation5 + $0x28] sm:$0xff] }
  0xdb   :  { %v5931_v9 = vcombine.high %v359_v4, %v363_v5  ;;  %v239_v10 = vld [vmem:[#allocation5 + $0x240] sm:$0xff]  ;;  %2550 = vmatprep.subr.bf16.mxu1 %v5803_v8  ;;  %v5930_v15 = vcombine.low %v359_v4, %v363_v5 }
  0xdc   :  { %v243_v11 = vld [vmem:[#allocation5 + $0x260] sm:$0xff]  ;;  %2551 = vmatpush1.bf16.msra.mxu1 %v5802_v14  ;;  %v176_v14 = vld [vmem:[#allocation5 + $0x48] sm:$0xff] }
  0xdd   :  { %v367_v12 = vld [vmem:[#allocation5 + $0x640] sm:$0xff]  ;;  %v5811_v16 = vcombine.high %v239_v10, %v243_v11  ;;  %2591 = vmatprep.subr.bf16.mxu0 %v5931_v9  ;;  %v5810_v22 = vcombine.low %v239_v10, %v243_v11 }
  0xde   :  { %v371_v13 = vld [vmem:[#allocation5 + $0x660] sm:$0xff]  ;;  %2592 = vmatpush1.bf16.msra.mxu0 %v5930_v15  ;;  %v180_v15 = vld [vmem:[#allocation5 + $0x68] sm:$0xff] }
  0xdf   :  { %v5939_v17 = vcombine.high %v367_v12, %v371_v13  ;;  %v247_v18 = vld [vmem:[#allocation5 + $0x280] sm:$0xff]  ;;  %2552 = vmatprep.subr.bf16.mxu1 %v5811_v16  ;;  %v5938_v23 = vcombine.low %v367_v12, %v371_v13  ;;  %v5741_v12 = vcombine.high %v168_v6, %v172_v7  ;;  %v7571_v16 = vcombine.low %v7555_v53, %v7555_v53 }
  0xe0   :  { %v251_v19 = vld [vmem:[#allocation5 + $0x2a0] sm:$0xff]  ;;  %2553 = vmatpush1.bf16.msra.mxu1 %v5810_v22 }
  0xe1   :  { %v375_v20 = vld [vmem:[#allocation5 + $0x680] sm:$0xff]  ;;  %v5819_v24 = vcombine.high %v247_v18, %v251_v19  ;;  %2593 = vmatprep.subr.bf16.mxu0 %v5939_v17  ;;  %v5818_v30 = vcombine.low %v247_v18, %v251_v19  ;;  %v7573_v19 = vld [vmem:[#allocation2 + $0x10] sm:$0xff] }
  0xe2   :  { %v379_v21 = vld [vmem:[#allocation5 + $0x6a0] sm:$0xff]  ;;  %2594 = vmatpush1.bf16.msra.mxu0 %v5938_v23  ;;  %v5749_v23 = vcombine.high %v176_v14, %v180_v15 }
  0xe3   :  { %v5947_v25 = vcombine.high %v375_v20, %v379_v21  ;;  %v255_v26 = vld [vmem:[#allocation5 + $0x2c0] sm:$0xff]  ;;  %2554 = vmatprep.subr.bf16.mxu1 %v5819_v24  ;;  %v5946_v31 = vcombine.low %v375_v20, %v379_v21  ;;  %v5740_v20 = vcombine.low %v168_v6, %v172_v7  ;;  %v7577_v21 = vcombine.low %v7557_v54, %v7557_v54  ;;  %v228_v7 = vld [vmem:[#allocation5 + $0x1e8] sm:$0xff] }
  0xe4   :  { %v259_v27 = vld [vmem:[#allocation5 + $0x2e0] sm:$0xff]  ;;  %2555 = vmatpush1.bf16.msra.mxu1 %v5818_v30  ;;  %v5748_v54 = vcombine.low %v176_v14, %v180_v15  ;;  %v236_v15 = vld [vmem:[#allocation5 + $0x228] sm:$0xff] }
  0xe5   :  { %v383_v28 = vld [vmem:[#allocation5 + $0x6c0] sm:$0xff]  ;;  %v5827_v32 = vcombine.high %v255_v26, %v259_v27  ;;  %2595 = vmatprep.subr.bf16.mxu0 %v5947_v25  ;;  %v5826_v38 = vcombine.low %v255_v26, %v259_v27  ;;  %v184_v26 = vld [vmem:[#allocation5 + $0x88] sm:$0xff] }
  0xe6   :  { %v387_v29 = vld [vmem:[#allocation5 + $0x6e0] sm:$0xff]  ;;  %2596 = vmatpush1.bf16.msra.mxu0 %v5946_v31  ;;  %v188_v27 = vld [vmem:[#allocation5 + $0xa8] sm:$0xff] }
  0xe7   :  { %v5955_v33 = vcombine.high %v383_v28, %v387_v29  ;;  %v263_v34 = vld [vmem:[#allocation5 + $0x300] sm:$0xff]  ;;  %2556 = vmatprep.subr.bf16.mxu1 %v5827_v32  ;;  %v5954_v39 = vcombine.low %v383_v28, %v387_v29  ;;  %v7581_v28 = vcombine.high %v7573_v19, %v7573_v19  ;;  %v5757_v30 = vcombine.high %v184_v26, %v188_v27 }
  0xe8   :  { %v267_v35 = vld [vmem:[#allocation5 + $0x320] sm:$0xff]  ;;  %2557 = vmatpush1.bf16.msra.mxu1 %v5826_v38 }
  0xe9   :  { %v391_v36 = vld [vmem:[#allocation5 + $0x700] sm:$0xff]  ;;  %v5835_v40 = vcombine.high %v263_v34, %v267_v35  ;;  %2597 = vmatprep.subr.bf16.mxu0 %v5955_v33  ;;  %v5834_v46 = vcombine.low %v263_v34, %v267_v35  ;;  %v192_v33 = vld [vmem:[#allocation5 + $0xc8] sm:$0xff] }
  0xea   :  { %v395_v37 = vld [vmem:[#allocation5 + $0x720] sm:$0xff]  ;;  %2598 = vmatpush1.bf16.msra.mxu0 %v5954_v39  ;;  %v196_v35 = vld [vmem:[#allocation5 + $0xe8] sm:$0xff] }
  0xeb   :  { %v5963_v41 = vcombine.high %v391_v36, %v395_v37  ;;  %v271_v42 = vld [vmem:[#allocation5 + $0x340] sm:$0xff]  ;;  %2558 = vmatprep.subr.bf16.mxu1 %v5835_v40  ;;  %v5962_v47 = vcombine.low %v391_v36, %v395_v37  ;;  %v5756_v36 = vcombine.low %v184_v26, %v188_v27  ;;  %v5765_v38 = vcombine.high %v192_v33, %v196_v35  ;;  %v244_v26 = vld [vmem:[#allocation5 + $0x268] sm:$0xff] }
  0xec   :  { %v275_v43 = vld [vmem:[#allocation5 + $0x360] sm:$0xff]  ;;  %2559 = vmatpush1.bf16.msra.mxu1 %v5834_v46 }
  0xed   :  { %v399_v44 = vld [vmem:[#allocation5 + $0x740] sm:$0xff]  ;;  %v5843_v48 = vcombine.high %v271_v42, %v275_v43  ;;  %2599 = vmatprep.subr.bf16.mxu0 %v5963_v41  ;;  %v5842_v56 = vcombine.low %v271_v42, %v275_v43  ;;  %v200_v41 = vld [vmem:[#allocation5 + $0x108] sm:$0xff] }
  0xee   :  { %v403_v45 = vld [vmem:[#allocation5 + $0x760] sm:$0xff]  ;;  %2600 = vmatpush1.bf16.msra.mxu0 %v5962_v47  ;;  %v204_v43 = vld [vmem:[#allocation5 + $0x128] sm:$0xff] }
  0xef   :  { %v5971_v49 = vcombine.high %v399_v44, %v403_v45  ;;  %v279_v50 = vld [vmem:[#allocation5 + $0x380] sm:$0xff]  ;;  %2560 = vmatprep.subr.bf16.mxu1 %v5843_v48  ;;  %v5970_v57 = vcombine.low %v399_v44, %v403_v45  ;;  %v5764_v44 = vcombine.low %v192_v33, %v196_v35  ;;  %v5773_v46 = vcombine.high %v200_v41, %v204_v43  ;;  %v252_v33 = vld [vmem:[#allocation5 + $0x2a8] sm:$0xff] }
  0xf0   :  { %v283_v51 = vld [vmem:[#allocation5 + $0x3a0] sm:$0xff]  ;;  %2561 = vmatpush1.bf16.msra.mxu1 %v5842_v56 }
  0xf1   :  { %v407_v52 = vld [vmem:[#allocation5 + $0x780] sm:$0xff]  ;;  %v5851_v59 = vcombine.high %v279_v50, %v283_v51  ;;  %2601 = vmatprep.subr.bf16.mxu0 %v5971_v49  ;;  %v5850_v2 = vcombine.low %v279_v50, %v283_v51  ;;  %v208_v49 = vld [vmem:[#allocation5 + $0x148] sm:$0xff] }
  0xf2   :  { %v411_v55 = vld [vmem:[#allocation5 + $0x7a0] sm:$0xff]  ;;  %2602 = vmatpush1.bf16.msra.mxu0 %v5970_v57  ;;  %v212_v51 = vld [vmem:[#allocation5 + $0x168] sm:$0xff] }
  0xf3   :  { %v5979_v60 = vcombine.high %v407_v52, %v411_v55  ;;  %v287_v62 = vld [vmem:[#allocation5 + $0x3c0] sm:$0xff]  ;;  %2562 = vmatprep.subr.bf16.mxu1 %v5851_v59  ;;  %v5978_v3 = vcombine.low %v407_v52, %v411_v55  ;;  %v5772_v52 = vcombine.low %v200_v41, %v204_v43  ;;  %v5781_v56 = vcombine.high %v208_v49, %v212_v51  ;;  %v260_v41 = vld [vmem:[#allocation5 + $0x2e8] sm:$0xff] }
  0xf4   :  { %v291_v63 = vld [vmem:[#allocation5 + $0x3e0] sm:$0xff]  ;;  %2563 = vmatpush1.bf16.msra.mxu1 %v5850_v2 }
  0xf5   :  { %v415_v0 = vld [vmem:[#allocation5 + $0x7c0] sm:$0xff]  ;;  %v5859_v4 = vcombine.high %v287_v62, %v291_v63  ;;  %2603 = vmatprep.subr.bf16.mxu0 %v5979_v60  ;;  %v5858_v10 = vcombine.low %v287_v62, %v291_v63  ;;  %v216_v60 = vld [vmem:[#allocation5 + $0x188] sm:$0xff] }
  0xf6   :  { %v419_v1 = vld [vmem:[#allocation5 + $0x7e0] sm:$0xff]  ;;  %2604 = vmatpush1.bf16.msra.mxu0 %v5978_v3  ;;  %v220_v63 = vld [vmem:[#allocation5 + $0x1a8] sm:$0xff] }
  0xf7   :  { %v5987_v5 = vcombine.high %v415_v0, %v419_v1  ;;  %v423_v8 = vld [vmem:[#allocation5 + $0x800] sm:$0xff]  ;;  %2564 = vmatprep.subr.bf16.mxu1 %v5859_v4  ;;  %v5986_v11 = vcombine.low %v415_v0, %v419_v1  ;;  %v5780_v0 = vcombine.low %v208_v49, %v212_v51  ;;  %v5789_v2 = vcombine.high %v216_v60, %v220_v63  ;;  %v268_v49 = vld [vmem:[#allocation5 + $0x328] sm:$0xff] }
  0xf8   :  { %v427_v9 = vld [vmem:[#allocation5 + $0x820] sm:$0xff]  ;;  %2565 = vmatpush1.bf16.msra.mxu1 %v5858_v10 }
  0xf9   :  { %2605 = vmatprep.subr.bf16.mxu0 %v5987_v5  ;;  %v5995_v13 = vcombine.high %v423_v8, %v427_v9  ;;  %v431_v17 = vld [vmem:[#allocation5 + $0x840] sm:$0xff]  ;;  %v5994_v22 = vcombine.low %v423_v8, %v427_v9  ;;  %2657 = vmatprep.subr.bf16.mxu1 %v5741_v12  ;;  %v224_v5 = vld [vmem:[#allocation5 + $0x1c8] sm:$0xff]  ;;  %v5788_v8 = vcombine.low %v216_v60, %v220_v63 }
  0xfa   :  { %v435_v18 = vld [vmem:[#allocation5 + $0x860] sm:$0xff]  ;;  %2606 = vmatpush1.bf16.msra.mxu0 %v5986_v11  ;;  %v5797_v10 = vcombine.high %v224_v5, %v228_v7  ;;  %v276_v60 = vld [vmem:[#allocation5 + $0x368] sm:$0xff] }
  0xfb   :  { %v439_v24 = vld [vmem:[#allocation5 + $0x880] sm:$0xff]  ;;  %2616 = vmatprep.subr.bf16.mxu0 %v5995_v13  ;;  %v6003_v53 = vcombine.high %v431_v17, %v435_v18  ;;  %2567 = vmatmul.mubr.bf16.vlgmr.msra.gmra.mrb[0].mxu1 %v7571_v16  ;;  %v6002_v29 = vcombine.low %v431_v17, %v435_v18  ;;  %v232_v13 = vld [vmem:[#allocation5 + $0x208] sm:$0xff]  ;;  %v5796_v17 = vcombine.low %v224_v5, %v228_v7 }
  0xfc   :  { %v443_v25 = vld [vmem:[#allocation5 + $0x8a0] sm:$0xff]  ;;  %2658 = vmatpush1.bf16.msra.mxu1 %v5740_v20  ;;  %2689 = vmatprep.mubr.bf16.mxu1 %v7561_v58  ;;  %v5805_v20 = vcombine.high %v232_v13, %v236_v15  ;;  %v284_v5 = vld [vmem:[#allocation5 + $0x3a8] sm:$0xff] }
  0xfd   :  { %2608 = vmatmul.mubr.bf16.vlgmr.msra.gmra.mrb[0].mxu0 %v7577_v21  ;;  %2659 = vmatprep.subr.bf16.mxu1 %v5749_v23  ;;  %v447_v31 = vld [vmem:[#allocation5 + $0x8c0] sm:$0xff]  ;;  %v6011_v34 = vcombine.high %v439_v24, %v443_v25  ;;  %v6010_v37 = vcombine.low %v439_v24, %v443_v25  ;;  %v240_v24 = vld [vmem:[#allocation5 + $0x248] sm:$0xff] }
  0xfe   :  { %2617 = vmatpush1.bf16.msra.mxu0 %v5994_v22  ;;  %v451_v32 = vld [vmem:[#allocation5 + $0x8e0] sm:$0xff]  ;;  %2648 = vmatprep.mubr.bf16.mxu0 %v7581_v28 }
  0xff   :  { %2618 = vmatprep.subr.bf16.mxu0 %v6003_v53  ;;  %v455_v39 = vld [vmem:[#allocation5 + $0x900] sm:$0xff]  ;;  %v6019_v42 = vcombine.high %v447_v31, %v451_v32  ;;  %v6018_v45 = vcombine.low %v447_v31, %v451_v32  ;;  %v5804_v53 = vcombine.low %v232_v13, %v236_v15  ;;  %v248_v31 = vld [vmem:[#allocation5 + $0x288] sm:$0xff] }
 0x100   :  { %2660 = vmatpush1.bf16.msra.mxu1 %v5748_v54  ;;  %v459_v40 = vld [vmem:[#allocation5 + $0x920] sm:$0xff]  ;;  %v5813_v54 = vcombine.high %v240_v24, %v244_v26  ;;  %v292_v13 = vld [vmem:[#allocation5 + $0x3e8] sm:$0xff] }
 0x101   :  { %2661 = vmatprep.subr.bf16.mxu1 %v5757_v30  ;;  %v463_v47 = vld [vmem:[#allocation5 + $0x940] sm:$0xff]  ;;  %v6027_v50 = vcombine.high %v455_v39, %v459_v40  ;;  %v6026_v55 = vcombine.low %v455_v39, %v459_v40  ;;  %v256_v39 = vld [vmem:[#allocation5 + $0x2c8] sm:$0xff] }
 0x102   :  { %2619 = vmatpush1.bf16.msra.mxu0 %v6002_v29  ;;  %v467_v48 = vld [vmem:[#allocation5 + $0x960] sm:$0xff] }
 0x103   :  { %2620 = vmatprep.subr.bf16.mxu0 %v6011_v34  ;;  %v471_v57 = vld [vmem:[#allocation5 + $0x980] sm:$0xff]  ;;  %v6035_v62 = vcombine.high %v463_v47, %v467_v48  ;;  %v6034_v1 = vcombine.low %v463_v47, %v467_v48  ;;  %v5812_v34 = vcombine.low %v240_v24, %v244_v26  ;;  %v264_v47 = vld [vmem:[#allocation5 + $0x308] sm:$0xff]  ;;  %v173_v24 = vld [vmem:[#allocation5 + $0x30] sm:$0xff] }
 0x104   :  { %2662 = vmatpush1.bf16.msra.mxu1 %v5756_v36  ;;  %v475_v59 = vld [vmem:[#allocation5 + $0x9a0] sm:$0xff]  ;;  %v5821_v36 = vcombine.high %v248_v31, %v252_v33 }
 0x105   :  { %2663 = vmatprep.subr.bf16.mxu1 %v5765_v38  ;;  %v479_v3 = vld [vmem:[#allocation5 + $0x9c0] sm:$0xff]  ;;  %v6043_v6 = vcombine.high %v471_v57, %v475_v59  ;;  %v6042_v9 = vcombine.low %v471_v57, %v475_v59  ;;  %v272_v57 = vld [vmem:[#allocation5 + $0x348] sm:$0xff] }
 0x106   :  { %2621 = vmatpush1.bf16.msra.mxu0 %v6010_v37  ;;  %v483_v4 = vld [vmem:[#allocation5 + $0x9e0] sm:$0xff] }
 0x107   :  { %2622 = vmatprep.subr.bf16.mxu0 %v6019_v42  ;;  %v487_v11 = vld [vmem:[#allocation5 + $0xa00] sm:$0xff]  ;;  %v6051_v14 = vcombine.high %v479_v3, %v483_v4  ;;  %v6050_v18 = vcombine.low %v479_v3, %v483_v4  ;;  %v5820_v42 = vcombine.low %v248_v31, %v252_v33  ;;  %v280_v3 = vld [vmem:[#allocation5 + $0x388] sm:$0xff]  ;;  %v181_v31 = vld [vmem:[#allocation5 + $0x70] sm:$0xff] }
 0x108   :  { %2664 = vmatpush1.bf16.msra.mxu1 %v5764_v44  ;;  %v491_v12 = vld [vmem:[#allocation5 + $0xa20] sm:$0xff]  ;;  %v5829_v44 = vcombine.high %v256_v39, %v260_v41 }
 0x109   :  { %2665 = vmatprep.subr.bf16.mxu1 %v5773_v46  ;;  %v495_v22 = vld [vmem:[#allocation5 + $0xa40] sm:$0xff]  ;;  %v6059_v25 = vcombine.high %v487_v11, %v491_v12  ;;  %v6058_v27 = vcombine.low %v487_v11, %v491_v12  ;;  %v288_v11 = vld [vmem:[#allocation5 + $0x3c8] sm:$0xff] }
 0x10a   :  { %2623 = vmatpush1.bf16.msra.mxu0 %v6018_v45  ;;  %v499_v23 = vld [vmem:[#allocation5 + $0xa60] sm:$0xff] }
 0x10b   :  { %2624 = vmatprep.subr.bf16.mxu0 %v6027_v50  ;;  %v503_v29 = vld [vmem:[#allocation5 + $0xa80] sm:$0xff]  ;;  %v6067_v32 = vcombine.high %v495_v22, %v499_v23  ;;  %v6066_v35 = vcombine.low %v495_v22, %v499_v23  ;;  %v5828_v50 = vcombine.low %v256_v39, %v260_v41  ;;  %v169_v22 = vld [vmem:[#allocation5 + $0x10] sm:$0xff] }
 0x10c   :  { %2666 = vmatpush1.bf16.msra.mxu1 %v5772_v52  ;;  %v507_v30 = vld [vmem:[#allocation5 + $0xaa0] sm:$0xff]  ;;  %v5837_v52 = vcombine.high %v264_v47, %v268_v49 }
 0x10d   :  { %2667 = vmatprep.subr.bf16.mxu1 %v5781_v56  ;;  %v511_v37 = vld [vmem:[#allocation5 + $0xac0] sm:$0xff]  ;;  %v6075_v40 = vcombine.high %v503_v29, %v507_v30  ;;  %v6074_v43 = vcombine.low %v503_v29, %v507_v30  ;;  %v177_v29 = vld [vmem:[#allocation5 + $0x50] sm:$0xff]  ;;  %v5743_v30 = vcombine.high %v169_v22, %v173_v24 }
 0x10e   :  { %2625 = vmatpush1.bf16.msra.mxu0 %v6026_v55  ;;  %v515_v38 = vld [vmem:[#allocation5 + $0xae0] sm:$0xff]  ;;  %v5751_v39 = vcombine.high %v177_v29, %v181_v31 }
 0x10f   :  { %2626 = vmatprep.subr.bf16.mxu0 %v6035_v62  ;;  %v519_v45 = vld [vmem:[#allocation5 + $0xb00] sm:$0xff]  ;;  %v6083_v48 = vcombine.high %v511_v37, %v515_v38  ;;  %v6082_v51 = vcombine.low %v511_v37, %v515_v38  ;;  %v5836_v62 = vcombine.low %v264_v47, %v268_v49  ;;  %v316_v37 = vld [vmem:[#allocation5 + $0x4a8] sm:$0xff]  ;;  %v185_v38 = vld [vmem:[#allocation5 + $0x90] sm:$0xff] }
 0x110   :  { %2668 = vmatpush1.bf16.msra.mxu1 %v5780_v0  ;;  %v523_v46 = vld [vmem:[#allocation5 + $0xb20] sm:$0xff]  ;;  %v5845_v0 = vcombine.high %v272_v57, %v276_v60  ;;  %v197_v47 = vld [vmem:[#allocation5 + $0xf0] sm:$0xff] }
 0x111   :  { %2669 = vmatprep.subr.bf16.mxu1 %v5789_v2  ;;  %v527_v55 = vld [vmem:[#allocation5 + $0xb40] sm:$0xff]  ;;  %v6091_v59 = vcombine.high %v519_v45, %v523_v46  ;;  %v6090_v63 = vcombine.low %v519_v45, %v523_v46  ;;  %v193_v45 = vld [vmem:[#allocation5 + $0xd0] sm:$0xff] }
 0x112   :  { %2627 = vmatpush1.bf16.msra.mxu0 %v6034_v1  ;;  %v531_v56 = vld [vmem:[#allocation5 + $0xb60] sm:$0xff] }
 0x113   :  { %2628 = vmatprep.subr.bf16.mxu0 %v6043_v6  ;;  %v535_v1 = vld [vmem:[#allocation5 + $0xb80] sm:$0xff]  ;;  %v6099_v4 = vcombine.high %v527_v55, %v531_v56  ;;  %v5844_v6 = vcombine.low %v272_v57, %v276_v60  ;;  %v6098_v7 = vcombine.low %v527_v55, %v531_v56  ;;  %v201_v55 = vld [vmem:[#allocation5 + $0x110] sm:$0xff]  ;;  %v5767_v56 = vcombine.high %v193_v45, %v197_v47 }
 0x114   :  { %2670 = vmatpush1.bf16.msra.mxu1 %v5788_v8  ;;  %v539_v2 = vld [vmem:[#allocation5 + $0xba0] sm:$0xff]  ;;  %v5853_v8 = vcombine.high %v280_v3, %v284_v5  ;;  %v205_v57 = vld [vmem:[#allocation5 + $0x130] sm:$0xff]  ;;  %v5766_v60 = vcombine.low %v193_v45, %v197_v47 }
 0x115   :  { %2671 = vmatprep.subr.bf16.mxu1 %v5797_v10  ;;  %v547_v10 = vld [vmem:[#allocation5 + $0xbe0] sm:$0xff]  ;;  %v6107_v12 = vcombine.high %v535_v1, %v539_v2  ;;  %v6106_v15 = vcombine.low %v535_v1, %v539_v2  ;;  %v209_v1 = vld [vmem:[#allocation5 + $0x150] sm:$0xff]  ;;  %v5775_v2 = vcombine.high %v201_v55, %v205_v57 }
 0x116   :  { %2629 = vmatpush1.bf16.msra.mxu0 %v6042_v9  ;;  %v543_v9 = vld [vmem:[#allocation5 + $0xbc0] sm:$0xff]  ;;  %v253_v45 = vld [vmem:[#allocation5 + $0x2b0] sm:$0xff] }
 0x117   :  { %2630 = vmatprep.subr.bf16.mxu0 %v6051_v14  ;;  %v5852_v14 = vcombine.low %v280_v3, %v284_v5  ;;  %v6115_v23 = vcombine.high %v543_v9, %v547_v10  ;;  %v6114_v26 = vcombine.low %v543_v9, %v547_v10  ;;  %v213_v3 = vld [vmem:[#allocation5 + $0x170] sm:$0xff]  ;;  %v5774_v5 = vcombine.low %v201_v55, %v205_v57 }
 0x118   :  { %2672 = vmatpush1.bf16.msra.mxu1 %v5796_v17  ;;  %v5861_v17 = vcombine.high %v288_v11, %v292_v13  ;;  %v217_v9 = vld [vmem:[#allocation5 + $0x190] sm:$0xff]  ;;  %v5783_v10 = vcombine.high %v209_v1, %v213_v3 }
 0x119   :  { %2673 = vmatprep.subr.bf16.mxu1 %v5805_v20  ;;  %v300_v20 = vld [vmem:[#allocation5 + $0x428] sm:$0xff]  ;;  %v261_v55 = vld [vmem:[#allocation5 + $0x2f0] sm:$0xff] }
 0x11a   :  { %2631 = vmatpush1.bf16.msra.mxu0 %v6050_v18  ;;  %v296_v18 = vld [vmem:[#allocation5 + $0x408] sm:$0xff] }
 0x11b   :  { %2632 = vmatprep.subr.bf16.mxu0 %v6059_v25  ;;  %v5860_v25 = vcombine.low %v288_v11, %v292_v13  ;;  %v5868_v33 = vcombine.low %v296_v18, %v300_v20  ;;  %v221_v11 = vld [vmem:[#allocation5 + $0x1b0] sm:$0xff]  ;;  %v5782_v13 = vcombine.low %v209_v1, %v213_v3 }
 0x11c   :  { %2674 = vmatpush1.bf16.msra.mxu1 %v5804_v53  ;;  %v5869_v53 = vcombine.high %v296_v18, %v300_v20  ;;  %v5791_v18 = vcombine.high %v217_v9, %v221_v11  ;;  %v225_v20 = vld [vmem:[#allocation5 + $0x1d0] sm:$0xff] }
 0x11d   :  { %2675 = vmatprep.subr.bf16.mxu1 %v5813_v54  ;;  %v308_v54 = vld [vmem:[#allocation5 + $0x468] sm:$0xff]  ;;  %v269_v1 = vld [vmem:[#allocation5 + $0x330] sm:$0xff] }
 0x11e   :  { %2633 = vmatpush1.bf16.msra.mxu0 %v6058_v27  ;;  %v304_v27 = vld [vmem:[#allocation5 + $0x448] sm:$0xff] }
 0x11f   :  { %2634 = vmatprep.subr.bf16.mxu0 %v6067_v32  ;;  %v7589_v32 = vcombine.low %v7573_v19, %v7573_v19  ;;  %v5876_v41 = vcombine.low %v304_v27, %v308_v54  ;;  %v5750_v19 = vcombine.low %v177_v29, %v181_v31  ;;  %v237_v29 = vld [vmem:[#allocation5 + $0x230] sm:$0xff] }
 0x120   :  { %2676 = vmatpush1.bf16.msra.mxu1 %v5812_v34  ;;  %v5742_v34 = vcombine.low %v169_v22, %v173_v24  ;;  %v229_v22 = vld [vmem:[#allocation5 + $0x1f0] sm:$0xff]  ;;  %v5790_v24 = vcombine.low %v217_v9, %v221_v11 }
 0x121   :  { %2677 = vmatprep.subr.bf16.mxu1 %v5821_v36  ;;  %v312_v36 = vld [vmem:[#allocation5 + $0x488] sm:$0xff]  ;;  %v5798_v31 = vcombine.low %v225_v20, %v229_v22  ;;  %v277_v9 = vld [vmem:[#allocation5 + $0x370] sm:$0xff] }
 0x122   :  { %2635 = vmatpush1.bf16.msra.mxu0 %v6066_v35  ;;  %v5877_v35 = vcombine.high %v304_v27, %v308_v54  ;;  %v233_v27 = vld [vmem:[#allocation5 + $0x210] sm:$0xff]  ;;  %v5799_v54 = vcombine.high %v225_v20, %v229_v22 }
 0x123   :  { %2636 = vmatprep.subr.bf16.mxu0 %v6075_v40  ;;  %v189_v40 = vld [vmem:[#allocation5 + $0xb0] sm:$0xff] }
 0x124   :  { %2678 = vmatpush1.bf16.msra.mxu1 %v5820_v42  ;;  %v5885_v42 = vcombine.high %v312_v36, %v316_v37  ;;  %v5759_v46 = vcombine.high %v185_v38, %v189_v40  ;;  %v5758_v49 = vcombine.low %v185_v38, %v189_v40  ;;  %v245_v38 = vld [vmem:[#allocation5 + $0x270] sm:$0xff]  ;;  %v5806_v40 = vcombine.low %v233_v27, %v237_v29 }
 0x125   :  { %2679 = vmatprep.subr.bf16.mxu1 %v5829_v44  ;;  %v324_v44 = vld [vmem:[#allocation5 + $0x4e8] sm:$0xff] }
 0x126   :  { %2637 = vmatpush1.bf16.msra.mxu0 %v6074_v43  ;;  %v320_v43 = vld [vmem:[#allocation5 + $0x4c8] sm:$0xff] }
 0x127   :  { %2638 = vmatprep.subr.bf16.mxu0 %v6083_v48  ;;  %v5884_v48 = vcombine.low %v312_v36, %v316_v37  ;;  %v241_v36 = vld [vmem:[#allocation5 + $0x250] sm:$0xff]  ;;  %v5807_v37 = vcombine.high %v233_v27, %v237_v29 }
 0x128   :  { %2680 = vmatpush1.bf16.msra.mxu1 %v5828_v50  ;;  %v5893_v50 = vcombine.high %v320_v43, %v324_v44  ;;  %v5814_v47 = vcombine.low %v241_v36, %v245_v38  ;;  %v293_v27 = vld [vmem:[#allocation5 + $0x3f0] sm:$0xff] }
 0x129   :  { %2681 = vmatprep.subr.bf16.mxu1 %v5837_v52  ;;  %v332_v52 = vld [vmem:[#allocation5 + $0x528] sm:$0xff] }
 0x12a   :  { %2639 = vmatpush1.bf16.msra.mxu0 %v6082_v51  ;;  %v328_v51 = vld [vmem:[#allocation5 + $0x508] sm:$0xff] }
 0x12b   :  { %2640 = vmatprep.subr.bf16.mxu0 %v6091_v59  ;;  %v5892_v59 = vcombine.low %v320_v43, %v324_v44  ;;  %v249_v43 = vld [vmem:[#allocation5 + $0x290] sm:$0xff]  ;;  %v5815_v44 = vcombine.high %v241_v36, %v245_v38 }
 0x12c   :  { %2682 = vmatpush1.bf16.msra.mxu1 %v5836_v62  ;;  %v5901_v62 = vcombine.high %v328_v51, %v332_v52  ;;  %v5822_v57 = vcombine.low %v249_v43, %v253_v45  ;;  %v301_v36 = vld [vmem:[#allocation5 + $0x430] sm:$0xff] }
 0x12d   :  { %2683 = vmatprep.subr.bf16.mxu1 %v5845_v0  ;;  %v340_v0 = vld [vmem:[#allocation5 + $0x568] sm:$0xff] }
 0x12e   :  { %2641 = vmatpush1.bf16.msra.mxu0 %v6090_v63  ;;  %v336_v63 = vld [vmem:[#allocation5 + $0x548] sm:$0xff] }
 0x12f   :  { %2642 = vmatprep.subr.bf16.mxu0 %v6099_v4  ;;  %v5900_v4 = vcombine.low %v328_v51, %v332_v52  ;;  %v257_v51 = vld [vmem:[#allocation5 + $0x2d0] sm:$0xff]  ;;  %v5823_v52 = vcombine.high %v249_v43, %v253_v45 }
 0x130   :  { %2684 = vmatpush1.bf16.msra.mxu1 %v5844_v6  ;;  %v5909_v6 = vcombine.high %v336_v63, %v340_v0  ;;  %v5830_v3 = vcombine.low %v257_v51, %v261_v55  ;;  %v309_v43 = vld [vmem:[#allocation5 + $0x470] sm:$0xff] }
 0x131   :  { %2685 = vmatprep.subr.bf16.mxu1 %v5853_v8  ;;  %v348_v8 = vld [vmem:[#allocation5 + $0x5a8] sm:$0xff] }
 0x132   :  { %2643 = vmatpush1.bf16.msra.mxu0 %v6098_v7  ;;  %v344_v7 = vld [vmem:[#allocation5 + $0x588] sm:$0xff] }
 0x133   :  { %2644 = vmatprep.subr.bf16.mxu0 %v6107_v12  ;;  %v5908_v12 = vcombine.low %v336_v63, %v340_v0  ;;  %v265_v63 = vld [vmem:[#allocation5 + $0x310] sm:$0xff]  ;;  %v5831_v0 = vcombine.high %v257_v51, %v261_v55 }
 0x134   :  { %2686 = vmatpush1.bf16.msra.mxu1 %v5852_v14  ;;  %v5917_v14 = vcombine.high %v344_v7, %v348_v8  ;;  %v5838_v11 = vcombine.low %v265_v63, %v269_v1  ;;  %v317_v51 = vld [vmem:[#allocation5 + $0x4b0] sm:$0xff] }
 0x135   :  { %2687 = vmatprep.subr.bf16.mxu1 %v5861_v17  ;;  %v356_v17 = vld [vmem:[#allocation5 + $0x5e8] sm:$0xff] }
 0x136   :  { %2645 = vmatpush1.bf16.msra.mxu0 %v6106_v15  ;;  %v352_v15 = vld [vmem:[#allocation5 + $0x5c8] sm:$0xff] }
 0x137   :  { %2646 = vmatprep.subr.bf16.mxu0 %v6115_v23  ;;  %v5916_v23 = vcombine.low %v344_v7, %v348_v8  ;;  %v273_v7 = vld [vmem:[#allocation5 + $0x350] sm:$0xff]  ;;  %v5839_v8 = vcombine.high %v265_v63, %v269_v1 }
 0x138   :  { %2688 = vmatpush1.bf16.msra.mxu1 %v5860_v25  ;;  %v5925_v25 = vcombine.high %v352_v15, %v356_v17  ;;  %v5846_v22 = vcombine.low %v273_v7, %v277_v9  ;;  %v325_v63 = vld [vmem:[#allocation5 + $0x4f0] sm:$0xff] }
 0x139   :  { %2698 = vmatprep.subr.bf16.mxu1 %v5869_v53  ;;  %v364_v53 = vld [vmem:[#allocation5 + $0x628] sm:$0xff] }
 0x13a   :  { %2647 = vmatpush1.bf16.msra.mxu0 %v6114_v26  ;;  %v360_v26 = vld [vmem:[#allocation5 + $0x608] sm:$0xff] }
 0x13b   :  { %2780 = vmatprep.subr.bf16.mxu0 %v5743_v30  ;;  %2690 = vmatmul.mubr.bf16.vlgmr.msra.gmra.mrb[4].mxu1 %v7571_v16  ;;  %v5924_v30 = vcombine.low %v352_v15, %v356_v17  ;;  %v281_v15 = vld [vmem:[#allocation5 + $0x390] sm:$0xff]  ;;  %v5847_v17 = vcombine.high %v273_v7, %v277_v9 }
 0x13c   :  { %2699 = vmatpush1.bf16.msra.mxu1 %v5868_v33  ;;  %2730 = vmatprep.mubr.bf16.mxu1 %v7565_v61  ;;  %v5933_v33 = vcombine.high %v360_v26, %v364_v53  ;;  %v333_v7 = vld [vmem:[#allocation5 + $0x530] sm:$0xff] }
 0x13d   :  { %2649 = vmatmul.mubr.bf16.vlgmr.msra.gmra.mrb[0].mxu0 %v7589_v32  ;;  %2700 = vmatprep.subr.bf16.mxu1 %v5877_v35  ;;  %v372_v35 = vld [vmem:[#allocation5 + $0x668] sm:$0xff] }
 0x13e   :  { %2781 = vmatpush1.bf16.msra.mxu0 %v5742_v34  ;;  %2812 = vmatprep.mubr.bf16.mxu0 %v7561_v58  ;;  %v368_v34 = vld [vmem:[#allocation5 + $0x648] sm:$0xff] }
 0x13f   :  { %2782 = vmatprep.subr.bf16.mxu0 %v5751_v39  ;;  %v5932_v39 = vcombine.low %v360_v26, %v364_v53  ;;  %v289_v26 = vld [vmem:[#allocation5 + $0x3d0] sm:$0xff] }
 0x140   :  { %2701 = vmatpush1.bf16.msra.mxu1 %v5876_v41  ;;  %v5941_v41 = vcombine.high %v368_v34, %v372_v35  ;;  %v5862_v38 = vcombine.low %v289_v26, %v293_v27 }
 0x141   :  { %2702 = vmatprep.subr.bf16.mxu1 %v5885_v42  ;;  %v380_v42 = vld [vmem:[#allocation5 + $0x6a8] sm:$0xff] }
 0x142   :  { %2783 = vmatpush1.bf16.msra.mxu0 %v5750_v19  ;;  %v376_v19 = vld [vmem:[#allocation5 + $0x688] sm:$0xff] }
 0x143   :  { %2784 = vmatprep.subr.bf16.mxu0 %v5759_v46  ;;  %v5940_v46 = vcombine.low %v368_v34, %v372_v35  ;;  %v297_v34 = vld [vmem:[#allocation5 + $0x410] sm:$0xff]  ;;  %v5863_v35 = vcombine.high %v289_v26, %v293_v27 }
 0x144   :  { %2703 = vmatpush1.bf16.msra.mxu1 %v5884_v48  ;;  %v5949_v48 = vcombine.high %v376_v19, %v380_v42  ;;  %v5870_v45 = vcombine.low %v297_v34, %v301_v36  ;;  %v349_v26 = vld [vmem:[#allocation5 + $0x5b0] sm:$0xff] }
 0x145   :  { %2704 = vmatprep.subr.bf16.mxu1 %v5893_v50  ;;  %v388_v50 = vld [vmem:[#allocation5 + $0x6e8] sm:$0xff] }
 0x146   :  { %2785 = vmatpush1.bf16.msra.mxu0 %v5758_v49  ;;  %v384_v49 = vld [vmem:[#allocation5 + $0x6c8] sm:$0xff] }
 0x147   :  { %2786 = vmatprep.subr.bf16.mxu0 %v5767_v56  ;;  %v5948_v56 = vcombine.low %v376_v19, %v380_v42  ;;  %v305_v19 = vld [vmem:[#allocation5 + $0x450] sm:$0xff]  ;;  %v5871_v42 = vcombine.high %v297_v34, %v301_v36 }
 0x148   :  { %2705 = vmatpush1.bf16.msra.mxu1 %v5892_v59  ;;  %v5957_v59 = vcombine.high %v384_v49, %v388_v50  ;;  %v5878_v55 = vcombine.low %v305_v19, %v309_v43  ;;  %v357_v34 = vld [vmem:[#allocation5 + $0x5f0] sm:$0xff] }
 0x149   :  { %2706 = vmatprep.subr.bf16.mxu1 %v5901_v62  ;;  %v396_v62 = vld [vmem:[#allocation5 + $0x728] sm:$0xff] }
 0x14a   :  { %2787 = vmatpush1.bf16.msra.mxu0 %v5766_v60  ;;  %v392_v60 = vld [vmem:[#allocation5 + $0x708] sm:$0xff] }
 0x14b   :  { %2788 = vmatprep.subr.bf16.mxu0 %v5775_v2  ;;  %v5956_v2 = vcombine.low %v384_v49, %v388_v50  ;;  %v5879_v49 = vcombine.high %v305_v19, %v309_v43  ;;  %v313_v50 = vld [vmem:[#allocation5 + $0x490] sm:$0xff] }
 0x14c   :  { %2707 = vmatpush1.bf16.msra.mxu1 %v5900_v4  ;;  %v5965_v4 = vcombine.high %v392_v60, %v396_v62  ;;  %v5886_v1 = vcombine.low %v313_v50, %v317_v51  ;;  %v365_v19 = vld [vmem:[#allocation5 + $0x630] sm:$0xff] }
 0x14d   :  { %2708 = vmatprep.subr.bf16.mxu1 %v5909_v6  ;;  %v404_v6 = vld [vmem:[#allocation5 + $0x768] sm:$0xff] }
 0x14e   :  { %2789 = vmatpush1.bf16.msra.mxu0 %v5774_v5  ;;  %v400_v5 = vld [vmem:[#allocation5 + $0x748] sm:$0xff] }
 0x14f   :  { %2790 = vmatprep.subr.bf16.mxu0 %v5783_v10  ;;  %v5964_v10 = vcombine.low %v392_v60, %v396_v62  ;;  %v5972_v20 = vcombine.low %v400_v5, %v404_v6  ;;  %v321_v60 = vld [vmem:[#allocation5 + $0x4d0] sm:$0xff]  ;;  %v5887_v62 = vcombine.high %v313_v50, %v317_v51 }
 0x150   :  { %2709 = vmatpush1.bf16.msra.mxu1 %v5908_v12  ;;  %v5973_v12 = vcombine.high %v400_v5, %v404_v6  ;;  %v329_v5 = vld [vmem:[#allocation5 + $0x510] sm:$0xff]  ;;  %v5895_v6 = vcombine.high %v321_v60, %v325_v63  ;;  %v5894_v9 = vcombine.low %v321_v60, %v325_v63 }
 0x151   :  { %2710 = vmatprep.subr.bf16.mxu1 %v5917_v14  ;;  %v412_v14 = vld [vmem:[#allocation5 + $0x7a8] sm:$0xff]  ;;  %v381_v60 = vld [vmem:[#allocation5 + $0x6b0] sm:$0xff] }
 0x152   :  { %2791 = vmatpush1.bf16.msra.mxu0 %v5782_v13  ;;  %v408_v13 = vld [vmem:[#allocation5 + $0x788] sm:$0xff] }
 0x153   :  { %2792 = vmatprep.subr.bf16.mxu0 %v5791_v18  ;;  %v285_v18 = vld [vmem:[#allocation5 + $0x3b0] sm:$0xff] }
 0x154   :  { %2711 = vmatpush1.bf16.msra.mxu1 %v5916_v23  ;;  %v5981_v23 = vcombine.high %v408_v13, %v412_v14  ;;  %v5855_v53 = vcombine.high %v281_v15, %v285_v18  ;;  %v5854_v29 = vcombine.low %v281_v15, %v285_v18  ;;  %v341_v15 = vld [vmem:[#allocation5 + $0x570] sm:$0xff]  ;;  %v5902_v18 = vcombine.low %v329_v5, %v333_v7 }
 0x155   :  { %2712 = vmatprep.subr.bf16.mxu1 %v5925_v25  ;;  %v420_v25 = vld [vmem:[#allocation5 + $0x7e8] sm:$0xff] }
 0x156   :  { %2793 = vmatpush1.bf16.msra.mxu0 %v5790_v24  ;;  %v416_v24 = vld [vmem:[#allocation5 + $0x7c8] sm:$0xff] }
 0x157   :  { %2794 = vmatprep.subr.bf16.mxu0 %v5799_v54  ;;  %v5980_v54 = vcombine.low %v408_v13, %v412_v14  ;;  %v337_v13 = vld [vmem:[#allocation5 + $0x550] sm:$0xff]  ;;  %v5903_v14 = vcombine.high %v329_v5, %v333_v7 }
 0x158   :  { %2713 = vmatpush1.bf16.msra.mxu1 %v5924_v30  ;;  %v5989_v30 = vcombine.high %v416_v24, %v420_v25  ;;  %v5910_v27 = vcombine.low %v337_v13, %v341_v15  ;;  %v389_v5 = vld [vmem:[#allocation5 + $0x6f0] sm:$0xff] }
 0x159   :  { %2714 = vmatprep.subr.bf16.mxu1 %v5933_v33  ;;  %v428_v33 = vld [vmem:[#allocation5 + $0x828] sm:$0xff] }
 0x15a   :  { %2795 = vmatpush1.bf16.msra.mxu0 %v5798_v31  ;;  %v424_v31 = vld [vmem:[#allocation5 + $0x808] sm:$0xff] }
 0x15b   :  { %2796 = vmatprep.subr.bf16.mxu0 %v5807_v37  ;;  %v5988_v37 = vcombine.low %v416_v24, %v420_v25  ;;  %v345_v24 = vld [vmem:[#allocation5 + $0x590] sm:$0xff]  ;;  %v5911_v25 = vcombine.high %v337_v13, %v341_v15 }
 0x15c   :  { %2715 = vmatpush1.bf16.msra.mxu1 %v5932_v39  ;;  %v5997_v39 = vcombine.high %v424_v31, %v428_v33  ;;  %v5918_v36 = vcombine.low %v345_v24, %v349_v26  ;;  %v397_v13 = vld [vmem:[#allocation5 + $0x730] sm:$0xff] }
 0x15d   :  { %2716 = vmatprep.subr.bf16.mxu1 %v5941_v41  ;;  %v436_v41 = vld [vmem:[#allocation5 + $0x868] sm:$0xff] }
 0x15e   :  { %2797 = vmatpush1.bf16.msra.mxu0 %v5806_v40  ;;  %v432_v40 = vld [vmem:[#allocation5 + $0x848] sm:$0xff] }
 0x15f   :  { %2798 = vmatprep.subr.bf16.mxu0 %v5815_v44  ;;  %v5996_v44 = vcombine.low %v424_v31, %v428_v33  ;;  %v5919_v31 = vcombine.high %v345_v24, %v349_v26  ;;  %v353_v33 = vld [vmem:[#allocation5 + $0x5d0] sm:$0xff] }
 0x160   :  { %2717 = vmatpush1.bf16.msra.mxu1 %v5940_v46  ;;  %v6005_v46 = vcombine.high %v432_v40, %v436_v41  ;;  %v5926_v43 = vcombine.low %v353_v33, %v357_v34  ;;  %v405_v24 = vld [vmem:[#allocation5 + $0x770] sm:$0xff] }
 0x161   :  { %2718 = vmatprep.subr.bf16.mxu1 %v5949_v48  ;;  %v444_v48 = vld [vmem:[#allocation5 + $0x8a8] sm:$0xff] }
 0x162   :  { %2799 = vmatpush1.bf16.msra.mxu0 %v5814_v47  ;;  %v440_v47 = vld [vmem:[#allocation5 + $0x888] sm:$0xff] }
 0x163   :  { %2800 = vmatprep.subr.bf16.mxu0 %v5823_v52  ;;  %v6004_v52 = vcombine.low %v432_v40, %v436_v41  ;;  %v5927_v40 = vcombine.high %v353_v33, %v357_v34  ;;  %v361_v41 = vld [vmem:[#allocation5 + $0x610] sm:$0xff] }
 0x164   :  { %2719 = vmatpush1.bf16.msra.mxu1 %v5948_v56  ;;  %v6013_v56 = vcombine.high %v440_v47, %v444_v48  ;;  %v5934_v51 = vcombine.low %v361_v41, %v365_v19 }
 0x165   :  { %2720 = vmatprep.subr.bf16.mxu1 %v5957_v59  ;;  %v452_v59 = vld [vmem:[#allocation5 + $0x8e8] sm:$0xff] }
 0x166   :  { %2801 = vmatpush1.bf16.msra.mxu0 %v5822_v57  ;;  %v448_v57 = vld [vmem:[#allocation5 + $0x8c8] sm:$0xff] }
 0x167   :  { %2802 = vmatprep.subr.bf16.mxu0 %v5831_v0  ;;  %v6012_v0 = vcombine.low %v440_v47, %v444_v48  ;;  %v369_v47 = vld [vmem:[#allocation5 + $0x650] sm:$0xff]  ;;  %v5935_v48 = vcombine.high %v361_v41, %v365_v19 }
 0x168   :  { %2721 = vmatpush1.bf16.msra.mxu1 %v5956_v2  ;;  %v6021_v2 = vcombine.high %v448_v57, %v452_v59 }
 0x169   :  { %2722 = vmatprep.subr.bf16.mxu1 %v5965_v4  ;;  %v460_v4 = vld [vmem:[#allocation5 + $0x928] sm:$0xff] }
 0x16a   :  { %2803 = vmatpush1.bf16.msra.mxu0 %v5830_v3  ;;  %v456_v3 = vld [vmem:[#allocation5 + $0x908] sm:$0xff] }
 0x16b   :  { %2804 = vmatprep.subr.bf16.mxu0 %v5839_v8  ;;  %v6020_v8 = vcombine.low %v448_v57, %v452_v59  ;;  %v377_v57 = vld [vmem:[#allocation5 + $0x690] sm:$0xff] }
 0x16c   :  { %2723 = vmatpush1.bf16.msra.mxu1 %v5964_v10  ;;  %v6029_v10 = vcombine.high %v456_v3, %v460_v4  ;;  %v5950_v7 = vcombine.low %v377_v57, %v381_v60 }
 0x16d   :  { %2724 = vmatprep.subr.bf16.mxu1 %v5973_v12  ;;  %v468_v12 = vld [vmem:[#allocation5 + $0x968] sm:$0xff] }
 0x16e   :  { %2805 = vmatpush1.bf16.msra.mxu0 %v5838_v11  ;;  %v464_v11 = vld [vmem:[#allocation5 + $0x948] sm:$0xff] }
 0x16f   :  { %2806 = vmatprep.subr.bf16.mxu0 %v5847_v17  ;;  %v6028_v17 = vcombine.low %v456_v3, %v460_v4  ;;  %v385_v3 = vld [vmem:[#allocation5 + $0x6d0] sm:$0xff]  ;;  %v5951_v4 = vcombine.high %v377_v57, %v381_v60 }
 0x170   :  { %2725 = vmatpush1.bf16.msra.mxu1 %v5972_v20  ;;  %v6037_v20 = vcombine.high %v464_v11, %v468_v12  ;;  %v5958_v15 = vcombine.low %v385_v3, %v389_v5  ;;  %v437_v57 = vld [vmem:[#allocation5 + $0x870] sm:$0xff] }
 0x171   :  { %2726 = vmatprep.subr.bf16.mxu1 %v5981_v23  ;;  %v476_v23 = vld [vmem:[#allocation5 + $0x9a8] sm:$0xff] }
 0x172   :  { %2807 = vmatpush1.bf16.msra.mxu0 %v5846_v22  ;;  %v472_v22 = vld [vmem:[#allocation5 + $0x988] sm:$0xff] }
 0x173   :  { %2808 = vmatprep.subr.bf16.mxu0 %v5855_v53  ;;  %v6036_v53 = vcombine.low %v464_v11, %v468_v12  ;;  %v393_v11 = vld [vmem:[#allocation5 + $0x710] sm:$0xff]  ;;  %v5959_v12 = vcombine.high %v385_v3, %v389_v5 }
 0x174   :  { %2727 = vmatpush1.bf16.msra.mxu1 %v5980_v54  ;;  %v6045_v54 = vcombine.high %v472_v22, %v476_v23  ;;  %v5966_v26 = vcombine.low %v393_v11, %v397_v13  ;;  %v445_v3 = vld [vmem:[#allocation5 + $0x8b0] sm:$0xff] }
 0x175   :  { %2728 = vmatprep.subr.bf16.mxu1 %v5989_v30  ;;  %v484_v30 = vld [vmem:[#allocation5 + $0x9e8] sm:$0xff] }
 0x176   :  { %2809 = vmatpush1.bf16.msra.mxu0 %v5854_v29  ;;  %v480_v29 = vld [vmem:[#allocation5 + $0x9c8] sm:$0xff] }
 0x177   :  { %2810 = vmatprep.subr.bf16.mxu0 %v5863_v35  ;;  %v6044_v35 = vcombine.low %v472_v22, %v476_v23  ;;  %v401_v22 = vld [vmem:[#allocation5 + $0x750] sm:$0xff]  ;;  %v5967_v23 = vcombine.high %v393_v11, %v397_v13 }
 0x178   :  { %2729 = vmatpush1.bf16.msra.mxu1 %v5988_v37  ;;  %v6053_v37 = vcombine.high %v480_v29, %v484_v30  ;;  %v5974_v34 = vcombine.low %v401_v22, %v405_v24  ;;  %v453_v11 = vld [vmem:[#allocation5 + $0x8f0] sm:$0xff] }
 0x179   :  { %2739 = vmatprep.subr.bf16.mxu1 %v5997_v39  ;;  %v492_v39 = vld [vmem:[#allocation5 + $0xa28] sm:$0xff] }
 0x17a   :  { %2811 = vmatpush1.bf16.msra.mxu0 %v5862_v38  ;;  %v488_v38 = vld [vmem:[#allocation5 + $0xa08] sm:$0xff] }
 0x17b   :  { %2821 = vmatprep.subr.bf16.mxu0 %v5871_v42  ;;  %2731 = vmatmul.mubr.bf16.vlgmr.msra.gmra.mrb[4].mxu1 %v7577_v21  ;;  %v6052_v42 = vcombine.low %v480_v29, %v484_v30  ;;  %v6060_v50 = vcombine.low %v488_v38, %v492_v39  ;;  %v409_v29 = vld [vmem:[#allocation5 + $0x790] sm:$0xff]  ;;  %v5975_v30 = vcombine.high %v401_v22, %v405_v24 }
 0x17c   :  { %2740 = vmatpush1.bf16.msra.mxu1 %v5996_v44  ;;  %2771 = vmatprep.mubr.bf16.mxu1 %v7581_v28  ;;  %v6061_v44 = vcombine.high %v488_v38, %v492_v39  ;;  %v548_v38 = vld [vmem:[#allocation5 + $0xbe8] sm:$0xff]  ;;  %v417_v39 = vld [vmem:[#allocation5 + $0x7d0] sm:$0xff] }
 0x17d   :  { %2813 = vmatmul.mubr.bf16.vlgmr.msra.gmra.mrb[4].mxu0 %v7571_v16  ;;  %2741 = vmatprep.subr.bf16.mxu1 %v6005_v46  ;;  %v500_v46 = vld [vmem:[#allocation5 + $0xa68] sm:$0xff]  ;;  %v461_v22 = vld [vmem:[#allocation5 + $0x930] sm:$0xff] }
 0x17e   :  { %2822 = vmatpush1.bf16.msra.mxu0 %v5870_v45  ;;  %2853 = vmatprep.mubr.bf16.mxu0 %v7565_v61  ;;  %v496_v45 = vld [vmem:[#allocation5 + $0xa48] sm:$0xff] }
 0x17f   :  { %2823 = vmatprep.subr.bf16.mxu0 %v5879_v49  ;;  %v373_v49 = vld [vmem:[#allocation5 + $0x670] sm:$0xff] }
 0x180   :  { %2742 = vmatpush1.bf16.msra.mxu1 %v6004_v52  ;;  %v6069_v52 = vcombine.high %v496_v45, %v500_v46  ;;  %v5943_v59 = vcombine.high %v369_v47, %v373_v49  ;;  %v5942_v63 = vcombine.low %v369_v47, %v373_v49  ;;  %v429_v47 = vld [vmem:[#allocation5 + $0x830] sm:$0xff] }
 0x181   :  { %2743 = vmatprep.subr.bf16.mxu1 %v6013_v56  ;;  %v508_v56 = vld [vmem:[#allocation5 + $0xaa8] sm:$0xff] }
 0x182   :  { %2824 = vmatpush1.bf16.msra.mxu0 %v5878_v55  ;;  %v504_v55 = vld [vmem:[#allocation5 + $0xa88] sm:$0xff] }
 0x183   :  { %2825 = vmatprep.subr.bf16.mxu0 %v5887_v62  ;;  %v6068_v62 = vcombine.low %v496_v45, %v500_v46  ;;  %v174_v45 = vld [vmem:[#allocation5 + $0x38] sm:$0xff]  ;;  %v425_v46 = vld [vmem:[#allocation5 + $0x810] sm:$0xff] }
 0x184   :  { %2744 = vmatpush1.bf16.msra.mxu1 %v6012_v0  ;;  %v6077_v0 = vcombine.high %v504_v55, %v508_v56  ;;  %v5998_v60 = vcombine.low %v425_v46, %v429_v47 }
 0x185   :  { %2745 = vmatprep.subr.bf16.mxu1 %v6021_v2  ;;  %v516_v2 = vld [vmem:[#allocation5 + $0xae8] sm:$0xff] }
 0x186   :  { %2826 = vmatpush1.bf16.msra.mxu0 %v5886_v1  ;;  %v512_v1 = vld [vmem:[#allocation5 + $0xac8] sm:$0xff] }
 0x187   :  { %2827 = vmatprep.subr.bf16.mxu0 %v5895_v6  ;;  %v6076_v6 = vcombine.low %v504_v55, %v508_v56  ;;  %v182_v55 = vld [vmem:[#allocation5 + $0x78] sm:$0xff]  ;;  %v433_v56 = vld [vmem:[#allocation5 + $0x850] sm:$0xff] }
 0x188   :  { %2746 = vmatpush1.bf16.msra.mxu1 %v6020_v8  ;;  %v6085_v8 = vcombine.high %v512_v1, %v516_v2  ;;  %v6006_v5 = vcombine.low %v433_v56, %v437_v57 }
 0x189   :  { %2747 = vmatprep.subr.bf16.mxu1 %v6029_v10  ;;  %v524_v10 = vld [vmem:[#allocation5 + $0xb28] sm:$0xff] }
 0x18a   :  { %2828 = vmatpush1.bf16.msra.mxu0 %v5894_v9  ;;  %v520_v9 = vld [vmem:[#allocation5 + $0xb08] sm:$0xff] }
 0x18b   :  { %2829 = vmatprep.subr.bf16.mxu0 %v5903_v14  ;;  %v6084_v14 = vcombine.low %v512_v1, %v516_v2  ;;  %v190_v1 = vld [vmem:[#allocation5 + $0xb8] sm:$0xff]  ;;  %v441_v2 = vld [vmem:[#allocation5 + $0x890] sm:$0xff] }
 0x18c   :  { %2748 = vmatpush1.bf16.msra.mxu1 %v6028_v17  ;;  %v6093_v17 = vcombine.high %v520_v9, %v524_v10  ;;  %v6014_v13 = vcombine.low %v441_v2, %v445_v3 }
 0x18d   :  { %2749 = vmatprep.subr.bf16.mxu1 %v6037_v20  ;;  %v532_v20 = vld [vmem:[#allocation5 + $0xb68] sm:$0xff] }
 0x18e   :  { %2830 = vmatpush1.bf16.msra.mxu0 %v5902_v18  ;;  %v528_v18 = vld [vmem:[#allocation5 + $0xb48] sm:$0xff] }
 0x18f   :  { %2831 = vmatprep.subr.bf16.mxu0 %v5911_v25  ;;  %v6092_v25 = vcombine.low %v520_v9, %v524_v10  ;;  %v6100_v33 = vcombine.low %v528_v18, %v532_v20  ;;  %v198_v9 = vld [vmem:[#allocation5 + $0xf8] sm:$0xff]  ;;  %v449_v10 = vld [vmem:[#allocation5 + $0x8d0] sm:$0xff] }
 0x190   :  { %2750 = vmatpush1.bf16.msra.mxu1 %v6036_v53  ;;  %v6101_v53 = vcombine.high %v528_v18, %v532_v20  ;;  %v206_v18 = vld [vmem:[#allocation5 + $0x138] sm:$0xff]  ;;  %v457_v20 = vld [vmem:[#allocation5 + $0x910] sm:$0xff]  ;;  %v6022_v24 = vcombine.low %v449_v10, %v453_v11 }
 0x191   :  { %2751 = vmatprep.subr.bf16.mxu1 %v6045_v54  ;;  %v540_v54 = vld [vmem:[#allocation5 + $0xba8] sm:$0xff] }
 0x192   :  { %2832 = vmatpush1.bf16.msra.mxu0 %v5910_v27  ;;  %v536_v27 = vld [vmem:[#allocation5 + $0xb88] sm:$0xff] }
 0x193   :  { %2833 = vmatprep.subr.bf16.mxu0 %v5919_v31  ;;  %v413_v31 = vld [vmem:[#allocation5 + $0x7b0] sm:$0xff]  ;;  %v6108_v41 = vcombine.low %v536_v27, %v540_v54 }
 0x194   :  { %2752 = vmatpush1.bf16.msra.mxu1 %v6044_v35  ;;  %v6109_v35 = vcombine.high %v536_v27, %v540_v54  ;;  %v5982_v19 = vcombine.low %v409_v29, %v413_v31  ;;  %v465_v27 = vld [vmem:[#allocation5 + $0x950] sm:$0xff] }
 0x195   :  { %2753 = vmatprep.subr.bf16.mxu1 %v6053_v37  ;;  %v544_v37 = vld [vmem:[#allocation5 + $0xbc8] sm:$0xff]  ;;  %v469_v54 = vld [vmem:[#allocation5 + $0x970] sm:$0xff] }
 0x196   :  { %2834 = vmatpush1.bf16.msra.mxu0 %v5918_v36  ;;  %v5983_v36 = vcombine.high %v409_v29, %v413_v31 }
 0x197   :  { %2835 = vmatprep.subr.bf16.mxu0 %v5927_v40  ;;  %v421_v40 = vld [vmem:[#allocation5 + $0x7f0] sm:$0xff] }
 0x198   :  { %2754 = vmatpush1.bf16.msra.mxu1 %v6052_v42  ;;  %v6117_v42 = vcombine.high %v544_v37, %v548_v38  ;;  %v5990_v49 = vcombine.low %v417_v39, %v421_v40 }
 0x199   :  { %2755 = vmatprep.subr.bf16.mxu1 %v6061_v44  ;;  %v170_v44 = vld [vmem:[#allocation5 + $0x18] sm:$0xff] }
 0x19a   :  { %2836 = vmatpush1.bf16.msra.mxu0 %v5926_v43  ;;  %v5991_v43 = vcombine.high %v417_v39, %v421_v40  ;;  %v6038_v39 = vcombine.low %v465_v27, %v469_v54 }
 0x19b   :  { %2837 = vmatprep.subr.bf16.mxu0 %v5935_v48  ;;  %v6116_v48 = vcombine.low %v544_v37, %v548_v38  ;;  %v477_v37 = vld [vmem:[#allocation5 + $0x9b0] sm:$0xff] }
 0x19c   :  { %2756 = vmatpush1.bf16.msra.mxu1 %v6060_v50  ;;  %v5745_v50 = vcombine.high %v170_v44, %v174_v45 }
 0x19d   :  { %2757 = vmatprep.subr.bf16.mxu1 %v6069_v52  ;;  %v178_v52 = vld [vmem:[#allocation5 + $0x58] sm:$0xff] }
 0x19e   :  { %2838 = vmatpush1.bf16.msra.mxu0 %v5934_v51  ;;  %v5999_v51 = vcombine.high %v425_v46, %v429_v47  ;;  %v485_v46 = vld [vmem:[#allocation5 + $0x9f0] sm:$0xff] }
 0x19f   :  { %2839 = vmatprep.subr.bf16.mxu0 %v5943_v59  ;;  %v5744_v59 = vcombine.low %v170_v44, %v174_v45  ;;  %v481_v45 = vld [vmem:[#allocation5 + $0x9d0] sm:$0xff] }
 0x1a0   :  { %2758 = vmatpush1.bf16.msra.mxu1 %v6068_v62  ;;  %v5753_v62 = vcombine.high %v178_v52, %v182_v55 }
 0x1a1   :  { %2759 = vmatprep.subr.bf16.mxu1 %v6077_v0  ;;  %v186_v0 = vld [vmem:[#allocation5 + $0x98] sm:$0xff] }
 0x1a2   :  { %2840 = vmatpush1.bf16.msra.mxu0 %v5942_v63  ;;  %v6007_v63 = vcombine.high %v433_v56, %v437_v57  ;;  %v238_v56 = vld [vmem:[#allocation5 + $0x238] sm:$0xff]  ;;  %v489_v57 = vld [vmem:[#allocation5 + $0xa10] sm:$0xff] }
 0x1a3   :  { %2841 = vmatprep.subr.bf16.mxu0 %v5951_v4  ;;  %v5752_v4 = vcombine.low %v178_v52, %v182_v55  ;;  %v6055_v52 = vcombine.high %v481_v45, %v485_v46  ;;  %v234_v55 = vld [vmem:[#allocation5 + $0x218] sm:$0xff] }
 0x1a4   :  { %2760 = vmatpush1.bf16.msra.mxu1 %v6076_v6  ;;  %v5761_v6 = vcombine.high %v186_v0, %v190_v1 }
 0x1a5   :  { %2761 = vmatprep.subr.bf16.mxu1 %v6085_v8  ;;  %v194_v8 = vld [vmem:[#allocation5 + $0xd8] sm:$0xff] }
 0x1a6   :  { %2842 = vmatpush1.bf16.msra.mxu0 %v5950_v7  ;;  %v6015_v7 = vcombine.high %v441_v2, %v445_v3  ;;  %v246_v2 = vld [vmem:[#allocation5 + $0x278] sm:$0xff]  ;;  %v497_v3 = vld [vmem:[#allocation5 + $0xa50] sm:$0xff] }
 0x1a7   :  { %2843 = vmatprep.subr.bf16.mxu0 %v5959_v12  ;;  %v5760_v12 = vcombine.low %v186_v0, %v190_v1  ;;  %v242_v1 = vld [vmem:[#allocation5 + $0x258] sm:$0xff] }
 0x1a8   :  { %2762 = vmatpush1.bf16.msra.mxu1 %v6084_v14  ;;  %v5769_v14 = vcombine.high %v194_v8, %v198_v9 }
 0x1a9   :  { %2763 = vmatprep.subr.bf16.mxu1 %v6093_v17  ;;  %v202_v17 = vld [vmem:[#allocation5 + $0x118] sm:$0xff] }
 0x1aa   :  { %2844 = vmatpush1.bf16.msra.mxu0 %v5958_v15  ;;  %v6023_v15 = vcombine.high %v449_v10, %v453_v11  ;;  %v5776_v29 = vcombine.low %v202_v17, %v206_v18  ;;  %v254_v10 = vld [vmem:[#allocation5 + $0x2b8] sm:$0xff]  ;;  %v505_v11 = vld [vmem:[#allocation5 + $0xa90] sm:$0xff] }
 0x1ab   :  { %2845 = vmatprep.subr.bf16.mxu0 %v5967_v23  ;;  %v5768_v23 = vcombine.low %v194_v8, %v198_v9  ;;  %v250_v9 = vld [vmem:[#allocation5 + $0x298] sm:$0xff] }
 0x1ac   :  { %2764 = vmatpush1.bf16.msra.mxu1 %v6092_v25  ;;  %v5777_v25 = vcombine.high %v202_v17, %v206_v18  ;;  %v258_v18 = vld [vmem:[#allocation5 + $0x2d8] sm:$0xff] }
 0x1ad   :  { %2765 = vmatprep.subr.bf16.mxu1 %v6101_v53  ;;  %v214_v53 = vld [vmem:[#allocation5 + $0x178] sm:$0xff] }
 0x1ae   :  { %2846 = vmatpush1.bf16.msra.mxu0 %v5966_v26  ;;  %v210_v26 = vld [vmem:[#allocation5 + $0x158] sm:$0xff] }
 0x1af   :  { %2847 = vmatprep.subr.bf16.mxu0 %v5975_v30  ;;  %v6030_v30 = vcombine.low %v457_v20, %v461_v22  ;;  %v5785_v31 = vcombine.high %v210_v26, %v214_v53  ;;  %v5784_v38 = vcombine.low %v210_v26, %v214_v53  ;;  %v266_v53 = vld [vmem:[#allocation5 + $0x318] sm:$0xff] }
 0x1b0   :  { %2766 = vmatpush1.bf16.msra.mxu1 %v6100_v33  ;;  %v6039_v33 = vcombine.high %v465_v27, %v469_v54  ;;  %v270_v27 = vld [vmem:[#allocation5 + $0x338] sm:$0xff]  ;;  %v521_v54 = vld [vmem:[#allocation5 + $0xb10] sm:$0xff] }
 0x1b1   :  { %2767 = vmatprep.subr.bf16.mxu1 %v6109_v35  ;;  %v222_v35 = vld [vmem:[#allocation5 + $0x1b8] sm:$0xff] }
 0x1b2   :  { %2848 = vmatpush1.bf16.msra.mxu0 %v5974_v34  ;;  %v218_v34 = vld [vmem:[#allocation5 + $0x198] sm:$0xff] }
 0x1b3   :  { %2849 = vmatprep.subr.bf16.mxu0 %v5983_v36  ;;  %v473_v36 = vld [vmem:[#allocation5 + $0x990] sm:$0xff]  ;;  %v5793_v40 = vcombine.high %v218_v34, %v222_v35 }
 0x1b4   :  { %2768 = vmatpush1.bf16.msra.mxu1 %v6108_v41 }
 0x1b5   :  { %2769 = vmatprep.subr.bf16.mxu1 %v6117_v42  ;;  %v226_v42 = vld [vmem:[#allocation5 + $0x1d8] sm:$0xff] }
 0x1b6   :  { %2850 = vmatpush1.bf16.msra.mxu0 %v5982_v19  ;;  %v6047_v19 = vcombine.high %v473_v36, %v477_v37 }
 0x1b7   :  { %2851 = vmatprep.subr.bf16.mxu0 %v5991_v43  ;;  %v230_v43 = vld [vmem:[#allocation5 + $0x1f8] sm:$0xff] }
 0x1b8   :  { %2770 = vmatpush1.bf16.msra.mxu1 %v6116_v48  ;;  %v5792_v48 = vcombine.low %v218_v34, %v222_v35  ;;  %v274_v35 = vld [vmem:[#allocation5 + $0x358] sm:$0xff] }
 0x1b9   :  { %2903 = vmatprep.subr.bf16.mxu1 %v5745_v50  ;;  %v6046_v50 = vcombine.low %v473_v36, %v477_v37  ;;  %v278_v36 = vld [vmem:[#allocation5 + $0x378] sm:$0xff]  ;;  %v529_v37 = vld [vmem:[#allocation5 + $0xb50] sm:$0xff] }
 0x1ba   :  { %2852 = vmatpush1.bf16.msra.mxu0 %v5990_v49 }
 0x1bb   :  { %2862 = vmatprep.subr.bf16.mxu0 %v5999_v51  ;;  %2772 = vmatmul.mubr.bf16.vlgmr.msra.gmra.mrb[4].mxu1 %v7589_v32  ;;  %v5801_v51 = vcombine.high %v226_v42, %v230_v43 }
 0x1bc   :  { %2904 = vmatpush1.bf16.msra.mxu1 %v5744_v59  ;;  %2935 = vmatprep.mubr.bf16.mxu1 %v7561_v58  ;;  %v6031_v58 = vcombine.high %v457_v20, %v461_v22  ;;  %v493_v59 = vld [vmem:[#allocation5 + $0xa30] sm:$0xff]  ;;  %v262_v20 = vld [vmem:[#allocation5 + $0x2f8] sm:$0xff] }
 0x1bd   :  { %2854 = vmatmul.mubr.bf16.vlgmr.msra.gmra.mrb[4].mxu0 %v7577_v21  ;;  %2905 = vmatprep.subr.bf16.mxu1 %v5753_v62  ;;  %v6054_v62 = vcombine.low %v481_v45, %v485_v46  ;;  %v6063_v0 = vcombine.high %v489_v57, %v493_v59  ;;  %v513_v22 = vld [vmem:[#allocation5 + $0xad0] sm:$0xff]  ;;  %v286_v45 = vld [vmem:[#allocation5 + $0x3b8] sm:$0xff] }
 0x1be   :  { %2863 = vmatpush1.bf16.msra.mxu0 %v5998_v60  ;;  %2894 = vmatprep.mubr.bf16.mxu0 %v7581_v28  ;;  %v5800_v60 = vcombine.low %v226_v42, %v230_v43  ;;  %v282_v43 = vld [vmem:[#allocation5 + $0x398] sm:$0xff]  ;;  %v537_v46 = vld [vmem:[#allocation5 + $0xb90] sm:$0xff] }
 0x1bf   :  { %2864 = vmatprep.subr.bf16.mxu0 %v6007_v63  ;;  %v5809_v63 = vcombine.high %v234_v55, %v238_v56 }
 0x1c0   :  { %2906 = vmatpush1.bf16.msra.mxu1 %v5752_v4  ;;  %v501_v4 = vld [vmem:[#allocation5 + $0xa70] sm:$0xff] }
 0x1c1   :  { %2907 = vmatprep.subr.bf16.mxu1 %v5761_v6  ;;  %v6062_v6 = vcombine.low %v489_v57, %v493_v59  ;;  %v6071_v8 = vcombine.high %v497_v3, %v501_v4  ;;  %v549_v57 = vld [vmem:[#allocation5 + $0xbf0] sm:$0xff]  ;;  %v5856_v59 = vcombine.low %v282_v43, %v286_v45 }
 0x1c2   :  { %2865 = vmatpush1.bf16.msra.mxu0 %v6006_v5  ;;  %v5808_v5 = vcombine.low %v234_v55, %v238_v56  ;;  %v294_v55 = vld [vmem:[#allocation5 + $0x3f8] sm:$0xff]  ;;  %v545_v56 = vld [vmem:[#allocation5 + $0xbd0] sm:$0xff] }
 0x1c3   :  { %2866 = vmatprep.subr.bf16.mxu0 %v6015_v7  ;;  %v5817_v7 = vcombine.high %v242_v1, %v246_v2 }
 0x1c4   :  { %2908 = vmatpush1.bf16.msra.mxu1 %v5760_v12  ;;  %v509_v12 = vld [vmem:[#allocation5 + $0xab0] sm:$0xff] }
 0x1c5   :  { %2909 = vmatprep.subr.bf16.mxu1 %v5769_v14  ;;  %v6070_v14 = vcombine.low %v497_v3, %v501_v4  ;;  %v6079_v17 = vcombine.high %v505_v11, %v509_v12  ;;  %v6118_v3 = vcombine.low %v545_v56, %v549_v57 }
 0x1c6   :  { %2867 = vmatpush1.bf16.msra.mxu0 %v6014_v13  ;;  %v5816_v13 = vcombine.low %v242_v1, %v246_v2  ;;  %v302_v1 = vld [vmem:[#allocation5 + $0x438] sm:$0xff] }
 0x1c7   :  { %2868 = vmatprep.subr.bf16.mxu0 %v6023_v15  ;;  %v5825_v15 = vcombine.high %v250_v9, %v254_v10 }
 0x1c8   :  { %2910 = vmatpush1.bf16.msra.mxu1 %v5768_v23  ;;  %v517_v23 = vld [vmem:[#allocation5 + $0xaf0] sm:$0xff] }
 0x1c9   :  { %2911 = vmatprep.subr.bf16.mxu1 %v5777_v25  ;;  %v6078_v25 = vcombine.low %v505_v11, %v509_v12  ;;  %v6087_v26 = vcombine.high %v513_v22, %v517_v23  ;;  %v6600_v11 = vld [vmem:[#allocation8 + $0x24] ss:$16 sps:$4 sm:$0xff]  }
 0x1ca   :  { %2869 = vmatpush1.bf16.msra.mxu0 %v6022_v24  ;;  %v5824_v24 = vcombine.low %v250_v9, %v254_v10  ;;  %v6595_v9 = vld [vmem:[#allocation8] ss:$16 sps:$4 sm:$0xff]  }
 0x1cb   :  { %2870 = vmatprep.subr.bf16.mxu0 %v6031_v58  ;;  %v5833_v58 = vcombine.high %v258_v18, %v262_v20  ;;  %v314_v12 = vld [vmem:[#allocation5 + $0x498] sm:$0xff] }
 0x1cc   :  { %2912 = vmatpush1.bf16.msra.mxu1 %v5776_v29  ;;  %v525_v29 = vld [vmem:[#allocation5 + $0xb30] sm:$0xff] }
 0x1cd   :  { %2913 = vmatprep.subr.bf16.mxu1 %v5785_v31  ;;  %v6086_v31 = vcombine.low %v513_v22, %v517_v23  ;;  %v6095_v34 = vcombine.high %v521_v54, %v525_v29  ;;  %v322_v22 = vld [vmem:[#allocation5 + $0x4d8] sm:$0xff] }
 0x1ce   :  { %2871 = vmatpush1.bf16.msra.mxu0 %v6030_v30  ;;  %v7603_v41 = vpop.f32.mrb[0].mxu1  ;;  %v5832_v30 = vcombine.low %v258_v18, %v262_v20  ;;  %v553_v18 = vlaneseq  ;;  %v6603_v20 = vld [vmem:[#allocation8 + $0x44] ss:$16 sps:$4 sm:$0xff]  }
 0x1cf   :  { %2872 = vmatprep.subr.bf16.mxu0 %v6039_v33  ;;  %v7605_v44 = vpop.f32.mrb[1].mxu1  ;;  %v5841_v33 = vcombine.high %v266_v53, %v270_v27  ;;  %v326_v23 = vld [vmem:[#allocation5 + $0x4f8] sm:$0xff] }
 0x1d0   :  { %v2572_v47 = vpop.f32.mrb[2].mxu1  ;;  %2914 = vmatpush1.bf16.msra.mxu1 %v5784_v38  ;;  %v533_v38 = vld [vmem:[#allocation5 + $0xb70] sm:$0xff] }
 0x1d1   :  { %v2573_v49 = vpop.f32.mrb[3].mxu1  ;;  %2915 = vmatprep.subr.bf16.mxu1 %v5793_v40  ;;  %v6094_v40 = vcombine.low %v521_v54, %v525_v29  ;;  %v6103_v42 = vcombine.high %v529_v37, %v533_v38  ;;  %v541_v47 = vld [vmem:[#allocation5 + $0xbb0] sm:$0xff]  ;;  %v5896_v54 = vcombine.low %v322_v22, %v326_v23  ;;  %v6604_v29 = vld [vmem:[#allocation8 + $0x60] ss:$16 sps:$4 sm:$0xff]  }
 0x1d2   :  { %2873 = vmatpush1.bf16.msra.mxu0 %v6038_v39  ;;  %v5840_v39 = vcombine.low %v266_v53, %v270_v27  ;;  %v6102_v49 = vcombine.low %v529_v37, %v533_v38  ;;  %v330_v53 = vld [vmem:[#allocation5 + $0x518] sm:$0xff] }
 0x1d3   :  { %2874 = vmatprep.subr.bf16.mxu0 %v6047_v19  ;;  %v5849_v19 = vcombine.high %v274_v35, %v278_v36  ;;  %v334_v27 = vld [vmem:[#allocation5 + $0x538] sm:$0xff] }
 0x1d4   :  { %2916 = vmatpush1.bf16.msra.mxu1 %v5792_v48  ;;  %v5848_v48 = vcombine.low %v274_v35, %v278_v36  ;;  %v7616_v35 = vld [vmem:[#allocation7] sm:$0xff]  ;;  %v5904_v37 = vcombine.low %v330_v53, %v334_v27  ;;  %v6607_v38 = vld [vmem:[#allocation8 + $0x80] ss:$16 sps:$4 sm:$0xff]  }
 0x1d5   :  { %2917 = vmatprep.subr.bf16.mxu1 %v5801_v51  ;;  %v6111_v51 = vcombine.high %v537_v46, %v541_v47 }
 0x1d6   :  { %2875 = vmatpush1.bf16.msra.mxu0 %v6046_v50  ;;  %v5857_v50 = vcombine.high %v282_v43, %v286_v45  ;;  %v350_v43 = vld [vmem:[#allocation5 + $0x5b8] sm:$0xff] }
 0x1d7   :  { %2876 = vmatprep.subr.bf16.mxu0 %v6055_v52  ;;  %v290_v52 = vld [vmem:[#allocation5 + $0x3d8] sm:$0xff] }
 0x1d8   :  { %2918 = vmatpush1.bf16.msra.mxu1 %v5800_v60  ;;  %v6110_v60 = vcombine.low %v537_v46, %v541_v47  ;;  %v5864_v2 = vcombine.low %v290_v52, %v294_v55  ;;  %v6610_v47 = vld [vmem:[#allocation8 + $0xa0] ss:$16 sps:$4 sm:$0xff]  }
 0x1d9   :  { %2919 = vmatprep.subr.bf16.mxu1 %v5809_v63  ;;  %v6119_v63 = vcombine.high %v545_v56, %v549_v57 }
 0x1da   :  { %2877 = vmatpush1.bf16.msra.mxu0 %v6054_v62  ;;  %v5865_v62 = vcombine.high %v290_v52, %v294_v55  ;;  %v358_v52 = vld [vmem:[#allocation5 + $0x5f8] sm:$0xff] }
 0x1db   :  { %2878 = vmatprep.subr.bf16.mxu0 %v6063_v0  ;;  %v298_v0 = vld [vmem:[#allocation5 + $0x418] sm:$0xff] }
 0x1dc   :  { %2920 = vmatpush1.bf16.msra.mxu1 %v5808_v5  ;;  %v5873_v4 = vcombine.high %v298_v0, %v302_v1  ;;  %v6597_v5 = vld [vmem:[#allocation8 + $0x4] ss:$16 sps:$4 sm:$0xff]  }
 0x1dd   :  { %2921 = vmatprep.subr.bf16.mxu1 %v5817_v7  ;;  %v310_v7 = vld [vmem:[#allocation5 + $0x478] sm:$0xff] }
 0x1de   :  { %2879 = vmatpush1.bf16.msra.mxu0 %v6062_v6  ;;  %v306_v6 = vld [vmem:[#allocation5 + $0x458] sm:$0xff] }
 0x1df   :  { %2880 = vmatprep.subr.bf16.mxu0 %v6071_v8  ;;  %v5872_v8 = vcombine.low %v298_v0, %v302_v1  ;;  %v5881_v10 = vcombine.high %v306_v6, %v310_v7  ;;  %v6613_v0 = vld [vmem:[#allocation8 + $0xc0] ss:$16 sps:$4 sm:$0xff]  }
 0x1e0   :  { %2922 = vmatpush1.bf16.msra.mxu1 %v5816_v13  ;;  %v318_v13 = vld [vmem:[#allocation5 + $0x4b8] sm:$0xff] }
 0x1e1   :  { %2923 = vmatprep.subr.bf16.mxu1 %v5825_v15  ;;  %v6598_v15 = vld [vmem:[#allocation8 + $0x20] ss:$16 sps:$4 sm:$0xff]  }
 0x1e2   :  { %2881 = vmatpush1.bf16.msra.mxu0 %v6070_v14  ;;  %v5880_v14 = vcombine.low %v306_v6, %v310_v7  ;;  %v6616_v6 = vld [vmem:[#allocation8 + $0xe0] ss:$16 sps:$4 sm:$0xff]  }
 0x1e3   :  { %2882 = vmatprep.subr.bf16.mxu0 %v6079_v17  ;;  %v5889_v17 = vcombine.high %v314_v12, %v318_v13 }
 0x1e4   :  { %2924 = vmatpush1.bf16.msra.mxu1 %v5824_v24  ;;  %v5888_v24 = vcombine.low %v314_v12, %v318_v13  ;;  %v374_v12 = vld [vmem:[#allocation5 + $0x678] sm:$0xff] }
 0x1e5   :  { %2925 = vmatprep.subr.bf16.mxu1 %v5833_v58  ;;  %v7611_v58 = vshrl.u32 %v553_v18, 7 }
 0x1e6   :  { %2883 = vmatpush1.bf16.msra.mxu0 %v6078_v25  ;;  %v5897_v25 = vcombine.high %v322_v22, %v326_v23  ;;  %v382_v22 = vld [vmem:[#allocation5 + $0x6b8] sm:$0xff] }
 0x1e7   :  { %2884 = vmatprep.subr.bf16.mxu0 %v6087_v26  ;;  %v6606_v26 = vld [vmem:[#allocation8 + $0x64] ss:$16 sps:$4 sm:$0xff]   ;;  %v7619_v36 = vsub.s32 1, %v7611_v58 }
 0x1e8   :  { %2926 = vmatpush1.bf16.msra.mxu1 %v5832_v30  ;;  %v5905_v30 = vcombine.high %v330_v53, %v334_v27  ;;  %v390_v53 = vld [vmem:[#allocation5 + $0x6f8] sm:$0xff] }
 0x1e9   :  { %2927 = vmatprep.subr.bf16.mxu1 %v5841_v33  ;;  %v338_v33 = vld [vmem:[#allocation5 + $0x558] sm:$0xff]  ;;  %v560_v45 = vrot.slane %v7616_v35, %v7619_v36 }
 0x1ea   :  { %2885 = vmatpush1.bf16.msra.mxu0 %v6086_v31  ;;  %v6609_v31 = vld [vmem:[#allocation8 + $0x84] ss:$16 sps:$4 sm:$0xff]  }
 0x1eb   :  { %2886 = vmatprep.subr.bf16.mxu0 %v6095_v34  ;;  %v342_v34 = vld [vmem:[#allocation5 + $0x578] sm:$0xff]  ;;  %v2571_v55 = vadd.f32 %v7605_v44, %v560_v45 }
 0x1ec   :  { %2928 = vmatpush1.bf16.msra.mxu1 %v5840_v39  ;;  %v5913_v39 = vcombine.high %v338_v33, %v342_v34  ;;  %v5912_v46 = vcombine.low %v338_v33, %v342_v34  ;;  %v398_v33 = vld [vmem:[#allocation5 + $0x738] sm:$0xff] }
 0x1ed   :  { %2929 = vmatprep.subr.bf16.mxu1 %v5849_v19  ;;  %v6612_v19 = vld [vmem:[#allocation8 + $0xa4] ss:$16 sps:$4 sm:$0xff]  }
 0x1ee   :  { %2887 = vmatpush1.bf16.msra.mxu0 %v6094_v40 }
 0x1ef   :  { %2888 = vmatprep.subr.bf16.mxu0 %v6103_v42  ;;  %v346_v42 = vld [vmem:[#allocation5 + $0x598] sm:$0xff] }
 0x1f0   :  { %2930 = vmatpush1.bf16.msra.mxu1 %v5848_v48  ;;  %v5921_v48 = vcombine.high %v346_v42, %v350_v43 }
 0x1f1   :  { %2931 = vmatprep.subr.bf16.mxu1 %v5857_v50  ;;  %v6615_v50 = vld [vmem:[#allocation8 + $0xc4] ss:$16 sps:$4 sm:$0xff]  }
 0x1f2   :  { %2889 = vmatpush1.bf16.msra.mxu0 %v6102_v49 }
 0x1f3   :  { %2890 = vmatprep.subr.bf16.mxu0 %v6111_v51  ;;  %v354_v51 = vld [vmem:[#allocation5 + $0x5d8] sm:$0xff] }
 0x1f4   :  { %2932 = vmatpush1.bf16.msra.mxu1 %v5856_v59  ;;  %v5929_v1 = vcombine.high %v354_v51, %v358_v52  ;;  %v5928_v44 = vcombine.low %v354_v51, %v358_v52  ;;  %v6639_v52 = vld [vmem:[#allocation8 + $0x1c4] ss:$16 sps:$4 sm:$0xff]  }
 0x1f5   :  { %2933 = vmatprep.subr.bf16.mxu1 %v5865_v62 }
 0x1f6   :  { %2891 = vmatpush1.bf16.msra.mxu0 %v6110_v60  ;;  %v5920_v60 = vcombine.low %v346_v42, %v350_v43  ;;  %v6631_v43 = vld [vmem:[#allocation8 + $0x180] ss:$16 sps:$4 sm:$0xff]  }
 0x1f7   :  { %2892 = vmatprep.subr.bf16.mxu0 %v6119_v63 }
 0x1f8   :  { %2934 = vmatpush1.bf16.msra.mxu1 %v5864_v2 }
 0x1f9   :  { %2944 = vmatprep.subr.bf16.mxu1 %v5873_v4  ;;  %v366_v4 = vld [vmem:[#allocation5 + $0x638] sm:$0xff] }
 0x1fa   :  { %2893 = vmatpush1.bf16.msra.mxu0 %v6118_v3  ;;  %v362_v3 = vld [vmem:[#allocation5 + $0x618] sm:$0xff] }
 0x1fb   :  { %4616 = vmatprep.subr.bf16.mxu0 %v6597_v5  ;;  %2936 = vmatmul.mubr.bf16.vlgmr.msra.gmra.mrb[8].mxu1 %v7571_v16  ;;  %v6601_v16 = vld [vmem:[#allocation8 + $0x40] ss:$16 sps:$4 sm:$0xff]   ;;  %v5936_v13 = vcombine.low %v362_v3, %v366_v4 }
 0x1fc   :  { %2945 = vmatpush1.bf16.msra.mxu1 %v5872_v8  ;;  %2976 = vmatprep.mubr.bf16.mxu1 %v7565_v61  ;;  %v7614_v61 = vsub.s32 0, %v7611_v58  ;;  %v5937_v8 = vcombine.high %v362_v3, %v366_v4  ;;  %v6640_v3 = vld [vmem:[#allocation8 + $0x1e0] ss:$16 sps:$4 sm:$0xff]  }
 0x1fd   :  { %2895 = vmatmul.mubr.bf16.vlgmr.msra.gmra.mrb[4].mxu0 %v7589_v32  ;;  %2946 = vmatprep.subr.bf16.mxu1 %v5881_v10  ;;  %v6621_v10 = vld [vmem:[#allocation8 + $0x104] ss:$16 sps:$4 sm:$0xff]  }
 0x1fe   :  { %4617 = vmatpush1.bf16.msra.mxu0 %v6595_v9  ;;  %v556_v40 = vrot.slane %v7616_v35, %v7614_v61 }
 0x1ff   :  { %4618 = vmatprep.subr.bf16.mxu0 %v6600_v11  ;;  %v370_v11 = vld [vmem:[#allocation5 + $0x658] sm:$0xff] }
 0x200   :  { %2947 = vmatpush1.bf16.msra.mxu1 %v5880_v14  ;;  %v2569_v49 = vadd.f32 %v7603_v41, %v556_v40  ;;  %v6618_v41 = vld [vmem:[#allocation8 + $0xe4] ss:$16 sps:$4 sm:$0xff]   ;;  %v6619_v14 = vld [vmem:[#allocation8 + $0x100] ss:$16 sps:$4 sm:$0xff]   ;;  %v5944_v23 = vcombine.low %v370_v11, %v374_v12 }
 0x201   :  { %2948 = vmatprep.subr.bf16.mxu1 %v5889_v17  ;;  %v6624_v17 = vld [vmem:[#allocation8 + $0x124] ss:$16 sps:$4 sm:$0xff]  }
 0x202   :  { %4619 = vmatpush1.bf16.msra.mxu0 %v6598_v15  ;;  %v5945_v15 = vcombine.high %v370_v11, %v374_v12  ;;  %v402_v40 = vld [vmem:[#allocation5 + $0x758] sm:$0xff] }
 0x203   :  { %4620 = vmatprep.subr.bf16.mxu0 %v6603_v20  ;;  %v378_v20 = vld [vmem:[#allocation5 + $0x698] sm:$0xff] }
 0x204   :  { %2949 = vmatpush1.bf16.msra.mxu1 %v5888_v24  ;;  %v6622_v24 = vld [vmem:[#allocation8 + $0x120] ss:$16 sps:$4 sm:$0xff]   ;;  %v5952_v27 = vcombine.low %v378_v20, %v382_v22 }
 0x205   :  { %2950 = vmatprep.subr.bf16.mxu1 %v5897_v25  ;;  %v6627_v25 = vld [vmem:[#allocation8 + $0x144] ss:$16 sps:$4 sm:$0xff]   ;;  %v6643_v11 = vld [vmem:[#allocation8 + $0x200] ss:$16 sps:$4 sm:$0xff]  }
 0x206   :  { %4621 = vmatpush1.bf16.msra.mxu0 %v6601_v16  ;;  %v5953_v16 = vcombine.high %v378_v20, %v382_v22  ;;  %v6646_v20 = vld [vmem:[#allocation8 + $0x220] ss:$16 sps:$4 sm:$0xff]  }
 0x207   :  { %4622 = vmatprep.subr.bf16.mxu0 %v6606_v26  ;;  %v386_v26 = vld [vmem:[#allocation5 + $0x6d8] sm:$0xff] }
 0x208   :  { %2951 = vmatpush1.bf16.msra.mxu1 %v5896_v54  ;;  %v6625_v54 = vld [vmem:[#allocation8 + $0x140] ss:$16 sps:$4 sm:$0xff]   ;;  %v5960_v34 = vcombine.low %v386_v26, %v390_v53 }
 0x209   :  { %2952 = vmatprep.subr.bf16.mxu1 %v5905_v30  ;;  %v6630_v30 = vld [vmem:[#allocation8 + $0x164] ss:$16 sps:$4 sm:$0xff]  }
 0x20a   :  { %4623 = vmatpush1.bf16.msra.mxu0 %v6604_v29  ;;  %v5961_v29 = vcombine.high %v386_v26, %v390_v53  ;;  %v450_v22 = vld [vmem:[#allocation5 + $0x8d8] sm:$0xff] }
 0x20b   :  { %4624 = vmatprep.subr.bf16.mxu0 %v6609_v31  ;;  %v394_v31 = vld [vmem:[#allocation5 + $0x718] sm:$0xff] }
 0x20c   :  { %2953 = vmatpush1.bf16.msra.mxu1 %v5904_v37  ;;  %v6628_v37 = vld [vmem:[#allocation8 + $0x160] ss:$16 sps:$4 sm:$0xff]   ;;  %v5968_v42 = vcombine.low %v394_v31, %v398_v33 }
 0x20d   :  { %2954 = vmatprep.subr.bf16.mxu1 %v5913_v39  ;;  %v6633_v39 = vld [vmem:[#allocation8 + $0x184] ss:$16 sps:$4 sm:$0xff]  }
 0x20e   :  { %4625 = vmatpush1.bf16.msra.mxu0 %v6607_v38  ;;  %v5969_v38 = vcombine.high %v394_v31, %v398_v33  ;;  %v458_v26 = vld [vmem:[#allocation5 + $0x918] sm:$0xff] }
 0x20f   :  { %4626 = vmatprep.subr.bf16.mxu0 %v6612_v19  ;;  %v406_v19 = vld [vmem:[#allocation5 + $0x778] sm:$0xff] }
 0x210   :  { %v2650_v56 = vpop.f32.mrb[0].mxu0  ;;  %2955 = vmatpush1.bf16.msra.mxu1 %v5912_v46  ;;  %v5977_v45 = vcombine.high %v402_v40, %v406_v19  ;;  %v6636_v46 = vld [vmem:[#allocation8 + $0x1a4] ss:$16 sps:$4 sm:$0xff]  }
 0x211   :  { %v7627_v57 = vadd.f32 %v2650_v56, %v2569_v49  ;;  %v2652_v59 = vpop.f32.mrb[1].mxu0  ;;  %2956 = vmatprep.subr.bf16.mxu1 %v5921_v48  ;;  %v414_v48 = vld [vmem:[#allocation5 + $0x7b8] sm:$0xff]  ;;  %v5976_v49 = vcombine.low %v402_v40, %v406_v19 }
 0x212   :  { %v6499_v62 = vadd.f32 %v2652_v59, %v2571_v55  ;;  %v2654_v63 = vpop.f32.mrb[2].mxu0  ;;  %4627 = vmatpush1.bf16.msra.mxu0 %v6610_v47  ;;  %v410_v47 = vld [vmem:[#allocation5 + $0x798] sm:$0xff] }
 0x213   :  { %v2655_v2 = vpop.f32.mrb[3].mxu0  ;;  %4628 = vmatprep.subr.bf16.mxu0 %v6615_v50  ;;  %v6634_v50 = vld [vmem:[#allocation8 + $0x1a0] ss:$16 sps:$4 sm:$0xff]   ;;  %v5985_v51 = vcombine.high %v410_v47, %v414_v48  ;;  %v5984_v59 = vcombine.low %v410_v47, %v414_v48  ;;  %v6642_v63 = vld [vmem:[#allocation8 + $0x1e4] ss:$16 sps:$4 sm:$0xff]   ;;  %vm3026_vm1 = vcmp.ge.f32.partialorder %v7627_v57, 0.0 }
 0x214   :  { %vm3027_vm0 = vcmp.ge.f32.partialorder %v6499_v62, 0.0  ;;  %v3035_v5 = vmul.f32 0.01, %v6499_v62  ;;  %2957 = vmatpush1.bf16.msra.mxu1 %v5920_v60  ;;  %v418_v55 = vld [vmem:[#allocation5 + $0x7d8] sm:$0xff]  ;;  %v3034_v2 = vmul.f32 0.01, %v7627_v57 }
 0x215   :  { %2958 = vmatprep.subr.bf16.mxu1 %v5929_v1  ;;  %v422_v56 = vld [vmem:[#allocation5 + $0x7f8] sm:$0xff] }
 0x216   :  { %4629 = vmatpush1.bf16.msra.mxu0 %v6613_v0  ;;  %v3043_v7 = vsel %vm3027_vm0, %v6499_v62, %v3035_v5  ;;  %v6637_v60 = vld [vmem:[#allocation8 + $0x1c0] ss:$16 sps:$4 sm:$0xff]   ;;  %v5993_v62 = vcombine.high %v418_v55, %v422_v56  ;;  %v6660_v19 = vld [vmem:[#allocation8 + $0x2a4] ss:$16 sps:$4 sm:$0xff]  }
 0x217   :  { %4630 = vmatprep.subr.bf16.mxu0 %v6618_v41  ;;  %v7629_v9 = vpack.c.bf16 %v3043_v7, %v3043_v7  ;;  %v426_v0 = vld [vmem:[#allocation5 + $0x818] sm:$0xff]  ;;  %v5992_v41 = vcombine.low %v418_v55, %v422_v56  ;;  %v3042_v7 = vsel %vm3026_vm1, %v7627_v57, %v3034_v2 }
 0x218   :  { %2959 = vmatpush1.bf16.msra.mxu1 %v5928_v44  ;;  %v430_v1 = vld [vmem:[#allocation5 + $0x838] sm:$0xff]  ;;  %v7635_v12 = vpack.c.bf16 %v3042_v7, %v3042_v7 }
 0x219   :  { %4648 = vmatprep.mubr.bf16.mxu0 %v7629_v9  ;;  %2960 = vmatprep.subr.bf16.mxu1 %v5937_v8  ;;  %v6001_v4 = vcombine.high %v426_v0, %v430_v1  ;;  %v434_v5 = vld [vmem:[#allocation5 + $0x858] sm:$0xff]  ;;  %v6000_v8 = vcombine.low %v426_v0, %v430_v1 }
 0x21a   :  { %4631 = vmatpush1.bf16.msra.mxu0 %v6616_v6  ;;  %v438_v44 = vld [vmem:[#allocation5 + $0x878] sm:$0xff] }
 0x21b   :  { %4632 = vmatprep.subr.bf16.mxu0 %v6621_v10  ;;  %v6645_v6 = vld [vmem:[#allocation8 + $0x204] ss:$16 sps:$4 sm:$0xff]   ;;  %v6009_v10 = vcombine.high %v434_v5, %v438_v44 }
 0x21c   :  { %2961 = vmatpush1.bf16.msra.mxu1 %v5936_v13  ;;  %v442_v13 = vld [vmem:[#allocation5 + $0x898] sm:$0xff] }
 0x21d   :  { %2962 = vmatprep.subr.bf16.mxu1 %v5945_v15  ;;  %v6648_v15 = vld [vmem:[#allocation8 + $0x224] ss:$16 sps:$4 sm:$0xff]  }
 0x21e   :  { %4633 = vmatpush1.bf16.msra.mxu0 %v6619_v14  ;;  %v446_v14 = vld [vmem:[#allocation5 + $0x8b8] sm:$0xff] }
 0x21f   :  { %4634 = vmatprep.subr.bf16.mxu0 %v6624_v17  ;;  %v6008_v17 = vcombine.low %v434_v5, %v438_v44  ;;  %v6017_v57 = vcombine.high %v442_v13, %v446_v14  ;;  %v462_v53 = vld [vmem:[#allocation5 + $0x938] sm:$0xff] }
 0x220   :  { %2963 = vmatpush1.bf16.msra.mxu1 %v5944_v23  ;;  %v454_v23 = vld [vmem:[#allocation5 + $0x8f8] sm:$0xff] }
 0x221   :  { %2964 = vmatprep.subr.bf16.mxu1 %v5953_v16  ;;  %v6016_v16 = vcombine.low %v442_v13, %v446_v14  ;;  %v466_v31 = vld [vmem:[#allocation5 + $0x958] sm:$0xff] }
 0x222   :  { %4635 = vmatpush1.bf16.msra.mxu0 %v6622_v24  ;;  %v6651_v24 = vld [vmem:[#allocation8 + $0x244] ss:$16 sps:$4 sm:$0xff]  }
 0x223   :  { %4636 = vmatprep.subr.bf16.mxu0 %v6627_v25  ;;  %v6025_v25 = vcombine.high %v450_v22, %v454_v23  ;;  %v470_v33 = vld [vmem:[#allocation5 + $0x978] sm:$0xff] }
 0x224   :  { %2965 = vmatpush1.bf16.msra.mxu1 %v5952_v27  ;;  %v6654_v27 = vld [vmem:[#allocation8 + $0x264] ss:$16 sps:$4 sm:$0xff]  }
 0x225   :  { %2966 = vmatprep.subr.bf16.mxu1 %v5961_v29  ;;  %v6033_v29 = vcombine.high %v458_v26, %v462_v53  ;;  %v478_v40 = vld [vmem:[#allocation5 + $0x9b8] sm:$0xff] }
 0x226   :  { %4637 = vmatpush1.bf16.msra.mxu0 %v6625_v54  ;;  %v6024_v54 = vcombine.low %v450_v22, %v454_v23  ;;  %v486_v47 = vld [vmem:[#allocation5 + $0x9f8] sm:$0xff] }
 0x227   :  { %4638 = vmatprep.subr.bf16.mxu0 %v6630_v30  ;;  %v6652_v30 = vld [vmem:[#allocation8 + $0x260] ss:$16 sps:$4 sm:$0xff]   ;;  %v6663_v48 = vld [vmem:[#allocation8 + $0x2c4] ss:$16 sps:$4 sm:$0xff]  }
 0x228   :  { %2967 = vmatpush1.bf16.msra.mxu1 %v5960_v34  ;;  %v6032_v34 = vcombine.low %v458_v26, %v462_v53  ;;  %v494_v55 = vld [vmem:[#allocation5 + $0xa38] sm:$0xff] }
 0x229   :  { %2968 = vmatprep.subr.bf16.mxu1 %v5969_v38  ;;  %v6655_v38 = vld [vmem:[#allocation8 + $0x280] ss:$16 sps:$4 sm:$0xff]   ;;  %v6666_v56 = vld [vmem:[#allocation8 + $0x2e4] ss:$16 sps:$4 sm:$0xff]  }
 0x22a   :  { %4639 = vmatpush1.bf16.msra.mxu0 %v6628_v37  ;;  %v6041_v37 = vcombine.high %v466_v31, %v470_v33  ;;  %v502_v0 = vld [vmem:[#allocation5 + $0xa78] sm:$0xff] }
 0x22b   :  { %4640 = vmatprep.subr.bf16.mxu0 %v6633_v39  ;;  %v474_v39 = vld [vmem:[#allocation5 + $0x998] sm:$0xff] }
 0x22c   :  { %2969 = vmatpush1.bf16.msra.mxu1 %v5968_v42  ;;  %v6040_v42 = vcombine.low %v466_v31, %v470_v33  ;;  %v6669_v1 = vld [vmem:[#allocation8 + $0x304] ss:$16 sps:$4 sm:$0xff]  }
 0x22d   :  { %2970 = vmatprep.subr.bf16.mxu1 %v5977_v45  ;;  %v6658_v45 = vld [vmem:[#allocation8 + $0x2a0] ss:$16 sps:$4 sm:$0xff]   ;;  %v6675_v44 = vld [vmem:[#allocation8 + $0x324] ss:$16 sps:$4 sm:$0xff]  }
 0x22e   :  { %4641 = vmatpush1.bf16.msra.mxu0 %v6631_v43  ;;  %v6049_v43 = vcombine.high %v474_v39, %v478_v40  ;;  %v510_v5 = vld [vmem:[#allocation5 + $0xab8] sm:$0xff] }
 0x22f   :  { %4642 = vmatprep.subr.bf16.mxu0 %v6636_v46  ;;  %v482_v46 = vld [vmem:[#allocation5 + $0x9d8] sm:$0xff] }
 0x230   :  { %2971 = vmatpush1.bf16.msra.mxu1 %v5976_v49  ;;  %v6048_v49 = vcombine.low %v474_v39, %v478_v40  ;;  %v6681_v13 = vld [vmem:[#allocation8 + $0x344] ss:$16 sps:$4 sm:$0xff]  }
 0x231   :  { %2972 = vmatprep.subr.bf16.mxu1 %v5985_v51  ;;  %v6661_v51 = vld [vmem:[#allocation8 + $0x2c0] ss:$16 sps:$4 sm:$0xff]   ;;  %v6687_v22 = vld [vmem:[#allocation8 + $0x364] ss:$16 sps:$4 sm:$0xff]  }
 0x232   :  { %4643 = vmatpush1.bf16.msra.mxu0 %v6634_v50  ;;  %v6057_v50 = vcombine.high %v482_v46, %v486_v47  ;;  %v6693_v26 = vld [vmem:[#allocation8 + $0x384] ss:$16 sps:$4 sm:$0xff]  }
 0x233   :  { %4644 = vmatprep.subr.bf16.mxu0 %v6639_v52  ;;  %v490_v52 = vld [vmem:[#allocation5 + $0xa18] sm:$0xff] }
 0x234   :  { %2973 = vmatpush1.bf16.msra.mxu1 %v5984_v59  ;;  %v6056_v59 = vcombine.low %v482_v46, %v486_v47  ;;  %v6064_v2 = vcombine.low %v490_v52, %v494_v55  ;;  %v6699_v31 = vld [vmem:[#allocation8 + $0x3a4] ss:$16 sps:$4 sm:$0xff]   ;;  %v6672_v46 = vld [vmem:[#allocation8 + $0xc] ss:$16 sps:$4 sm:$0xff]   ;;  %v6709_v47 = vld [vmem:[#allocation8 + $0x3e0] ss:$16 sps:$4 sm:$0xff]  }
 0x235   :  { %2974 = vmatprep.subr.bf16.mxu1 %v5993_v62  ;;  %v6664_v62 = vld [vmem:[#allocation8 + $0x2e0] ss:$16 sps:$4 sm:$0xff]   ;;  %v6705_v39 = vld [vmem:[#allocation8 + $0x3c4] ss:$16 sps:$4 sm:$0xff]  }
 0x236   :  { %4645 = vmatpush1.bf16.msra.mxu0 %v6637_v60  ;;  %v6065_v60 = vcombine.high %v490_v52, %v494_v55  ;;  %v6684_v52 = vld [vmem:[#allocation8 + $0x4c] ss:$16 sps:$4 sm:$0xff]   ;;  %v6682_v55 = vld [vmem:[#allocation8 + $0x48] ss:$16 sps:$4 sm:$0xff]  }
 0x237   :  { %4646 = vmatprep.subr.bf16.mxu0 %v6642_v63  ;;  %v498_v63 = vld [vmem:[#allocation5 + $0xa58] sm:$0xff] }
 0x238   :  { %2975 = vmatpush1.bf16.msra.mxu1 %v5992_v41  ;;  %v6073_v41 = vcombine.high %v498_v63, %v502_v0 }
 0x239   :  { %2985 = vmatprep.subr.bf16.mxu1 %v6001_v4  ;;  %v506_v4 = vld [vmem:[#allocation5 + $0xa98] sm:$0xff] }
 0x23a   :  { %4647 = vmatpush1.bf16.msra.mxu0 %v6640_v3  ;;  %v6667_v3 = vld [vmem:[#allocation8 + $0x300] ss:$16 sps:$4 sm:$0xff]   ;;  %v6081_v7 = vcombine.high %v506_v4, %v510_v5  ;;  %v6080_v14 = vcombine.low %v506_v4, %v510_v5 }
 0x23b   :  { %4657 = vmatprep.subr.bf16.mxu0 %v6645_v6  ;;  %2977 = vmatmul.mubr.bf16.vlgmr.msra.gmra.mrb[8].mxu1 %v7577_v21  ;;  %v6649_v21 = vld [vmem:[#allocation8 + $0x240] ss:$16 sps:$4 sm:$0xff]   ;;  %v6072_v6 = vcombine.low %v498_v63, %v502_v0  ;;  %v6694_v63 = vld [vmem:[#allocation8 + $0x88] ss:$16 sps:$4 sm:$0xff]   ;;  %v6702_v0 = vld [vmem:[#allocation8 + $0xac] ss:$16 sps:$4 sm:$0xff]  }
 0x23c   :  { %2986 = vmatpush1.bf16.msra.mxu1 %v6000_v8  ;;  %3017 = vmatprep.mubr.bf16.mxu1 %v7581_v28  ;;  %v6657_v28 = vld [vmem:[#allocation8 + $0x284] ss:$16 sps:$4 sm:$0xff]   ;;  %v6673_v8 = vld [vmem:[#allocation8 + $0x320] ss:$16 sps:$4 sm:$0xff]  }
 0x23d   :  { %4649 = vmatmul.mubr.bf16.vlgmr.msra.gmra.mrb[8].mxu0 %v7635_v12  ;;  %2987 = vmatprep.subr.bf16.mxu1 %v6009_v10  ;;  %v514_v10 = vld [vmem:[#allocation5 + $0xad8] sm:$0xff] }
 0x23e   :  { %4658 = vmatpush1.bf16.msra.mxu0 %v6643_v11  ;;  %v518_v11 = vld [vmem:[#allocation5 + $0xaf8] sm:$0xff] }
 0x23f   :  { %4659 = vmatprep.subr.bf16.mxu0 %v6648_v15  ;;  %v6089_v15 = vcombine.high %v514_v10, %v518_v11  ;;  %v6088_v23 = vcombine.low %v514_v10, %v518_v11  ;;  %v6714_v11 = vld [vmem:[#allocation8 + $0xec] ss:$16 sps:$4 sm:$0xff]  }
 0x240   :  { %2988 = vmatpush1.bf16.msra.mxu1 %v6008_v17  ;;  %v6679_v17 = vld [vmem:[#allocation8 + $0x340] ss:$16 sps:$4 sm:$0xff]  }
 0x241   :  { %2989 = vmatprep.subr.bf16.mxu1 %v6017_v57  ;;  %v522_v57 = vld [vmem:[#allocation5 + $0xb18] sm:$0xff] }
 0x242   :  { %4660 = vmatpush1.bf16.msra.mxu0 %v6646_v20  ;;  %v526_v20 = vld [vmem:[#allocation5 + $0xb38] sm:$0xff] }
 0x243   :  { %4661 = vmatprep.subr.bf16.mxu0 %v6651_v24  ;;  %v6097_v24 = vcombine.high %v522_v57, %v526_v20  ;;  %v6096_v53 = vcombine.low %v522_v57, %v526_v20  ;;  %v6715_v20 = vld [vmem:[#allocation8 + $0x400] ss:$16 sps:$4 sm:$0xff]  }
 0x244   :  { %2990 = vmatpush1.bf16.msra.mxu1 %v6016_v16  ;;  %v6685_v16 = vld [vmem:[#allocation8 + $0x360] ss:$16 sps:$4 sm:$0xff]  }
 0x245   :  { %2991 = vmatprep.subr.bf16.mxu1 %v6025_v25  ;;  %v530_v25 = vld [vmem:[#allocation5 + $0xb58] sm:$0xff] }
 0x246   :  { %4662 = vmatpush1.bf16.msra.mxu0 %v6649_v21  ;;  %v534_v21 = vld [vmem:[#allocation5 + $0xb78] sm:$0xff] }
 0x247   :  { %4663 = vmatprep.subr.bf16.mxu0 %v6654_v27  ;;  %v6105_v27 = vcombine.high %v530_v25, %v534_v21  ;;  %v6104_v33 = vcombine.low %v530_v25, %v534_v21  ;;  %v6721_v25 = vld [vmem:[#allocation8 + $0x420] ss:$16 sps:$4 sm:$0xff]   ;;  %v6726_v21 = vld [vmem:[#allocation8 + $0x12c] ss:$16 sps:$4 sm:$0xff]  }
 0x248   :  { %2992 = vmatpush1.bf16.msra.mxu1 %v6024_v54  ;;  %v6691_v54 = vld [vmem:[#allocation8 + $0x380] ss:$16 sps:$4 sm:$0xff]  }
 0x249   :  { %2993 = vmatprep.subr.bf16.mxu1 %v6033_v29  ;;  %v538_v29 = vld [vmem:[#allocation5 + $0xb98] sm:$0xff] }
 0x24a   :  { %4664 = vmatpush1.bf16.msra.mxu0 %v6652_v30  ;;  %v542_v30 = vld [vmem:[#allocation5 + $0xbb8] sm:$0xff] }
 0x24b   :  { %4665 = vmatprep.subr.bf16.mxu0 %v6657_v28  ;;  %v6113_v28 = vcombine.high %v538_v29, %v542_v30  ;;  %v6112_v40 = vcombine.low %v538_v29, %v542_v30  ;;  %v6735_v29 = vld [vmem:[#allocation8 + $0x464] ss:$16 sps:$4 sm:$0xff]   ;;  %v6730_v30 = vld [vmem:[#allocation8 + $0x148] ss:$16 sps:$4 sm:$0xff]  }
 0x24c   :  { %2994 = vmatpush1.bf16.msra.mxu1 %v6032_v34  ;;  %v6697_v34 = vld [vmem:[#allocation8 + $0x3a0] ss:$16 sps:$4 sm:$0xff]  }
 0x24d   :  { %2995 = vmatprep.subr.bf16.mxu1 %v6041_v37  ;;  %v546_v37 = vld [vmem:[#allocation5 + $0xbd8] sm:$0xff] }
 0x24e   :  { %4666 = vmatpush1.bf16.msra.mxu0 %v6655_v38  ;;  %v550_v38 = vld [vmem:[#allocation5 + $0xbf8] sm:$0xff] }
 0x24f   :  { %4667 = vmatprep.subr.bf16.mxu0 %v6660_v19  ;;  %v6121_v19 = vcombine.high %v546_v37, %v550_v38 }
 0x250   :  { %2996 = vmatpush1.bf16.msra.mxu1 %v6040_v42  ;;  %v6703_v42 = vld [vmem:[#allocation8 + $0x3c0] ss:$16 sps:$4 sm:$0xff]  }
 0x251   :  { %2997 = vmatprep.subr.bf16.mxu1 %v6049_v43  ;;  %v6711_v43 = vld [vmem:[#allocation8 + $0x3e4] ss:$16 sps:$4 sm:$0xff]  }
 0x252   :  { %4668 = vmatpush1.bf16.msra.mxu0 %v6658_v45  ;;  %v6120_v45 = vcombine.low %v546_v37, %v550_v38  ;;  %v6739_v37 = vld [vmem:[#allocation8 + $0x480] ss:$16 sps:$4 sm:$0xff]   ;;  %v6744_v38 = vld [vmem:[#allocation8 + $0x18c] ss:$16 sps:$4 sm:$0xff]  }
 0x253   :  { %4669 = vmatprep.subr.bf16.mxu0 %v6663_v48  ;;  %v6717_v48 = vld [vmem:[#allocation8 + $0x404] ss:$16 sps:$4 sm:$0xff]  }
 0x254   :  { %2998 = vmatpush1.bf16.msra.mxu1 %v6048_v49  ;;  %v6670_v49 = vld [vmem:[#allocation8 + $0x8] ss:$16 sps:$4 sm:$0xff]  }
 0x255   :  { %2999 = vmatprep.subr.bf16.mxu1 %v6057_v50  ;;  %v6678_v50 = vld [vmem:[#allocation8 + $0x2c] ss:$16 sps:$4 sm:$0xff]  }
 0x256   :  { %4670 = vmatpush1.bf16.msra.mxu0 %v6661_v51  ;;  %v6676_v51 = vld [vmem:[#allocation8 + $0x28] ss:$16 sps:$4 sm:$0xff]  }
 0x257   :  { %4671 = vmatprep.subr.bf16.mxu0 %v6666_v56  ;;  %v6690_v56 = vld [vmem:[#allocation8 + $0x6c] ss:$16 sps:$4 sm:$0xff]  }
 0x258   :  { %3000 = vmatpush1.bf16.msra.mxu1 %v6056_v59  ;;  %v6688_v59 = vld [vmem:[#allocation8 + $0x68] ss:$16 sps:$4 sm:$0xff]  }
 0x259   :  { %3001 = vmatprep.subr.bf16.mxu1 %v6065_v60  ;;  %v6696_v60 = vld [vmem:[#allocation8 + $0x8c] ss:$16 sps:$4 sm:$0xff]  }
 0x25a   :  { %4672 = vmatpush1.bf16.msra.mxu0 %v6664_v62  ;;  %v563_v62 = vsub.s32 2, %v7611_v58 }
 0x25b   :  { %4673 = vmatprep.subr.bf16.mxu0 %v6669_v1 }
 0x25c   :  { %3002 = vmatpush1.bf16.msra.mxu1 %v6064_v2  ;;  %v6700_v2 = vld [vmem:[#allocation8 + $0xa8] ss:$16 sps:$4 sm:$0xff]  }
 0x25d   :  { %3003 = vmatprep.subr.bf16.mxu1 %v6073_v41  ;;  %v6708_v41 = vld [vmem:[#allocation8 + $0xcc] ss:$16 sps:$4 sm:$0xff]  }
 0x25e   :  { %4674 = vmatpush1.bf16.msra.mxu0 %v6667_v3 }
 0x25f   :  { %4675 = vmatprep.subr.bf16.mxu0 %v6675_v44 }
 0x260   :  { %3004 = vmatpush1.bf16.msra.mxu1 %v6072_v6 }
 0x261   :  { %3005 = vmatprep.subr.bf16.mxu1 %v6081_v7  ;;  %v6706_v7 = vld [vmem:[#allocation8 + $0xc8] ss:$16 sps:$4 sm:$0xff]  }
 0x262   :  { %4676 = vmatpush1.bf16.msra.mxu0 %v6673_v8 }
 0x263   :  { %4677 = vmatprep.subr.bf16.mxu0 %v6681_v13 }
 0x264   :  { %3006 = vmatpush1.bf16.msra.mxu1 %v6080_v14 }
 0x265   :  { %3007 = vmatprep.subr.bf16.mxu1 %v6089_v15 }
 0x266   :  { %4678 = vmatpush1.bf16.msra.mxu0 %v6679_v17  ;;  %v6712_v17 = vld [vmem:[#allocation8 + $0xe8] ss:$16 sps:$4 sm:$0xff]  }
 0x267   :  { %4679 = vmatprep.subr.bf16.mxu0 %v6687_v22  ;;  %v6720_v22 = vld [vmem:[#allocation8 + $0x10c] ss:$16 sps:$4 sm:$0xff]  }
 0x268   :  { %3008 = vmatpush1.bf16.msra.mxu1 %v6088_v23 }
 0x269   :  { %3009 = vmatprep.subr.bf16.mxu1 %v6097_v24  ;;  %v6723_v24 = vld [vmem:[#allocation8 + $0x424] ss:$16 sps:$4 sm:$0xff]  }
 0x26a   :  { %4680 = vmatpush1.bf16.msra.mxu0 %v6685_v16  ;;  %v6718_v16 = vld [vmem:[#allocation8 + $0x108] ss:$16 sps:$4 sm:$0xff]  }
 0x26b   :  { %4681 = vmatprep.subr.bf16.mxu0 %v6693_v26  ;;  %v6729_v26 = vld [vmem:[#allocation8 + $0x444] ss:$16 sps:$4 sm:$0xff]  }
 0x26c   :  { %3010 = vmatpush1.bf16.msra.mxu1 %v6096_v53  ;;  %v6724_v53 = vld [vmem:[#allocation8 + $0x128] ss:$16 sps:$4 sm:$0xff]  }
 0x26d   :  { %3011 = vmatprep.subr.bf16.mxu1 %v6105_v27  ;;  %v6727_v27 = vld [vmem:[#allocation8 + $0x440] ss:$16 sps:$4 sm:$0xff]  }
 0x26e   :  { %4682 = vmatpush1.bf16.msra.mxu0 %v6691_v54  ;;  %v6732_v54 = vld [vmem:[#allocation8 + $0x14c] ss:$16 sps:$4 sm:$0xff]  }
 0x26f   :  { %4683 = vmatprep.subr.bf16.mxu0 %v6699_v31  ;;  %v6733_v31 = vld [vmem:[#allocation8 + $0x460] ss:$16 sps:$4 sm:$0xff]  }
 0x270   :  { %3012 = vmatpush1.bf16.msra.mxu1 %v6104_v33  ;;  %v6738_v33 = vld [vmem:[#allocation8 + $0x16c] ss:$16 sps:$4 sm:$0xff]  }
 0x271   :  { %3013 = vmatprep.subr.bf16.mxu1 %v6113_v28  ;;  %v6741_v28 = vld [vmem:[#allocation8 + $0x484] ss:$16 sps:$4 sm:$0xff]  }
 0x272   :  { %4684 = vmatpush1.bf16.msra.mxu0 %v6697_v34  ;;  %v6736_v34 = vld [vmem:[#allocation8 + $0x168] ss:$16 sps:$4 sm:$0xff]  }
 0x273   :  { %4685 = vmatprep.subr.bf16.mxu0 %v6705_v39  ;;  %v6747_v39 = vld [vmem:[#allocation8 + $0x4a4] ss:$16 sps:$4 sm:$0xff]  }
 0x274   :  { %3014 = vmatpush1.bf16.msra.mxu1 %v6112_v40  ;;  %v6742_v40 = vld [vmem:[#allocation8 + $0x188] ss:$16 sps:$4 sm:$0xff]  }
 0x275   :  { %3015 = vmatprep.subr.bf16.mxu1 %v6121_v19  ;;  %v6745_v19 = vld [vmem:[#allocation8 + $0x4a0] ss:$16 sps:$4 sm:$0xff]  }
 0x276   :  { %4686 = vmatpush1.bf16.msra.mxu0 %v6703_v42  ;;  %v6750_v42 = vld [vmem:[#allocation8 + $0x1ac] ss:$16 sps:$4 sm:$0xff]  }
 0x277   :  { %4687 = vmatprep.subr.bf16.mxu0 %v6711_v43  ;;  %v6753_v43 = vld [vmem:[#allocation8 + $0x4c4] ss:$16 sps:$4 sm:$0xff]  }
 0x278   :  { %3016 = vmatpush1.bf16.msra.mxu1 %v6120_v45  ;;  %v6748_v45 = vld [vmem:[#allocation8 + $0x1a8] ss:$16 sps:$4 sm:$0xff]  }
 0x279   :  { %4780 = vmatprep.subr.bf16.mxu1 %v6672_v46  ;;  %v6751_v46 = vld [vmem:[#allocation8 + $0x4c0] ss:$16 sps:$4 sm:$0xff]  }
 0x27a   :  { %4688 = vmatpush1.bf16.msra.mxu0 %v6709_v47  ;;  %v6756_v47 = vld [vmem:[#allocation8 + $0x1cc] ss:$16 sps:$4 sm:$0xff]  }
 0x27b   :  { %4698 = vmatprep.subr.bf16.mxu0 %v6717_v48  ;;  %3018 = vmatmul.mubr.bf16.vlgmr.msra.gmra.mrb[8].mxu1 %v7589_v32  ;;  %v567_v32 = vsub.s32 3, %v7611_v58  ;;  %v6759_v48 = vld [vmem:[#allocation8 + $0x4e4] ss:$16 sps:$4 sm:$0xff]  }
 0x27c   :  { %4781 = vmatpush1.bf16.msra.mxu1 %v6670_v49  ;;  %4812 = vmatprep.mubr.bf16.mxu1 %v7629_v9  ;;  %v564_v9 = vrot.slane %v7616_v35, %v563_v62  ;;  %v6754_v49 = vld [vmem:[#allocation8 + $0x1c8] ss:$16 sps:$4 sm:$0xff]  }
 0x27d   :  { %4782 = vmatprep.subr.bf16.mxu1 %v6678_v50  ;;  %v568_v1 = vrot.slane %v7616_v35, %v567_v32  ;;  %v6757_v50 = vld [vmem:[#allocation8 + $0x4e0] ss:$16 sps:$4 sm:$0xff]  }
 0x280   :  { %4783 = vmatpush1.bf16.msra.mxu1 %v6676_v51  ;;  %v6762_v51 = vld [vmem:[#allocation8 + $0x1ec] ss:$16 sps:$4 sm:$0xff]  }
 0x281   :  { %4784 = vmatprep.subr.bf16.mxu1 %v6684_v52  ;;  %v6765_v52 = vld [vmem:[#allocation8 + $0x504] ss:$16 sps:$4 sm:$0xff]  }
 0x284   :  { %4785 = vmatpush1.bf16.msra.mxu1 %v6682_v55  ;;  %v6760_v55 = vld [vmem:[#allocation8 + $0x1e8] ss:$16 sps:$4 sm:$0xff]  }
 0x285   :  { %4786 = vmatprep.subr.bf16.mxu1 %v6690_v56  ;;  %v6763_v56 = vld [vmem:[#allocation8 + $0x500] ss:$16 sps:$4 sm:$0xff]  }
 0x288   :  { %4787 = vmatpush1.bf16.msra.mxu1 %v6688_v59  ;;  %v6768_v59 = vld [vmem:[#allocation8 + $0x20c] ss:$16 sps:$4 sm:$0xff]  }
 0x289   :  { %4788 = vmatprep.subr.bf16.mxu1 %v6696_v60  ;;  %v6771_v60 = vld [vmem:[#allocation8 + $0x524] ss:$16 sps:$4 sm:$0xff]  }
 0x28c   :  { %4789 = vmatpush1.bf16.msra.mxu1 %v6694_v63  ;;  %v6766_v63 = vld [vmem:[#allocation8 + $0x208] ss:$16 sps:$4 sm:$0xff]  }
 0x28d   :  { %4790 = vmatprep.subr.bf16.mxu1 %v6702_v0  ;;  %v6769_v0 = vld [vmem:[#allocation8 + $0x520] ss:$16 sps:$4 sm:$0xff]  }
 0x28e   :  { %v2773_v3 = vpop.f32.mrb[4].mxu1 }
 0x28f   :  { %v6500_v4 = vadd.f32 %v2773_v3, %v564_v9  ;;  %v2775_v5 = vpop.f32.mrb[5].mxu1  ;;  %v6774_v9 = vld [vmem:[#allocation8 + $0x22c] ss:$16 sps:$4 sm:$0xff]  }
 0x290   :  { %v6501_v44 = vadd.f32 %v2775_v5, %v568_v1  ;;  %v2777_v6 = vpop.f32.mrb[6].mxu1  ;;  %4791 = vmatpush1.bf16.msra.mxu1 %v6700_v2  ;;  %v6777_v1 = vld [vmem:[#allocation8 + $0x544] ss:$16 sps:$4 sm:$0xff]   ;;  %v6772_v2 = vld [vmem:[#allocation8 + $0x228] ss:$16 sps:$4 sm:$0xff]  }
 0x291   :  { %vm3028_vm2 = vcmp.ge.f32.partialorder %v6500_v4, 0.0  ;;  %v3036_v8 = vmul.f32 0.01, %v6500_v4  ;;  %v2778_v10 = vpop.f32.mrb[7].mxu1  ;;  %4792 = vmatprep.subr.bf16.mxu1 %v6708_v41  ;;  %v6775_v41 = vld [vmem:[#allocation8 + $0x540] ss:$16 sps:$4 sm:$0xff]  }
 0x292   :  { %vm3029_vm3 = vcmp.ge.f32.partialorder %v6501_v44, 0.0  ;;  %v3037_v13 = vmul.f32 0.01, %v6501_v44  ;;  %v6780_v3 = vld [vmem:[#allocation8 + $0x24c] ss:$16 sps:$4 sm:$0xff]  }
 0x293   :  { %v3044_v14 = vsel %vm3028_vm2, %v6500_v4, %v3036_v8  ;;  %v6783_v4 = vld [vmem:[#allocation8 + $0x564] ss:$16 sps:$4 sm:$0xff]   ;;  %v6778_v5 = vld [vmem:[#allocation8 + $0x248] ss:$16 sps:$4 sm:$0xff]   ;;  %v6786_v6 = vld [vmem:[#allocation8 + $0x26c] ss:$16 sps:$4 sm:$0xff]  }
 0x294   :  { %4793 = vmatpush1.bf16.msra.mxu1 %v6706_v7  ;;  %v3045_v15 = vsel %vm3029_vm3, %v6501_v44, %v3037_v13  ;;  %v7652_v23 = vpack.c.bf16 %v3044_v14, %v3044_v14  ;;  %v6781_v44 = vld [vmem:[#allocation8 + $0x560] ss:$16 sps:$4 sm:$0xff]   ;;  %v6789_v7 = vld [vmem:[#allocation8 + $0x584] ss:$16 sps:$4 sm:$0xff]   ;;  %v6792_v10 = vld [vmem:[#allocation8 + $0x28c] ss:$16 sps:$4 sm:$0xff]  }
 0x295   :  { %v7650_v57 = vpack.c.bf16 %v3045_v15, %v3045_v15  ;;  %4794 = vmatprep.subr.bf16.mxu1 %v6714_v11  ;;  %v6787_v8 = vld [vmem:[#allocation8 + $0x580] ss:$16 sps:$4 sm:$0xff]   ;;  %v6795_v11 = vld [vmem:[#allocation8 + $0x5a4] ss:$16 sps:$4 sm:$0xff]   ;;  %v6790_v13 = vld [vmem:[#allocation8 + $0x288] ss:$16 sps:$4 sm:$0xff]  }
 0x296   :  { %v571_v14 = vsub.s32 4, %v7611_v58  ;;  %v6793_v15 = vld [vmem:[#allocation8 + $0x5a0] ss:$16 sps:$4 sm:$0xff]  }
 0x297   :  { %4689 = vmatprep.mubr.bf16.mxu0 %v7650_v57 }
 0x298   :  { %4690 = vmatmul.mubr.bf16.vlgmr.msra.gmra.mrb[8].mxu0 %v7652_v23  ;;  %4795 = vmatpush1.bf16.msra.mxu1 %v6712_v17  ;;  %v575_v17 = vsub.s32 5, %v7611_v58 }
 0x299   :  { %4699 = vmatpush1.bf16.msra.mxu0 %v6715_v20  ;;  %4796 = vmatprep.subr.bf16.mxu1 %v6720_v22  ;;  %v6801_v20 = vld [vmem:[#allocation8 + $0x5c4] ss:$16 sps:$4 sm:$0xff]   ;;  %v572_v22 = vrot.slane %v7616_v35, %v571_v14  ;;  %v6901_v14 = vld [vmem:[#allocation8 + $0x6e0] ss:$16 sps:$4 sm:$0xff]  }
 0x29a   :  { %4700 = vmatprep.subr.bf16.mxu0 %v6723_v24  ;;  %v6796_v24 = vld [vmem:[#allocation8 + $0x2a8] ss:$16 sps:$4 sm:$0xff]  }
 0x29c   :  { %4797 = vmatpush1.bf16.msra.mxu1 %v6718_v16  ;;  %v576_v16 = vrot.slane %v7616_v35, %v575_v17  ;;  %v6861_v35 = vld [vmem:[#allocation8 + $0x604] ss:$16 sps:$4 sm:$0xff]   ;;  %v6832_v17 = vld [vmem:[#allocation8 + $0x3e8] ss:$16 sps:$4 sm:$0xff]  }
 0x29d   :  { %4701 = vmatpush1.bf16.msra.mxu0 %v6721_v25  ;;  %4798 = vmatprep.subr.bf16.mxu1 %v6726_v21  ;;  %v6799_v25 = vld [vmem:[#allocation8 + $0x5c0] ss:$16 sps:$4 sm:$0xff]   ;;  %v6804_v21 = vld [vmem:[#allocation8 + $0x2cc] ss:$16 sps:$4 sm:$0xff]  }
 0x29e   :  { %4702 = vmatprep.subr.bf16.mxu0 %v6729_v26  ;;  %v6807_v26 = vld [vmem:[#allocation8 + $0x5e4] ss:$16 sps:$4 sm:$0xff]  }
 0x2a0   :  { %4799 = vmatpush1.bf16.msra.mxu1 %v6724_v53 }
 0x2a1   :  { %4703 = vmatpush1.bf16.msra.mxu0 %v6727_v27  ;;  %4800 = vmatprep.subr.bf16.mxu1 %v6732_v54 }
 0x2a2   :  { %4704 = vmatprep.subr.bf16.mxu0 %v6735_v29  ;;  %v6802_v29 = vld [vmem:[#allocation8 + $0x2c8] ss:$16 sps:$4 sm:$0xff]  }
 0x2a4   :  { %4801 = vmatpush1.bf16.msra.mxu1 %v6730_v30 }
 0x2a5   :  { %4705 = vmatpush1.bf16.msra.mxu0 %v6733_v31  ;;  %4802 = vmatprep.subr.bf16.mxu1 %v6738_v33  ;;  %v6805_v33 = vld [vmem:[#allocation8 + $0x5e0] ss:$16 sps:$4 sm:$0xff]  }
 0x2a6   :  { %4706 = vmatprep.subr.bf16.mxu0 %v6741_v28  ;;  %v6810_v28 = vld [vmem:[#allocation8 + $0x2ec] ss:$16 sps:$4 sm:$0xff]  }
 0x2a8   :  { %4803 = vmatpush1.bf16.msra.mxu1 %v6736_v34 }
 0x2a9   :  { %4707 = vmatpush1.bf16.msra.mxu0 %v6739_v37  ;;  %4804 = vmatprep.subr.bf16.mxu1 %v6744_v38 }
 0x2aa   :  { %4708 = vmatprep.subr.bf16.mxu0 %v6747_v39 }
 0x2ac   :  { %4805 = vmatpush1.bf16.msra.mxu1 %v6742_v40  ;;  %v6808_v40 = vld [vmem:[#allocation8 + $0x2e8] ss:$16 sps:$4 sm:$0xff]  }
 0x2ad   :  { %4709 = vmatpush1.bf16.msra.mxu0 %v6745_v19  ;;  %4806 = vmatprep.subr.bf16.mxu1 %v6750_v42  ;;  %v6813_v42 = vld [vmem:[#allocation8 + $0x30c] ss:$16 sps:$4 sm:$0xff]  }
 0x2ae   :  { %4710 = vmatprep.subr.bf16.mxu0 %v6753_v43 }
 0x2b0   :  { %4807 = vmatpush1.bf16.msra.mxu1 %v6748_v45  ;;  %v6859_v45 = vld [vmem:[#allocation8 + $0x600] ss:$16 sps:$4 sm:$0xff]  }
 0x2b1   :  { %4711 = vmatpush1.bf16.msra.mxu0 %v6751_v46  ;;  %4808 = vmatprep.subr.bf16.mxu1 %v6756_v47  ;;  %v6867_v47 = vld [vmem:[#allocation8 + $0x624] ss:$16 sps:$4 sm:$0xff]  }
 0x2b2   :  { %4712 = vmatprep.subr.bf16.mxu0 %v6759_v48  ;;  %v6811_v48 = vld [vmem:[#allocation8 + $0x308] ss:$16 sps:$4 sm:$0xff]  }
 0x2b4   :  { %4809 = vmatpush1.bf16.msra.mxu1 %v6754_v49  ;;  %v6816_v49 = vld [vmem:[#allocation8 + $0x32c] ss:$16 sps:$4 sm:$0xff]  }
 0x2b5   :  { %4713 = vmatpush1.bf16.msra.mxu0 %v6757_v50  ;;  %4810 = vmatprep.subr.bf16.mxu1 %v6762_v51  ;;  %v6865_v50 = vld [vmem:[#allocation8 + $0x620] ss:$16 sps:$4 sm:$0xff]   ;;  %v6873_v51 = vld [vmem:[#allocation8 + $0x644] ss:$16 sps:$4 sm:$0xff]  }
 0x2b6   :  { %4714 = vmatprep.subr.bf16.mxu0 %v6765_v52  ;;  %v6814_v52 = vld [vmem:[#allocation8 + $0x328] ss:$16 sps:$4 sm:$0xff]  }
 0x2b8   :  { %4811 = vmatpush1.bf16.msra.mxu1 %v6760_v55  ;;  %v6819_v55 = vld [vmem:[#allocation8 + $0x34c] ss:$16 sps:$4 sm:$0xff]  }
 0x2b9   :  { %4715 = vmatpush1.bf16.msra.mxu0 %v6763_v56  ;;  %4821 = vmatprep.subr.bf16.mxu1 %v6768_v59  ;;  %v6871_v56 = vld [vmem:[#allocation8 + $0x640] ss:$16 sps:$4 sm:$0xff]   ;;  %v6879_v59 = vld [vmem:[#allocation8 + $0x664] ss:$16 sps:$4 sm:$0xff]  }
 0x2ba   :  { %4716 = vmatprep.subr.bf16.mxu0 %v6771_v60  ;;  %v6817_v60 = vld [vmem:[#allocation8 + $0x348] ss:$16 sps:$4 sm:$0xff]  }
 0x2bb   :  { %4813 = vmatmul.mubr.bf16.vlgmr.msra.gmra.mrb[12].mxu1 %v7635_v12  ;;  %v6784_v12 = vld [vmem:[#allocation8 + $0x268] ss:$16 sps:$4 sm:$0xff]  }
 0x2bc   :  { %4822 = vmatpush1.bf16.msra.mxu1 %v6766_v63  ;;  %4853 = vmatprep.mubr.bf16.mxu1 %v7650_v57  ;;  %v6798_v57 = vld [vmem:[#allocation8 + $0x2ac] ss:$16 sps:$4 sm:$0xff]  }
 0x2bd   :  { %4717 = vmatpush1.bf16.msra.mxu0 %v6769_v0  ;;  %4823 = vmatprep.subr.bf16.mxu1 %v6774_v9  ;;  %v6822_v63 = vld [vmem:[#allocation8 + $0x36c] ss:$16 sps:$4 sm:$0xff]   ;;  %v6877_v0 = vld [vmem:[#allocation8 + $0x660] ss:$16 sps:$4 sm:$0xff]   ;;  %v6885_v9 = vld [vmem:[#allocation8 + $0x684] ss:$16 sps:$4 sm:$0xff]  }
 0x2be   :  { %4718 = vmatprep.subr.bf16.mxu0 %v6777_v1  ;;  %v6820_v1 = vld [vmem:[#allocation8 + $0x368] ss:$16 sps:$4 sm:$0xff]  }
 0x2c0   :  { %4824 = vmatpush1.bf16.msra.mxu1 %v6772_v2  ;;  %v6825_v2 = vld [vmem:[#allocation8 + $0x38c] ss:$16 sps:$4 sm:$0xff]  }
 0x2c1   :  { %4719 = vmatpush1.bf16.msra.mxu0 %v6775_v41  ;;  %4825 = vmatprep.subr.bf16.mxu1 %v6780_v3  ;;  %v6883_v41 = vld [vmem:[#allocation8 + $0x680] ss:$16 sps:$4 sm:$0xff]   ;;  %v6891_v3 = vld [vmem:[#allocation8 + $0x6a4] ss:$16 sps:$4 sm:$0xff]  }
 0x2c2   :  { %4720 = vmatprep.subr.bf16.mxu0 %v6783_v4  ;;  %v6823_v4 = vld [vmem:[#allocation8 + $0x388] ss:$16 sps:$4 sm:$0xff]  }
 0x2c4   :  { %4826 = vmatpush1.bf16.msra.mxu1 %v6778_v5  ;;  %v6828_v5 = vld [vmem:[#allocation8 + $0x3ac] ss:$16 sps:$4 sm:$0xff]  }
 0x2c5   :  { %4721 = vmatpush1.bf16.msra.mxu0 %v6781_v44  ;;  %4827 = vmatprep.subr.bf16.mxu1 %v6786_v6  ;;  %v6889_v44 = vld [vmem:[#allocation8 + $0x6a0] ss:$16 sps:$4 sm:$0xff]   ;;  %v6897_v6 = vld [vmem:[#allocation8 + $0x6c4] ss:$16 sps:$4 sm:$0xff]  }
 0x2c6   :  { %4722 = vmatprep.subr.bf16.mxu0 %v6789_v7  ;;  %v6826_v7 = vld [vmem:[#allocation8 + $0x3a8] ss:$16 sps:$4 sm:$0xff]  }
 0x2c8   :  { %4828 = vmatpush1.bf16.msra.mxu1 %v6784_v12  ;;  %v6831_v12 = vld [vmem:[#allocation8 + $0x3cc] ss:$16 sps:$4 sm:$0xff]  }
 0x2c9   :  { %4723 = vmatpush1.bf16.msra.mxu0 %v6787_v8  ;;  %4829 = vmatprep.subr.bf16.mxu1 %v6792_v10  ;;  %v6895_v8 = vld [vmem:[#allocation8 + $0x6c0] ss:$16 sps:$4 sm:$0xff]   ;;  %v6903_v10 = vld [vmem:[#allocation8 + $0x6e4] ss:$16 sps:$4 sm:$0xff]  }
 0x2ca   :  { %4724 = vmatprep.subr.bf16.mxu0 %v6795_v11  ;;  %v6829_v11 = vld [vmem:[#allocation8 + $0x3c8] ss:$16 sps:$4 sm:$0xff]  }
 0x2cc   :  { %4830 = vmatpush1.bf16.msra.mxu1 %v6790_v13  ;;  %v6834_v13 = vld [vmem:[#allocation8 + $0x3ec] ss:$16 sps:$4 sm:$0xff]  }
 0x2cd   :  { %4725 = vmatpush1.bf16.msra.mxu0 %v6793_v15  ;;  %4831 = vmatprep.subr.bf16.mxu1 %v6798_v57  ;;  %v6909_v15 = vld [vmem:[#allocation8 + $0x704] ss:$16 sps:$4 sm:$0xff]   ;;  %v6837_v57 = vld [vmem:[#allocation8 + $0x40c] ss:$16 sps:$4 sm:$0xff]  }
 0x2ce   :  { %4726 = vmatprep.subr.bf16.mxu0 %v6801_v20  ;;  %v6907_v20 = vld [vmem:[#allocation8 + $0x700] ss:$16 sps:$4 sm:$0xff]  }
 0x2d0   :  { %v2896_v53 = vpop.f32.mrb[4].mxu0  ;;  %4832 = vmatpush1.bf16.msra.mxu1 %v6796_v24  ;;  %v6835_v24 = vld [vmem:[#allocation8 + $0x408] ss:$16 sps:$4 sm:$0xff]  }
 0x2d1   :  { %v6502_v27 = vadd.f32 %v2896_v53, %v572_v22  ;;  %v2898_v54 = vpop.f32.mrb[5].mxu0  ;;  %4727 = vmatpush1.bf16.msra.mxu0 %v6799_v25  ;;  %4833 = vmatprep.subr.bf16.mxu1 %v6804_v21  ;;  %v6915_v22 = vld [vmem:[#allocation8 + $0x724] ss:$16 sps:$4 sm:$0xff]   ;;  %v6913_v25 = vld [vmem:[#allocation8 + $0x720] ss:$16 sps:$4 sm:$0xff]  }
 0x2d2   :  { %v6503_v30 = vadd.f32 %v2898_v54, %v576_v16  ;;  %v2900_v31 = vpop.f32.mrb[6].mxu0  ;;  %4728 = vmatprep.subr.bf16.mxu0 %v6807_v26  ;;  %v6840_v16 = vld [vmem:[#allocation8 + $0x42c] ss:$16 sps:$4 sm:$0xff]   ;;  %v6921_v21 = vld [vmem:[#allocation8 + $0x744] ss:$16 sps:$4 sm:$0xff]  }
 0x2d3   :  { %vm3030_vm4 = vcmp.ge.f32.partialorder %v6502_v27, 0.0  ;;  %v3038_v34 = vmul.f32 0.01, %v6502_v27  ;;  %v2901_v37 = vpop.f32.mrb[7].mxu0  ;;  %v6838_v26 = vld [vmem:[#allocation8 + $0x428] ss:$16 sps:$4 sm:$0xff]  }
 0x2d4   :  { %vm3031_vm5 = vcmp.ge.f32.partialorder %v6503_v30, 0.0  ;;  %v3039_v38 = vmul.f32 0.01, %v6503_v30  ;;  %4834 = vmatpush1.bf16.msra.mxu1 %v6802_v29  ;;  %v6843_v53 = vld [vmem:[#allocation8 + $0x44c] ss:$16 sps:$4 sm:$0xff]  }
 0x2d5   :  { %v3046_v39 = vsel %vm3030_vm4, %v6502_v27, %v3038_v34  ;;  %4729 = vmatpush1.bf16.msra.mxu0 %v6805_v33  ;;  %4835 = vmatprep.subr.bf16.mxu1 %v6810_v28  ;;  %v6919_v27 = vld [vmem:[#allocation8 + $0x740] ss:$16 sps:$4 sm:$0xff]   ;;  %v6927_v54 = vld [vmem:[#allocation8 + $0x764] ss:$16 sps:$4 sm:$0xff]   ;;  %v6841_v29 = vld [vmem:[#allocation8 + $0x448] ss:$16 sps:$4 sm:$0xff]  }
 0x2d6   :  { %v3047_v19 = vsel %vm3031_vm5, %v6503_v30, %v3039_v38  ;;  %4739 = vmatprep.subr.bf16.mxu0 %v6861_v35  ;;  %v7664_v46 = vpack.c.bf16 %v3046_v39, %v3046_v39  ;;  %v6846_v30 = vld [vmem:[#allocation8 + $0x46c] ss:$16 sps:$4 sm:$0xff]   ;;  %v6925_v31 = vld [vmem:[#allocation8 + $0x760] ss:$16 sps:$4 sm:$0xff]   ;;  %v6844_v33 = vld [vmem:[#allocation8 + $0x468] ss:$16 sps:$4 sm:$0xff]  }
 0x2d7   :  { %v7662_v43 = vpack.c.bf16 %v3047_v19, %v3047_v19  ;;  %v6849_v28 = vld [vmem:[#allocation8 + $0x48c] ss:$16 sps:$4 sm:$0xff]   ;;  %v6931_v34 = vld [vmem:[#allocation8 + $0x780] ss:$16 sps:$4 sm:$0xff]   ;;  %v6939_v37 = vld [vmem:[#allocation8 + $0x7a4] ss:$16 sps:$4 sm:$0xff]  }
 0x2d8   :  { %4836 = vmatpush1.bf16.msra.mxu1 %v6808_v40  ;;  %v6847_v35 = vld [vmem:[#allocation8 + $0x488] ss:$16 sps:$4 sm:$0xff]   ;;  %v6852_v38 = vld [vmem:[#allocation8 + $0x4ac] ss:$16 sps:$4 sm:$0xff]   ;;  %v6937_v39 = vld [vmem:[#allocation8 + $0x7a0] ss:$16 sps:$4 sm:$0xff]  }
 0x2d9   :  { %4730 = vmatprep.mubr.bf16.mxu0 %v7662_v43  ;;  %4837 = vmatprep.subr.bf16.mxu1 %v6813_v42  ;;  %v6945_v40 = vld [vmem:[#allocation8 + $0x7c4] ss:$16 sps:$4 sm:$0xff]   ;;  %v6850_v19 = vld [vmem:[#allocation8 + $0x4a8] ss:$16 sps:$4 sm:$0xff]   ;;  %v6855_v42 = vld [vmem:[#allocation8 + $0x4cc] ss:$16 sps:$4 sm:$0xff]  }
 0x2da   :  { %4731 = vmatmul.mubr.bf16.vlgmr.msra.gmra.mrb[8].mxu0 %v7664_v46 }
 0x2db   :  { %4740 = vmatpush1.bf16.msra.mxu0 %v6859_v45  ;;  %v6951_v45 = vld [vmem:[#allocation8 + $0x7e4] ss:$16 sps:$4 sm:$0xff]  }
 0x2dc   :  { %4741 = vmatprep.subr.bf16.mxu0 %v6867_v47  ;;  %4838 = vmatpush1.bf16.msra.mxu1 %v6811_v48  ;;  %v6853_v47 = vld [vmem:[#allocation8 + $0x4c8] ss:$16 sps:$4 sm:$0xff]   ;;  %v6858_v48 = vld [vmem:[#allocation8 + $0x4ec] ss:$16 sps:$4 sm:$0xff]  }
 0x2dd   :  { %4839 = vmatprep.subr.bf16.mxu1 %v6816_v49  ;;  %v6949_v49 = vld [vmem:[#allocation8 + $0x7e0] ss:$16 sps:$4 sm:$0xff]  }
 0x2df   :  { %4742 = vmatpush1.bf16.msra.mxu0 %v6865_v50  ;;  %v6981_v50 = vld [vmem:[#allocation11 + $0x4] ss:$8 sps:$4 sm:$0xff]  }
 0x2e0   :  { %4743 = vmatprep.subr.bf16.mxu0 %v6873_v51  ;;  %4840 = vmatpush1.bf16.msra.mxu1 %v6814_v52  ;;  %v6856_v51 = vld [vmem:[#allocation8 + $0x4e8] ss:$16 sps:$4 sm:$0xff]   ;;  %v6864_v52 = vld [vmem:[#allocation8 + $0x50c] ss:$16 sps:$4 sm:$0xff]  }
 0x2e1   :  { %4841 = vmatprep.subr.bf16.mxu1 %v6819_v55  ;;  %v6862_v55 = vld [vmem:[#allocation8 + $0x508] ss:$16 sps:$4 sm:$0xff]  }
 0x2e3   :  { %4744 = vmatpush1.bf16.msra.mxu0 %v6871_v56  ;;  %v6870_v56 = vld [vmem:[#allocation8 + $0x52c] ss:$16 sps:$4 sm:$0xff]  }
 0x2e4   :  { %4745 = vmatprep.subr.bf16.mxu0 %v6879_v59  ;;  %4842 = vmatpush1.bf16.msra.mxu1 %v6817_v60  ;;  %v6868_v59 = vld [vmem:[#allocation8 + $0x528] ss:$16 sps:$4 sm:$0xff]   ;;  %v6876_v60 = vld [vmem:[#allocation8 + $0x54c] ss:$16 sps:$4 sm:$0xff]  }
 0x2e5   :  { %4843 = vmatprep.subr.bf16.mxu1 %v6822_v63  ;;  %v6874_v63 = vld [vmem:[#allocation8 + $0x548] ss:$16 sps:$4 sm:$0xff]  }
 0x2e7   :  { %4746 = vmatpush1.bf16.msra.mxu0 %v6877_v0  ;;  %v6882_v0 = vld [vmem:[#allocation8 + $0x56c] ss:$16 sps:$4 sm:$0xff]  }
 0x2e8   :  { %4747 = vmatprep.subr.bf16.mxu0 %v6885_v9  ;;  %4844 = vmatpush1.bf16.msra.mxu1 %v6820_v1  ;;  %v6880_v9 = vld [vmem:[#allocation8 + $0x568] ss:$16 sps:$4 sm:$0xff]   ;;  %v6888_v1 = vld [vmem:[#allocation8 + $0x58c] ss:$16 sps:$4 sm:$0xff]  }
 0x2e9   :  { %4845 = vmatprep.subr.bf16.mxu1 %v6825_v2  ;;  %v6886_v2 = vld [vmem:[#allocation8 + $0x588] ss:$16 sps:$4 sm:$0xff]  }
 0x2eb   :  { %4748 = vmatpush1.bf16.msra.mxu0 %v6883_v41  ;;  %v6894_v41 = vld [vmem:[#allocation8 + $0x5ac] ss:$16 sps:$4 sm:$0xff]  }
 0x2ec   :  { %4749 = vmatprep.subr.bf16.mxu0 %v6891_v3  ;;  %4846 = vmatpush1.bf16.msra.mxu1 %v6823_v4  ;;  %v6892_v3 = vld [vmem:[#allocation8 + $0x5a8] ss:$16 sps:$4 sm:$0xff]   ;;  %v6900_v4 = vld [vmem:[#allocation8 + $0x5cc] ss:$16 sps:$4 sm:$0xff]  }
 0x2ed   :  { %4847 = vmatprep.subr.bf16.mxu1 %v6828_v5  ;;  %v6898_v5 = vld [vmem:[#allocation8 + $0x5c8] ss:$16 sps:$4 sm:$0xff]  }
 0x2ef   :  { %4750 = vmatpush1.bf16.msra.mxu0 %v6889_v44  ;;  %v6906_v44 = vld [vmem:[#allocation8 + $0x5ec] ss:$16 sps:$4 sm:$0xff]  }
 0x2f0   :  { %4751 = vmatprep.subr.bf16.mxu0 %v6897_v6  ;;  %4848 = vmatpush1.bf16.msra.mxu1 %v6826_v7  ;;  %v6904_v6 = vld [vmem:[#allocation8 + $0x5e8] ss:$16 sps:$4 sm:$0xff]   ;;  %v6912_v7 = vld [vmem:[#allocation8 + $0x60c] ss:$16 sps:$4 sm:$0xff]  }
 0x2f1   :  { %4849 = vmatprep.subr.bf16.mxu1 %v6831_v12  ;;  %v6910_v12 = vld [vmem:[#allocation8 + $0x608] ss:$16 sps:$4 sm:$0xff]  }
 0x2f3   :  { %4752 = vmatpush1.bf16.msra.mxu0 %v6895_v8  ;;  %v6918_v8 = vld [vmem:[#allocation8 + $0x62c] ss:$16 sps:$4 sm:$0xff]  }
 0x2f4   :  { %4753 = vmatprep.subr.bf16.mxu0 %v6903_v10  ;;  %4850 = vmatpush1.bf16.msra.mxu1 %v6829_v11  ;;  %v6916_v10 = vld [vmem:[#allocation8 + $0x628] ss:$16 sps:$4 sm:$0xff]   ;;  %v6924_v11 = vld [vmem:[#allocation8 + $0x64c] ss:$16 sps:$4 sm:$0xff]  }
 0x2f5   :  { %4851 = vmatprep.subr.bf16.mxu1 %v6834_v13  ;;  %v6922_v13 = vld [vmem:[#allocation8 + $0x648] ss:$16 sps:$4 sm:$0xff]  }
 0x2f7   :  { %4754 = vmatpush1.bf16.msra.mxu0 %v6901_v14  ;;  %v6930_v14 = vld [vmem:[#allocation8 + $0x66c] ss:$16 sps:$4 sm:$0xff]  }
 0x2f8   :  { %4755 = vmatprep.subr.bf16.mxu0 %v6909_v15  ;;  %4852 = vmatpush1.bf16.msra.mxu1 %v6832_v17  ;;  %v6928_v15 = vld [vmem:[#allocation8 + $0x668] ss:$16 sps:$4 sm:$0xff]   ;;  %v6936_v17 = vld [vmem:[#allocation8 + $0x68c] ss:$16 sps:$4 sm:$0xff]  }
 0x2f9   :  { %4862 = vmatprep.subr.bf16.mxu1 %v6837_v57  ;;  %v579_v57 = vsub.s32 6, %v7611_v58 }
 0x2fb   :  { %4756 = vmatpush1.bf16.msra.mxu0 %v6907_v20  ;;  %4854 = vmatmul.mubr.bf16.vlgmr.msra.gmra.mrb[12].mxu1 %v7652_v23  ;;  %v6933_v23 = vld [vmem:[#allocation8 + $0x784] ss:$16 sps:$4 sm:$0xff]   ;;  %v6934_v20 = vld [vmem:[#allocation8 + $0x688] ss:$16 sps:$4 sm:$0xff]  }
 0x2fc   :  { %4757 = vmatprep.subr.bf16.mxu0 %v6915_v22  ;;  %4863 = vmatpush1.bf16.msra.mxu1 %v6835_v24  ;;  %v583_v22 = vsub.s32 7, %v7611_v58  ;;  %v7097_v24 = vld [vmem:[#allocation7] sm:$0xff]  ;;  %v7075_v58 = vld [vmem:[%s7759_s7 + $0x40] sm:$0xff]  }
 0x2fd   :  { %4894 = vmatprep.mubr.bf16.mxu1 %v7662_v43  ;;  %4864 = vmatprep.subr.bf16.mxu1 %v6840_v16  ;;  %v6943_v43 = vld [vmem:[#allocation8 + $0x7c0] ss:$16 sps:$4 sm:$0xff]   ;;  %v580_v16 = vrot.slane %v7097_v24, %v579_v57  ;;  %v7006_v57 = vld [vmem:[#allocation11 + $0x90] ss:$8 sps:$4 sm:$0xff]  }
 0x2ff   :  { %4758 = vmatpush1.bf16.msra.mxu0 %v6913_v25  ;;  %v584_v25 = vrot.slane %v7097_v24, %v583_v22  ;;  %v7009_v22 = vld [vmem:[#allocation11 + $0xa0] ss:$8 sps:$4 sm:$0xff]   ;;  %v7012_v24 = vld [vmem:[#allocation11 + $0xb0] ss:$8 sps:$4 sm:$0xff]  }
 0x300   :  { %4759 = vmatprep.subr.bf16.mxu0 %v6921_v21  ;;  %4865 = vmatpush1.bf16.msra.mxu1 %v6838_v26  ;;  %v6940_v21 = vld [vmem:[#allocation8 + $0x6a8] ss:$16 sps:$4 sm:$0xff]   ;;  %v6948_v26 = vld [vmem:[#allocation8 + $0x6cc] ss:$16 sps:$4 sm:$0xff]  }
 0x301   :  { %4866 = vmatprep.subr.bf16.mxu1 %v6843_v53 }
 0x303   :  { %4760 = vmatpush1.bf16.msra.mxu0 %v6919_v27 }
 0x304   :  { %4761 = vmatprep.subr.bf16.mxu0 %v6927_v54  ;;  %4867 = vmatpush1.bf16.msra.mxu1 %v6841_v29 }
 0x305   :  { %4868 = vmatprep.subr.bf16.mxu1 %v6846_v30 }
 0x307   :  { %4762 = vmatpush1.bf16.msra.mxu0 %v6925_v31  ;;  %v6946_v31 = vld [vmem:[#allocation8 + $0x6c8] ss:$16 sps:$4 sm:$0xff]  }
 0x308   :  { %4763 = vmatprep.subr.bf16.mxu0 %v6933_v23  ;;  %4869 = vmatpush1.bf16.msra.mxu1 %v6844_v33 }
 0x309   :  { %4870 = vmatprep.subr.bf16.mxu1 %v6849_v28  ;;  %v6954_v28 = vld [vmem:[#allocation8 + $0x6ec] ss:$16 sps:$4 sm:$0xff]  }
 0x30b   :  { %4764 = vmatpush1.bf16.msra.mxu0 %v6931_v34 }
 0x30c   :  { %4765 = vmatprep.subr.bf16.mxu0 %v6939_v37  ;;  %4871 = vmatpush1.bf16.msra.mxu1 %v6847_v35 }
 0x30d   :  { %4872 = vmatprep.subr.bf16.mxu1 %v6852_v38  ;;  %v6952_v38 = vld [vmem:[#allocation8 + $0x6e8] ss:$16 sps:$4 sm:$0xff]  }
 0x30f   :  { %4766 = vmatpush1.bf16.msra.mxu0 %v6937_v39 }
 0x310   :  { %4767 = vmatprep.subr.bf16.mxu0 %v6945_v40  ;;  %4873 = vmatpush1.bf16.msra.mxu1 %v6850_v19  ;;  %v6957_v40 = vld [vmem:[#allocation8 + $0x70c] ss:$16 sps:$4 sm:$0xff]  }
 0x311   :  { %4874 = vmatprep.subr.bf16.mxu1 %v6855_v42  ;;  %v6979_v19 = vld [vmem:[#allocation11] ss:$8 sps:$4 sm:$0xff]  }
 0x313   :  { %4768 = vmatpush1.bf16.msra.mxu0 %v6943_v43  ;;  %v6984_v43 = vld [vmem:[#allocation11 + $0x14] ss:$8 sps:$4 sm:$0xff]  }
 0x314   :  { %4769 = vmatprep.subr.bf16.mxu0 %v6951_v45  ;;  %4875 = vmatpush1.bf16.msra.mxu1 %v6853_v47  ;;  %v6955_v45 = vld [vmem:[#allocation8 + $0x708] ss:$16 sps:$4 sm:$0xff]   ;;  %v6960_v47 = vld [vmem:[#allocation8 + $0x72c] ss:$16 sps:$4 sm:$0xff]  }
 0x315   :  { %4876 = vmatprep.subr.bf16.mxu1 %v6858_v48  ;;  %v6982_v48 = vld [vmem:[#allocation11 + $0x10] ss:$8 sps:$4 sm:$0xff]  }
 0x317   :  { %4770 = vmatpush1.bf16.msra.mxu0 %v6949_v49  ;;  %v6987_v49 = vld [vmem:[#allocation11 + $0x24] ss:$8 sps:$4 sm:$0xff]  }
 0x318   :  { %5356 = vmatprep.subr.bf16.mxu0 %v6981_v50  ;;  %4877 = vmatpush1.bf16.msra.mxu1 %v6856_v51  ;;  %v6958_v50 = vld [vmem:[#allocation8 + $0x728] ss:$16 sps:$4 sm:$0xff]   ;;  %v6963_v51 = vld [vmem:[#allocation8 + $0x74c] ss:$16 sps:$4 sm:$0xff]  }
 0x319   :  { %4878 = vmatprep.subr.bf16.mxu1 %v6864_v52  ;;  %v6985_v52 = vld [vmem:[#allocation11 + $0x20] ss:$8 sps:$4 sm:$0xff]  }
 0x31c   :  { %4879 = vmatpush1.bf16.msra.mxu1 %v6862_v55  ;;  %v6990_v55 = vld [vmem:[#allocation11 + $0x34] ss:$8 sps:$4 sm:$0xff]  }
 0x31d   :  { %4880 = vmatprep.subr.bf16.mxu1 %v6870_v56  ;;  %v6961_v56 = vld [vmem:[#allocation8 + $0x748] ss:$16 sps:$4 sm:$0xff]  }
 0x320   :  { %4881 = vmatpush1.bf16.msra.mxu1 %v6868_v59  ;;  %v6966_v59 = vld [vmem:[#allocation8 + $0x76c] ss:$16 sps:$4 sm:$0xff]  }
 0x321   :  { %4882 = vmatprep.subr.bf16.mxu1 %v6876_v60  ;;  %v6988_v60 = vld [vmem:[#allocation11 + $0x30] ss:$8 sps:$4 sm:$0xff]  }
 0x324   :  { %4883 = vmatpush1.bf16.msra.mxu1 %v6874_v63  ;;  %v6993_v63 = vld [vmem:[#allocation11 + $0x44] ss:$8 sps:$4 sm:$0xff]  }
 0x325   :  { %4884 = vmatprep.subr.bf16.mxu1 %v6882_v0  ;;  %v6964_v0 = vld [vmem:[#allocation8 + $0x768] ss:$16 sps:$4 sm:$0xff]  }
 0x328   :  { %4885 = vmatpush1.bf16.msra.mxu1 %v6880_v9  ;;  %v6969_v9 = vld [vmem:[#allocation8 + $0x78c] ss:$16 sps:$4 sm:$0xff]  }
 0x329   :  { %4886 = vmatprep.subr.bf16.mxu1 %v6888_v1  ;;  %v6991_v1 = vld [vmem:[#allocation11 + $0x40] ss:$8 sps:$4 sm:$0xff]  }
 0x32c   :  { %4887 = vmatpush1.bf16.msra.mxu1 %v6886_v2  ;;  %v6996_v2 = vld [vmem:[#allocation11 + $0x54] ss:$8 sps:$4 sm:$0xff]  }
 0x32d   :  { %4888 = vmatprep.subr.bf16.mxu1 %v6894_v41  ;;  %v6967_v41 = vld [vmem:[#allocation8 + $0x788] ss:$16 sps:$4 sm:$0xff]  }
 0x330   :  { %4889 = vmatpush1.bf16.msra.mxu1 %v6892_v3  ;;  %v6972_v3 = vld [vmem:[#allocation8 + $0x7ac] ss:$16 sps:$4 sm:$0xff]  }
 0x331   :  { %4890 = vmatprep.subr.bf16.mxu1 %v6900_v4  ;;  %v6994_v4 = vld [vmem:[#allocation11 + $0x50] ss:$8 sps:$4 sm:$0xff]  }
 0x334   :  { %4891 = vmatpush1.bf16.msra.mxu1 %v6898_v5  ;;  %v6999_v5 = vld [vmem:[#allocation11 + $0x64] ss:$8 sps:$4 sm:$0xff]  }
 0x335   :  { %4892 = vmatprep.subr.bf16.mxu1 %v6906_v44  ;;  %v6970_v44 = vld [vmem:[#allocation8 + $0x7a8] ss:$16 sps:$4 sm:$0xff]  }
 0x338   :  { %4893 = vmatpush1.bf16.msra.mxu1 %v6904_v6  ;;  %v6975_v6 = vld [vmem:[#allocation8 + $0x7cc] ss:$16 sps:$4 sm:$0xff]  }
 0x339   :  { %4903 = vmatprep.subr.bf16.mxu1 %v6912_v7  ;;  %v6997_v7 = vld [vmem:[#allocation11 + $0x60] ss:$8 sps:$4 sm:$0xff]  }
 0x33b   :  { %4895 = vmatmul.mubr.bf16.vlgmr.msra.gmra.mrb[12].mxu1 %v7664_v46  ;;  %v6942_v46 = vld [vmem:[#allocation8 + $0x6ac] ss:$16 sps:$4 sm:$0xff]  }
 0x33c   :  { %4904 = vmatpush1.bf16.msra.mxu1 %v6910_v12  ;;  %v7002_v12 = vld [vmem:[#allocation11 + $0x74] ss:$8 sps:$4 sm:$0xff]  }
 0x33d   :  { %4905 = vmatprep.subr.bf16.mxu1 %v6918_v8  ;;  %v6973_v8 = vld [vmem:[#allocation8 + $0x7c8] ss:$16 sps:$4 sm:$0xff]  }
 0x340   :  { %4906 = vmatpush1.bf16.msra.mxu1 %v6916_v10  ;;  %v6978_v10 = vld [vmem:[#allocation8 + $0x7ec] ss:$16 sps:$4 sm:$0xff]  }
 0x341   :  { %4907 = vmatprep.subr.bf16.mxu1 %v6924_v11  ;;  %v7000_v11 = vld [vmem:[#allocation11 + $0x70] ss:$8 sps:$4 sm:$0xff]  }
 0x344   :  { %4908 = vmatpush1.bf16.msra.mxu1 %v6922_v13  ;;  %v7005_v13 = vld [vmem:[#allocation11 + $0x84] ss:$8 sps:$4 sm:$0xff]  }
 0x345   :  { %4909 = vmatprep.subr.bf16.mxu1 %v6930_v14  ;;  %v6976_v14 = vld [vmem:[#allocation8 + $0x7e8] ss:$16 sps:$4 sm:$0xff]  }
 0x348   :  { %4910 = vmatpush1.bf16.msra.mxu1 %v6928_v15  ;;  %v7003_v15 = vld [vmem:[#allocation11 + $0x80] ss:$8 sps:$4 sm:$0xff]  }
 0x349   :  { %4911 = vmatprep.subr.bf16.mxu1 %v6936_v17  ;;  %v7008_v17 = vld [vmem:[#allocation11 + $0x94] ss:$8 sps:$4 sm:$0xff]  }
 0x34c   :  { %4912 = vmatpush1.bf16.msra.mxu1 %v6934_v20  ;;  %v7011_v20 = vld [vmem:[#allocation11 + $0xa4] ss:$8 sps:$4 sm:$0xff]  }
 0x34d   :  { %4913 = vmatprep.subr.bf16.mxu1 %v6942_v46  ;;  %v7014_v46 = vld [vmem:[#allocation11 + $0xb4] ss:$8 sps:$4 sm:$0xff]  }
 0x34e   :  { %v3019_v53 = vpop.f32.mrb[8].mxu1 }
 0x34f   :  { %v6504_v27 = vadd.f32 %v3019_v53, %v580_v16  ;;  %v3021_v54 = vpop.f32.mrb[9].mxu1  ;;  %v7017_v16 = vld [vmem:[#allocation11 + $0xc4] ss:$8 sps:$4 sm:$0xff]  }
 0x350   :  { %v6505_v29 = vadd.f32 %v3021_v54, %v584_v25  ;;  %v3023_v30 = vpop.f32.mrb[10].mxu1  ;;  %4914 = vmatpush1.bf16.msra.mxu1 %v6940_v21  ;;  %v7015_v25 = vld [vmem:[#allocation11 + $0xc0] ss:$8 sps:$4 sm:$0xff]   ;;  %v7020_v21 = vld [vmem:[#allocation11 + $0xd4] ss:$8 sps:$4 sm:$0xff]  }
 0x351   :  { %vm3032_vm6 = vcmp.ge.f32.partialorder %v6504_v27, 0.0  ;;  %v3040_v23 = vmul.f32 0.01, %v6504_v27  ;;  %v3024_v33 = vpop.f32.mrb[11].mxu1  ;;  %4915 = vmatprep.subr.bf16.mxu1 %v6948_v26  ;;  %v7018_v26 = vld [vmem:[#allocation11 + $0xd0] ss:$8 sps:$4 sm:$0xff]  }
 0x352   :  { %vm3033_vm7 = vcmp.ge.f32.partialorder %v6505_v29, 0.0  ;;  %v3041_v34 = vmul.f32 0.01, %v6505_v29  ;;  %v7023_v53 = vld [vmem:[#allocation11 + $0xe4] ss:$8 sps:$4 sm:$0xff]  }
 0x353   :  { %v3048_v37 = vsel %vm3032_vm6, %v6504_v27, %v3040_v23  ;;  %v7021_v27 = vld [vmem:[#allocation11 + $0xe0] ss:$8 sps:$4 sm:$0xff]   ;;  %v7026_v54 = vld [vmem:[#allocation11 + $0xf4] ss:$8 sps:$4 sm:$0xff]   ;;  %v7029_v30 = vld [vmem:[#allocation11 + $0x104] ss:$8 sps:$4 sm:$0xff]  }
 0x354   :  { %4916 = vmatpush1.bf16.msra.mxu1 %v6946_v31  ;;  %v3049_v35 = vsel %vm3033_vm7, %v6505_v29, %v3041_v34  ;;  %v7673_v42 = vpack.c.bf16 %v3048_v37, %v3048_v37  ;;  %v7024_v29 = vld [vmem:[#allocation11 + $0xf0] ss:$8 sps:$4 sm:$0xff]   ;;  %v7677_v31 = vld [vmem:[#allocation10] sm:$0xf] }
 0x355   :  { %v3057_v39 = vpack.c.bf16 %v3049_v35, %v3049_v35  ;;  %4917 = vmatprep.subr.bf16.mxu1 %v6954_v28  ;;  %v3319_v23 = vrot.slane %v7677_v31, %v7614_v61  ;;  %v3323_v33 = vrot.slane %v7677_v31, %v7619_v36 }
 0x357   :  { %4771 = vmatprep.mubr.bf16.mxu0 %v3057_v39  ;;  %4935 = vmatprep.mubr.bf16.mxu1 %v3057_v39 }
 0x358   :  { %4772 = vmatmul.mubr.bf16.vlgmr.msra.gmra.mrb[8].mxu0 %v7673_v42  ;;  %4918 = vmatpush1.bf16.msra.mxu1 %v6952_v38 }
 0x359   :  { %4919 = vmatprep.subr.bf16.mxu1 %v6957_v40  ;;  %5357 = vmatpush1.bf16.msra.mxu0 %v6979_v19 }
 0x35a   :  { %5358 = vmatprep.subr.bf16.mxu0 %v6984_v43 }
 0x35c   :  { %4920 = vmatpush1.bf16.msra.mxu1 %v6955_v45 }
 0x35d   :  { %4921 = vmatprep.subr.bf16.mxu1 %v6960_v47  ;;  %5359 = vmatpush1.bf16.msra.mxu0 %v6982_v48  ;;  %v7027_v47 = vld [vmem:[#allocation11 + $0x100] ss:$8 sps:$4 sm:$0xff]  }
 0x35e   :  { %5360 = vmatprep.subr.bf16.mxu0 %v6987_v49  ;;  %v7032_v49 = vld [vmem:[#allocation11 + $0x114] ss:$8 sps:$4 sm:$0xff]  }
 0x360   :  { %4922 = vmatpush1.bf16.msra.mxu1 %v6958_v50  ;;  %v7030_v50 = vld [vmem:[#allocation11 + $0x110] ss:$8 sps:$4 sm:$0xff]  }
 0x361   :  { %4923 = vmatprep.subr.bf16.mxu1 %v6963_v51  ;;  %5361 = vmatpush1.bf16.msra.mxu0 %v6985_v52  ;;  %v7035_v51 = vld [vmem:[#allocation11 + $0x124] ss:$8 sps:$4 sm:$0xff]   ;;  %v7033_v52 = vld [vmem:[#allocation11 + $0x120] ss:$8 sps:$4 sm:$0xff]  }
 0x362   :  { %5362 = vmatprep.subr.bf16.mxu0 %v6990_v55  ;;  %v7038_v55 = vld [vmem:[#allocation11 + $0x134] ss:$8 sps:$4 sm:$0xff]  }
 0x364   :  { %4924 = vmatpush1.bf16.msra.mxu1 %v6961_v56  ;;  %v7036_v56 = vld [vmem:[#allocation11 + $0x130] ss:$8 sps:$4 sm:$0xff]  }
 0x365   :  { %4925 = vmatprep.subr.bf16.mxu1 %v6966_v59  ;;  %5363 = vmatpush1.bf16.msra.mxu0 %v6988_v60  ;;  %v7041_v59 = vld [vmem:[#allocation11 + $0x144] ss:$8 sps:$4 sm:$0xff]   ;;  %v7039_v60 = vld [vmem:[#allocation11 + $0x140] ss:$8 sps:$4 sm:$0xff]  }
 0x366   :  { %5364 = vmatprep.subr.bf16.mxu0 %v6993_v63  ;;  %v7044_v63 = vld [vmem:[#allocation11 + $0x154] ss:$8 sps:$4 sm:$0xff]  }
 0x368   :  { %4926 = vmatpush1.bf16.msra.mxu1 %v6964_v0  ;;  %v7042_v0 = vld [vmem:[#allocation11 + $0x150] ss:$8 sps:$4 sm:$0xff]  }
 0x369   :  { %4927 = vmatprep.subr.bf16.mxu1 %v6969_v9  ;;  %5365 = vmatpush1.bf16.msra.mxu0 %v6991_v1  ;;  %v7047_v9 = vld [vmem:[#allocation11 + $0x164] ss:$8 sps:$4 sm:$0xff]   ;;  %v7045_v1 = vld [vmem:[#allocation11 + $0x160] ss:$8 sps:$4 sm:$0xff]  }
 0x36a   :  { %5366 = vmatprep.subr.bf16.mxu0 %v6996_v2  ;;  %v7050_v2 = vld [vmem:[#allocation11 + $0x174] ss:$8 sps:$4 sm:$0xff]  }
 0x36c   :  { %4928 = vmatpush1.bf16.msra.mxu1 %v6967_v41  ;;  %v3331_v41 = vrot.slane %v7677_v31, %v567_v32  ;;  %v7059_v32 = vld [vmem:[#allocation11 + $0x1a4] ss:$8 sps:$4 sm:$0xff]  }
 0x36d   :  { %4929 = vmatprep.subr.bf16.mxu1 %v6972_v3  ;;  %5367 = vmatpush1.bf16.msra.mxu0 %v6994_v4  ;;  %v7048_v4 = vld [vmem:[#allocation11 + $0x170] ss:$8 sps:$4 sm:$0xff]  }
 0x36e   :  { %5368 = vmatprep.subr.bf16.mxu0 %v6999_v5 }
 0x370   :  { %4930 = vmatpush1.bf16.msra.mxu1 %v6970_v44  ;;  %v7053_v44 = vld [vmem:[#allocation11 + $0x184] ss:$8 sps:$4 sm:$0xff]  }
 0x371   :  { %4931 = vmatprep.subr.bf16.mxu1 %v6975_v6  ;;  %5369 = vmatpush1.bf16.msra.mxu0 %v6997_v7 }
 0x372   :  { %5370 = vmatprep.subr.bf16.mxu0 %v7002_v12 }
 0x374   :  { %4932 = vmatpush1.bf16.msra.mxu1 %v6973_v8 }
 0x375   :  { %4933 = vmatprep.subr.bf16.mxu1 %v6978_v10  ;;  %5371 = vmatpush1.bf16.msra.mxu0 %v7000_v11  ;;  %v7051_v10 = vld [vmem:[#allocation11 + $0x180] ss:$8 sps:$4 sm:$0xff]   ;;  %v7056_v11 = vld [vmem:[#allocation11 + $0x194] ss:$8 sps:$4 sm:$0xff]  }
 0x376   :  { %5372 = vmatprep.subr.bf16.mxu0 %v7005_v13 }
 0x378   :  { %4934 = vmatpush1.bf16.msra.mxu1 %v6976_v14 }
 0x379   :  { %5373 = vmatpush1.bf16.msra.mxu0 %v7003_v15  ;;  %v7054_v15 = vld [vmem:[#allocation11 + $0x190] ss:$8 sps:$4 sm:$0xff]  }
 0x37a   :  { %5374 = vmatprep.subr.bf16.mxu0 %v7008_v17  ;;  %v7057_v17 = vld [vmem:[#allocation11 + $0x1a0] ss:$8 sps:$4 sm:$0xff]  }
 0x37b   :  { %4936 = vmatmul.mubr.bf16.vlgmr.msra.gmra.mrb[12].mxu1 %v7673_v42 }
 0x37d   :  { %5375 = vmatpush1.bf16.msra.mxu0 %v7006_v57  ;;  %v7062_v57 = vld [vmem:[#allocation11 + $0x1b4] ss:$8 sps:$4 sm:$0xff]  }
 0x37e   :  { %5376 = vmatprep.subr.bf16.mxu0 %v7011_v20  ;;  %v7060_v20 = vld [vmem:[#allocation11 + $0x1b0] ss:$8 sps:$4 sm:$0xff]  }
 0x381   :  { %5377 = vmatpush1.bf16.msra.mxu0 %v7009_v22  ;;  %v7065_v22 = vld [vmem:[#allocation11 + $0x1c4] ss:$8 sps:$4 sm:$0xff]  }
 0x382   :  { %5378 = vmatprep.subr.bf16.mxu0 %v7014_v46  ;;  %v7063_v46 = vld [vmem:[#allocation11 + $0x1c0] ss:$8 sps:$4 sm:$0xff]  }
 0x385   :  { %5379 = vmatpush1.bf16.msra.mxu0 %v7012_v24  ;;  %v7068_v24 = vld [vmem:[#allocation11 + $0x1d4] ss:$8 sps:$4 sm:$0xff]  }
 0x386   :  { %5380 = vmatprep.subr.bf16.mxu0 %v7017_v16  ;;  %v3327_v16 = vrot.slane %v7677_v31, %v563_v62  ;;  %v7076_v62 = vld [vmem:[%s7759_s7] sm:$0xff]  }
 0x389   :  { %5381 = vmatpush1.bf16.msra.mxu0 %v7015_v25  ;;  %v7066_v25 = vld [vmem:[#allocation11 + $0x1d0] ss:$8 sps:$4 sm:$0xff]  }
 0x38a   :  { %5382 = vmatprep.subr.bf16.mxu0 %v7020_v21  ;;  %v7071_v21 = vld [vmem:[#allocation11 + $0x1e4] ss:$8 sps:$4 sm:$0xff]  }
 0x38d   :  { %5383 = vmatpush1.bf16.msra.mxu0 %v7018_v26 }
 0x38e   :  { %5384 = vmatprep.subr.bf16.mxu0 %v7023_v53  ;;  %v7069_v53 = vld [vmem:[#allocation11 + $0x1e0] ss:$8 sps:$4 sm:$0xff]  }
 0x391   :  { %5385 = vmatpush1.bf16.msra.mxu0 %v7021_v27  ;;  %v7074_v27 = vld [vmem:[#allocation11 + $0x1f4] ss:$8 sps:$4 sm:$0xff]  }
 0x392   :  { %5386 = vmatprep.subr.bf16.mxu0 %v7026_v54 }
 0x395   :  { %5387 = vmatpush1.bf16.msra.mxu0 %v7024_v29  ;;  %v7072_v29 = vld [vmem:[#allocation11 + $0x1f0] ss:$8 sps:$4 sm:$0xff]  }
 0x396   :  { %5397 = vmatprep.subr.bf16.mxu0 %v7029_v30 }
 0x42b   :  { %v4773_v28 = vpop.f32.mrb[8].mxu0 }
 0x42c   :  { %v6506_v34 = vadd.f32 %v4773_v28, %v3319_v23  ;;  %v4775_v37 = vpop.f32.mrb[9].mxu0  ;;  %v7077_v23 = vld [vmem:[%s7759_s7 + $0x48] sm:$0xff]   ;;  %v7079_v28 = vld [vmem:[%s7759_s7 + $0x50] sm:$0xff]  }
 0x42d   :  { %v6507_v35 = vadd.f32 %v4775_v37, %v3323_v33  ;;  %v4777_v38 = vpop.f32.mrb[10].mxu0  ;;  %v7078_v33 = vld [vmem:[%s7759_s7 + $0x8] sm:$0xff]   ;;  %v7081_v37 = vld [vmem:[%s7759_s7 + $0x58] sm:$0xff]  }
 0x42e   :  { %vm4944_vm8 = vcmp.ge.f32.partialorder %v6506_v34, 0.0  ;;  %v4948_v39 = vmul.f32 0.01, %v6506_v34  ;;  %v4778_v40 = vpop.f32.mrb[11].mxu0  ;;  %v7083_v38 = vld [vmem:[%s7759_s7 + $0x60] sm:$0xff]  }
 0x42f   :  { %vm4945_vm9 = vcmp.ge.f32.partialorder %v6507_v35, 0.0  ;;  %v4949_v19 = vmul.f32 0.01, %v6507_v35  ;;  %v7085_v40 = vld [vmem:[%s7759_s7 + $0x68] sm:$0xff]  }
 0x430   :  { %v4952_v42 = vsel %vm4944_vm8, %v6506_v34, %v4948_v39  ;;  %v7080_v34 = vld [vmem:[%s7759_s7 + $0x10] sm:$0xff]   ;;  %v7084_v39 = vld [vmem:[%s7759_s7 + $0x20] sm:$0xff]  }
 0x431   :  { %v4953_v43 = vsel %vm4945_vm9, %v6507_v35, %v4949_v19  ;;  %v4956_v48 = vpack.c.bf16 %v4952_v42, %v4952_v42  ;;  %v7082_v35 = vld [vmem:[%s7759_s7 + $0x18] sm:$0xff]   ;;  %v7086_v19 = vld [vmem:[%s7759_s7 + $0x28] sm:$0xff]   ;;  %v7087_v42 = vld [vmem:[%s7759_s7 + $0x70] sm:$0xff]  }
 0x432   :  { %v4957_v45 = vpack.c.bf16 %v4953_v43, %v4953_v43  ;;  %v7088_v43 = vld [vmem:[%s7759_s7 + $0x30] sm:$0xff]  }
 0x434   :  { %5388 = vmatprep.mubr.bf16.mxu0 %v4957_v45  ;;  %v7089_v45 = vld [vmem:[%s7759_s7 + $0x78] sm:$0xff]  }
 0x435   :  { %5389 = vmatmul.mubr.bf16.vlgmr.msra.gmra.mrb[12].mxu0 %v4956_v48  ;;  %v7372_v48 = vmov 0.0  }
 0x436   :  { %5398 = vmatpush1.bf16.msra.mxu0 %v7027_v47  ;;  %v7090_v47 = vld [vmem:[%s7759_s7 + $0x38] sm:$0xff]   ;;  %6488 = vmatprep.subr.bf16.mxu1 %v7372_v48  ;;  %s7374_s7 = smov [#allocation19]  }
 0x437   :  { %5399 = vmatprep.subr.bf16.mxu0 %v7032_v49  ;;  %v5024_v49 = vld [vmem:[#allocation13] sm:$0x3]  ;;  %6492 = vmatprep.mubr.msk.bf16.mxu1 %vm7373_vm14, %v7372_v48  ;;  %s5718_s0 = sshll.u32 %s7374_s7, 4  ;;  %s5719_s0 = int_to_ptr.vmem [resolvable:$true] %s5718_s0 }
 0x438   :  { %s7318_s1 = scalar_lea.vmem %s5719_s0, 128  ;;  %p7323_p11 = scmp.lt.s32.totalorder %s5719_s0, %s5719_s0 }
 0x439   :  { %p7319_p10 = scmp.ne.s32.totalorder %s5719_s0, %s7318_s1  ;;  %p7324_p12 = scmp.lt.s32.totalorder %s7318_s1, %s7318_s1 }
 0x43a   :  { %5400 = vmatpush1.bf16.msra.mxu0 %v7030_v50  ;;  %v5029_v50 = vrot.slane %v5024_v49, %v7614_v61  ;;  %v7092_v61 = vld [vmem:[#allocation16 + $0x8] sm:$0xff]  }
 0x43b   :  { %5401 = vmatprep.subr.bf16.mxu0 %v7035_v51  ;;  %v5033_v51 = vrot.slane %v5024_v49, %v7619_v36  ;;  %p7325_p13 = por %p7324_p12, %p7323_p11 }
 0x43d   :  { %p7326_p0 = pnand %p7325_p13, %p7319_p10 }
 0x43e   :  { %5402 = vmatpush1.bf16.msra.mxu0 %v7033_v52 }
 0x43f   :  { %5403 = vmatprep.subr.bf16.mxu0 %v7038_v55 }
 0x442   :  { %5404 = vmatpush1.bf16.msra.mxu0 %v7036_v56 }
 0x443   :  { %5405 = vmatprep.subr.bf16.mxu0 %v7041_v59 }
 0x446   :  { %5406 = vmatpush1.bf16.msra.mxu0 %v7039_v60 }
 0x447   :  { %5407 = vmatprep.subr.bf16.mxu0 %v7044_v63 }
 0x44a   :  { %5408 = vmatpush1.bf16.msra.mxu0 %v7042_v0 }
 0x44b   :  { %5409 = vmatprep.subr.bf16.mxu0 %v7047_v9 }
 0x44e   :  { %5410 = vmatpush1.bf16.msra.mxu0 %v7045_v1  ;;  %v4937_v3 = vpop.f32.mrb[12].mxu1 }
 0x44f   :  { %v4939_v5 = vpop.f32.mrb[13].mxu1  ;;  %5411 = vmatprep.subr.bf16.mxu0 %v7050_v2  ;;  %v6508_v26 = vadd.f32 %v4937_v3, %v3327_v16 }
 0x450   :  { %v6509_v6 = vadd.f32 %v4939_v5, %v3331_v41  ;;  %v4941_v7 = vpop.f32.mrb[14].mxu1  ;;  %v6442_v5 = vld [vmem:[#allocation14] ss:$0 sm:$0xff] }
 0x451   :  { %v4942_v12 = vpop.f32.mrb[15].mxu1  ;;  %v4950_v54 = vmul.f32 0.01, %v6508_v26  ;;  %vm4946_vm11 = vcmp.ge.f32.partialorder %v6508_v26, 0.0 }
 0x452   :  { %vm4947_vm10 = vcmp.ge.f32.partialorder %v6509_v6, 0.0  ;;  %v4951_v8 = vmul.f32 0.01, %v6509_v6  ;;  %5412 = vmatpush1.bf16.msra.mxu0 %v7048_v4  ;;  %v7091_v4 = vld [vmem:[#allocation16] sm:$0xff]  }
 0x453   :  { %5413 = vmatprep.subr.bf16.mxu0 %v7053_v44  ;;  %v4954_v30 = vsel %vm4946_vm11, %v6508_v26, %v4950_v54  ;;  %6489 = vmatpush3.bf16.msra.mxu1 %v7091_v4  ;;  %v5690_v26 = vand.u32 127, %v553_v18 }
 0x454   :  { %v4955_v13 = vsel %vm4947_vm10, %v6509_v6, %v4951_v8  ;;  %v4958_v31 = vpack.c.bf16 %v4954_v30, %v4954_v30  ;;  %6490 = vmatprep.subr.bf16.mxu1 %v7372_v48 }
 0x455   :  { %v4959_v14 = vpack.c.bf16 %v4955_v13, %v4955_v13  ;;  %vm5691_vm1 = vcmp.ge.s32.totalorder %v5690_v26, 32  ;;  %vm5692_vm2 = vcmp.lt.s32.totalorder %v5690_v26, 64 }
 0x456   :  { %5414 = vmatpush1.bf16.msra.mxu0 %v7051_v10  ;;  %vm5693_vm3 = vmand %vm5691_vm1, %vm5692_vm2 }
 0x457   :  { %5429 = vmatprep.mubr.bf16.mxu0 %v4959_v14  ;;  %5415 = vmatprep.subr.bf16.mxu0 %v7056_v11  ;;  %v6459_v11 = vld [vmem:[#allocation17] ss:$0 sm:$0xff] }
 0x458   :  { %6491 = vmatpush3.bf16.msra.mxu1 %v7092_v61 }
 0x45a   :  { %5416 = vmatpush1.bf16.msra.mxu0 %v7054_v15 }
 0x45b   :  { %5417 = vmatprep.subr.bf16.mxu0 %v7059_v32 }
 0x45e   :  { %5418 = vmatpush1.bf16.msra.mxu0 %v7057_v17 }
 0x45f   :  { %5419 = vmatprep.subr.bf16.mxu0 %v7062_v57 }
 0x462   :  { %5420 = vmatpush1.bf16.msra.mxu0 %v7060_v20 }
 0x463   :  { %5421 = vmatprep.subr.bf16.mxu0 %v7065_v22 }
 0x466   :  { %5422 = vmatpush1.bf16.msra.mxu0 %v7063_v46 }
 0x467   :  { %5423 = vmatprep.subr.bf16.mxu0 %v7068_v24 }
 0x46a   :  { %5424 = vmatpush1.bf16.msra.mxu0 %v7066_v25 }
 0x46b   :  { %5425 = vmatprep.subr.bf16.mxu0 %v7071_v21 }
 0x46e   :  { %5426 = vmatpush1.bf16.msra.mxu0 %v7069_v53 }
 0x46f   :  { %5427 = vmatprep.subr.bf16.mxu0 %v7074_v27 }
 0x472   :  { %5428 = vmatpush1.bf16.msra.mxu0 %v7072_v29 }
 0x473   :  { %6463 = vmatprep.subr.bf16.mxu0 %v7075_v58 }
 0x475   :  { %5430 = vmatmul.mubr.bf16.vlgmr.msra.gmra.mrb[12].mxu0 %v4958_v31 }
 0x476   :  { %6464 = vmatpush3.bf16.msra.mxu0 %v7076_v62 }
 0x477   :  { %6465 = vmatprep.subr.bf16.mxu0 %v7077_v23 }
 0x47a   :  { %6466 = vmatpush3.bf16.msra.mxu0 %v7078_v33 }
 0x47b   :  { %6467 = vmatprep.subr.bf16.mxu0 %v7079_v28 }
 0x47e   :  { %6468 = vmatpush3.bf16.msra.mxu0 %v7080_v34 }
 0x47f   :  { %6469 = vmatprep.subr.bf16.mxu0 %v7081_v37 }
 0x482   :  { %6470 = vmatpush3.bf16.msra.mxu0 %v7082_v35 }
 0x483   :  { %6471 = vmatprep.subr.bf16.mxu0 %v7083_v38 }
 0x486   :  { %6472 = vmatpush3.bf16.msra.mxu0 %v7084_v39 }
 0x487   :  { %6473 = vmatprep.subr.bf16.mxu0 %v7085_v40 }
 0x48a   :  { %6474 = vmatpush3.bf16.msra.mxu0 %v7086_v19 }
 0x48b   :  { %6475 = vmatprep.subr.bf16.mxu0 %v7087_v42 }
 0x48e   :  { %6476 = vmatpush3.bf16.msra.mxu0 %v7088_v43 }
 0x48f   :  { %6477 = vmatprep.subr.bf16.mxu0 %v7089_v45 }
 0x492   :  { %6478 = vmatpush3.bf16.msra.mxu0 %v7090_v47 }
 0x548   :  { %v5431_v52 = vpop.f32.mrb[12].mxu0 }
 0x549   :  { %v6510_v55 = vadd.f32 %v5431_v52, %v5029_v50  ;;  %v5433_v56 = vpop.f32.mrb[13].mxu0 }
 0x54a   :  { %v6511_v59 = vadd.f32 %v5433_v56, %v5033_v51  ;;  %v5435_v60 = vpop.f32.mrb[14].mxu0 }
 0x54b   :  { %vm5438_vm12 = vcmp.ge.f32.partialorder %v6510_v55, 0.0  ;;  %v5440_v63 = vmul.f32 0.01, %v6510_v55  ;;  %v5436_v0 = vpop.f32.mrb[15].mxu0 }
 0x54c   :  { %vm5439_vm13 = vcmp.ge.f32.partialorder %v6511_v59, 0.0  ;;  %v5441_v9 = vmul.f32 0.01, %v6511_v59 }
 0x54d   :  { %v5442_v1 = vsel %vm5438_vm12, %v6510_v55, %v5440_v63 }
 0x54e   :  { %v5443_v2 = vsel %vm5439_vm13, %v6511_v59, %v5441_v9  ;;  %v5444_v3 = vpack.c.bf16 %v5442_v1, %v5442_v1 }
 0x54f   :  { %v5445_v41 = vpack.c.bf16 %v5443_v2, %v5443_v2 }
 0x551   :  { %5613 = vmatprep.mubr.bf16.mxu0 %v5445_v41 }
 0x552   :  { %5614 = vmatmul.mubr.bf16.vlgmr.msra.gmra.mrb[16].mxu0 %v5444_v3 }
 0x625   :  { %v6479_v36 = vpop.f32.mrb[16].mxu0 }
 0x626   :  { %v6480_v44 = vpop.f32.mrb[17].mxu0 }
 0x627   :  { %v6481_v6 = vadd.f32 %v6480_v44, %v6479_v36  ;;  %v6482_v7 = vpop.f32.mrb[18].mxu0 }
 0x628   :  { %v6483_v12 = vpop.f32.mrb[19].mxu0 }
 0x629   :  { %v5616_v8 = vadd.f32 %v6481_v6, %v6442_v5 }
 0x62b   :  { %v5621_v10 = vpack.c.bf16 %v5616_v8, %v5616_v8 }
 0x62d   :  { %6493 = vmatmul.mubr.msk.bf16.vlgmr.msra.gmra.mrb[16].mxu1 %vm5645_vm15, %v5621_v10 }
 0x700   :  { %v5683_v13 = vpop.f32.mrb[16].mxu1 }
 0x701   :  { %v5684_v14 = vadd.f32 %v6459_v11, %v5683_v13  ;;  %v6494_v15 = vpop.f32.mrb[17].mxu1 }
 0x702   :  { %v5686_v32 = vpop.f32.mrb[18].mxu1 }
 0x703   :  { %v5695_v17 = vand.u32 2147483647, %v5684_v14  ;;  %v6495_v57 = vpop.f32.mrb[19].mxu1  ;;  %v5694_v29 = vmax.f32 %v5684_v14, 0.0 }
 0x705   :  { %v5696_v20 = vsub.f32 0.0, %v5695_v17 }
 0x707   :  { %v5697_v22 = vmul.f32 1.442695, %v5696_v20 }
 0x709   :  { %7093 = vpow2.f32 %v5697_v22 }
 0x713   :  { %v7094_v46 = vpop.eup %7093 }
 0x714   :  { %v5699_v24 = vadd.f32 1.0, %v7094_v46  ;;  %v5702_v16 = vmul.f32 -0.5, %v7094_v46  ;;  %v5705_v21 = vand.u32 2147483647, %v7094_v46 }
 0x716   :  { %7095 = vlog2.f32 %v5699_v24  ;;  %v5703_v25 = vadd.f32 1.0, %v5702_v16  ;;  %vm5706_vm0 = vcmp.lt.f32.partialorder %v5705_v21, 0.0004427343 }
 0x718   :  { %v5704_v54 = vmul.f32 %v7094_v46, %v5703_v25 }
 0x720   :  { %v7096_v53 = vpop.eup %7095 }
 0x721   :  { %v5701_v27 = vmul.f32 0.6931472, %v7096_v53 }
 0x723   :  { %v5707_v58 = vsel %vm5706_vm0, %v5704_v54, %v5701_v27 }
 0x724   :  { %v5708_v30 = vadd.f32 %v5707_v58, %v5694_v29 }
 0x726   :  { %v5709_v62 = vadd.f32 1e-07, %v5708_v30 }
 0x728   :  { %v5710_v31 = vsel %vm5693_vm3, %v5709_v62, %v5684_v14 }
 0x729   :  { %5711 = vst [vmem:[#allocation19] sm:$0xff] %v5710_v31 }
 0x72a   :  { %7329 = shalt.err (!%p7326_p0)
}
 0x72b   :  { %s7330_s15 = scalar_lea.hbm %s7763_s11, 128 }
 0x72c   :  { %p7331_p1 = scmp.ne.s32.totalorder %s7763_s11, %s7330_s15  ;;  %p7334_p2 = scmp.lt.u32.totalorder %s7330_s15, %s7763_s11 }
 0x72e   :  { %p7336_p3 = pnand %p7334_p2, %p7331_p1 }
 0x730   :  { %7339 = shalt.err (!%p7336_p3)
}
 0x731   :  { %5721 = dma.vmem_to_hbm [thread:$0]  %s5719_s0, 128, %s7763_s11, [#allocation4]  }
 0x732   :  { %7352 = dma.done.wait [#allocation4], 128  }
 0x733   :  { %7353 = vsyncadd [#allocation4], 4294967168 }
 0x734   :  { %5725 = vsyncpa [#allocation3], 1 }
 0x735   :  { %5726 = vsyncpa [#allocation6], 1 }
 0x736   :  { %5727 = vsyncpa [#allocation9], 1 }
 0x737   :  { %5728 = vsyncpa [#allocation12], 1 }
 0x738   :  { %5729 = vsyncpa [#allocation15], 1 }
 0x739   :  { %5730 = vsyncpa [#allocation18], 1 }
 0x73a   :  { %5731 = vsyncpa [#allocation4], 1 }

</bundles_post_ra>
